<compile_context>
chip_gen: v7x
topology: tpu7x:2x2x1
jax: 0.10.0
libtpu: 0.0.40
codegen_flags: <defaults>
</compile_context>

<pallas_src>
import numpy as np
import jax
import jax.numpy as jnp
from jax.experimental import pallas as pl
from jax.experimental.pallas import tpu as pltpu


# ----------------------------- fused Pallas kernel ---------------------------
def _critic_fused_kernel(xc_ref, w0_ref, b0_ref,
                         s1_ref, w1_ref, b1_ref,
                         s2_ref, w2_ref, b2_ref,
                         s3_ref, w3_ref, b3_ref,
                         w4_ref, b4_ref, out_ref):
    f32 = jnp.float32

    # conv0 (+bias+ReLU): one matmul against the host-built im2col matrix.
    a = jnp.dot(xc_ref[...], w0_ref[...], preferred_element_type=f32)
    a = jnp.maximum(a + b0_ref[...], 0.0)

    # conv1, conv2 and fc0 in tap-sum form: relu( sum_t (S_t @ A) @ W_t + b ).
    # S_t are constant 0/1 row-selection matrices => exact in-kernel "im2col";
    # every op below is a plain 2-D MXU dot or a VPU add/max.
    for s_ref, w_ref, b_ref in ((s1_ref, w1_ref, b1_ref),
                                (s2_ref, w2_ref, b2_ref),
                                (s3_ref, w3_ref, b3_ref)):
        taps, m_out, _ = s_ref.shape
        cout = w_ref.shape[2]
        acc = jnp.zeros((m_out, cout), f32) + b_ref[...]
        for t in range(taps):                       # static unroll
            rows = jnp.dot(s_ref[t], a, preferred_element_type=f32)
            acc = acc + jnp.dot(rows, w_ref[t], preferred_element_type=f32)
        a = jnp.maximum(acc, 0.0)

    # fc1 epilogue (no ReLU).
    out = jnp.dot(a, w4_ref[...], preferred_element_type=f32) + b4_ref[...]
    out_ref[...] = out.astype(out_ref.dtype)


def _full_spec(shape):
    zeros = (0,) * len(shape)
    return pl.BlockSpec(shape, lambda i, _z=zeros: _z)


# ------------------------------ host-side glue --------------------------------
def _im2col(x, kh, kw, stride):
    """x: (N, C, H, W) NCHW -> (N*Ho*Wo, C*kh*kw), C outer / (kh,kw) inner."""
    n, c, h, w = x.shape
    ho = (h - kh) // stride + 1
    wo = (w - kw) // stride + 1
    cols = []
    for i in range(kh):
        for j in range(kw):
            cols.append(x[:, :, i:i + stride * ho:stride, j:j + stride * wo:stride])
    cols = jnp.stack(cols, axis=2)                  # (N, C, kh*kw, Ho, Wo)
    cols = cols.reshape(n, c * kh * kw, ho, wo)
    cols = cols.transpose(0, 2, 3, 1).reshape(n * ho * wo, c * kh * kw)
    return cols


def _selectors(n, hi, wi, kh, kw, stride):
    """0/1 row-selection matrices: sel[t] @ A gathers the rows of the previous
    activation matrix (rows ordered (n, h, w)) needed for kernel tap t."""
    ho = (hi - kh) // stride + 1
    wo = (wi - kw) // stride + 1
    sel = np.zeros((kh * kw, n * ho * wo, n * hi * wi), np.float32)
    for i in range(kh):
        for j in range(kw):
            t = i * kw + j
            for b in range(n):
                for oh in range(ho):
                    for ow in range(wo):
                        r = b * ho * wo + oh * wo + ow
                        c = b * hi * wi + (stride * oh + i) * wi + (stride * ow + j)
                        sel[t, r, c] = 1.0
    return jnp.asarray(sel)


def pack_params(params, input_size, batch):
    """One-time packing of torch-layout params into kernel-ready operands."""
    c_in, h, w = input_size
    h0, w0 = (h - 8) // 4 + 1, (w - 8) // 4 + 1     # conv0 output spatial
    h1, w1 = (h0 - 4) // 2 + 1, (w0 - 4) // 2 + 1   # conv1 output spatial
    h2, w2 = (h1 - 3) // 1 + 1, (w1 - 3) // 1 + 1   # conv2 output spatial

    p = {}
    # conv0: single matmul against host im2col (columns: Cin outer, kxk inner).
    p["w0"] = params["conv0_w"].reshape(32, c_in * 8 * 8).T          # (Cin*64, 32)
    p["b0"] = params["conv0_b"].reshape(1, 32)
    # conv1 / conv2: per-tap (Cin, Cout) slabs, tap index t = i*kw + j.
    p["w1"] = jnp.transpose(params["conv1_w"], (2, 3, 1, 0)).reshape(16, 32, 64)
    p["b1"] = params["conv1_b"].reshape(1, 64)
    p["w2"] = jnp.transpose(params["conv2_w"], (2, 3, 1, 0)).reshape(9, 64, 64)
    p["b2"] = params["conv2_b"].reshape(1, 64)
    # fc0 re-indexed to consume the in-kernel (N*h2*w2, 64) activation matrix:
    # torch flat index = c*h2*w2 + h*w2 + w  ->  tap (h, w), channel c.
    p["w3"] = jnp.transpose(params["fc0_w"].reshape(256, 64, h2, w2),
                            (2, 3, 1, 0)).reshape(h2 * w2, 64, 256)
    p["b3"] = params["fc0_b"].reshape(1, 256)
    # fc1 fused as the kernel epilogue.
    p["w4"] = params["fc1_w"].T
    p["b4"] = params["fc1_b"].reshape(1, -1)
    # Constant 0/1 selection matrices ("in-kernel im2col").
    p["s1"] = _selectors(batch, h0, w0, 4, 4, 2)     # (16, N*16, N*100)
    p["s2"] = _selectors(batch, h1, w1, 3, 3, 1)     # (9,  N*4,  N*16)
    p["s3"] = _selectors(batch, h2, w2, h2, w2, 1)   # fc0 as a full-window conv
    return p


# ------------------------------ forward pass ----------------------------------
def convolutional_critic_forward(packed, x):
    """x: (N, C, H, W) float32 -> (N, output_size) float32."""
    xc = _im2col(x, 8, 8, 4)                         # (N*Ho*Wo, C*64) = (200, 256)
    args = (xc,
            packed["w0"], packed["b0"],
            packed["s1"], packed["w1"], packed["b1"],
            packed["s2"], packed["w2"], packed["b2"],
            packed["s3"], packed["w3"], packed["b3"],
            packed["w4"], packed["b4"])
    n = x.shape[0]
    out_dim = packed["w4"].shape[1]
    return pl.pallas_call(
        _critic_fused_kernel,
        out_shape=jax.ShapeDtypeStruct((n, out_dim), jnp.float32),
        grid=(1,),
        in_specs=[_full_spec(a.shape) for a in args],
        out_specs=_full_spec((n, out_dim)),
        compiler_params=pltpu.CompilerParams(dimension_semantics=("arbitrary",)),
    )(*args)
    # TODO(synk): for large RL batches, tile the batch over a "parallel" grid
    # axis (per-tile selectors) instead of whole-batch selection matrices.


# --------------------------- parameter init (torch-like) ----------------------
def _uniform_init(key, shape, fan_in):
    bound = 1.0 / (fan_in ** 0.5)
    return jax.random.uniform(key, shape, jnp.float32, -bound, bound)


def init_params(key, input_size, output_size):
    c_in, size_x, size_y = input_size
    conv_cfg = [(c_in, 32, 8, 4), (32, 64, 4, 2), (64, 64, 3, 1)]
    params = {}
    keys = jax.random.split(key, 10)
    ki = 0
    for idx, (ci, co, k, s) in enumerate(conv_cfg):
        fan_in = ci * k * k
        params[f"conv{idx}_w"] = _uniform_init(keys[ki], (co, ci, k, k), fan_in); ki += 1
        params[f"conv{idx}_b"] = _uniform_init(keys[ki], (co,), fan_in); ki += 1
        size_x = (size_x - k) // s + 1
        size_y = (size_y - k) // s + 1
    flat = size_x * size_y * 64
    params["fc0_w"] = _uniform_init(keys[ki], (256, flat), flat); ki += 1
    params["fc0_b"] = _uniform_init(keys[ki], (256,), flat); ki += 1
    params["fc1_w"] = _uniform_init(keys[ki], (output_size, 256), 256); ki += 1
    params["fc1_b"] = _uniform_init(keys[ki], (output_size,), 256); ki += 1
    return params


# ------------------------- pure-JAX reference check ---------------------------
def _reference_forward(params, x):
    def conv(x, w, b, s):
        y = jax.lax.conv_general_dilated(
            x, w, window_strides=(s, s), padding="VALID",
            dimension_numbers=("NCHW", "OIHW", "NCHW"))
        return jax.nn.relu(y + b[None, :, None, None])
    x = conv(x, params["conv0_w"], params["conv0_b"], 4)
    x = conv(x, params["conv1_w"], params["conv1_b"], 2)
    x = conv(x, params["conv2_w"], params["conv2_b"], 1)
    x = x.reshape(x.shape[0], -1)
    x = jax.nn.relu(x @ params["fc0_w"].T + params["fc0_b"])
    x = x @ params["fc1_w"].T + params["fc1_b"]
    return x


if __name__ == "__main__":
    input_size = (4, 44, 44)   # (C, H, W) -> conv stack yields 2x2x64 = 256 flat
    output_size = 1            # critic value
    batch = 2

    key = jax.random.PRNGKey(0)
    k_params, k_x = jax.random.split(key)
    params = init_params(k_params, input_size, output_size)
    packed = pack_params(params, input_size, batch)
    x = jax.random.normal(k_x, (batch,) + input_size, jnp.float32)

    fwd = jax.jit(convolutional_critic_forward)
    out = jax.block_until_ready(fwd(packed, x))
    assert out.shape == (batch, output_size), out.shape

    ref = _reference_forward(params, x)
    assert jnp.allclose(out, ref, atol=1e-4, rtol=1e-4), (out, ref)

    print("KERNEL_OK")
</pallas_src>

<mosaic_0001>
module attributes {stable_mosaic.version = 11 : i64} {
  func.func @_critic_fused_kernel(%arg0: i32, %arg1: memref<200x256xf32, #tpu.memory_space<vmem>>, %arg2: memref<256x32xf32, #tpu.memory_space<vmem>>, %arg3: memref<1x32xf32, #tpu.memory_space<vmem>>, %arg4: memref<16x32x200xf32, #tpu.memory_space<vmem>>, %arg5: memref<16x32x64xf32, #tpu.memory_space<vmem>>, %arg6: memref<1x64xf32, #tpu.memory_space<vmem>>, %arg7: memref<9x8x32xf32, #tpu.memory_space<vmem>>, %arg8: memref<9x64x64xf32, #tpu.memory_space<vmem>>, %arg9: memref<1x64xf32, #tpu.memory_space<vmem>>, %arg10: memref<4x2x8xf32, #tpu.memory_space<vmem>>, %arg11: memref<4x64x256xf32, #tpu.memory_space<vmem>>, %arg12: memref<1x256xf32, #tpu.memory_space<vmem>>, %arg13: memref<256x1xf32, #tpu.memory_space<vmem>>, %arg14: memref<1x1xf32, #tpu.memory_space<vmem>>, %arg15: memref<2x1xf32, #tpu.memory_space<vmem>>) attributes {dimension_semantics = [#tpu.dimension_semantics<arbitrary>], iteration_bounds = array<i64: 1>, scalar_prefetch = 0 : i64, scratch_operands = 0 : i64, tpu.core_type = #tpu.core_type<tc>, window_params = [{pipeline_mode = #tpu.pipeline_mode<synchronous>, transform_indices = @transform_0, window_bounds = array<i64: 200, 256>}, {pipeline_mode = #tpu.pipeline_mode<synchronous>, transform_indices = @transform_1, window_bounds = array<i64: 256, 32>}, {pipeline_mode = #tpu.pipeline_mode<synchronous>, transform_indices = @transform_2, window_bounds = array<i64: 1, 32>}, {pipeline_mode = #tpu.pipeline_mode<synchronous>, transform_indices = @transform_3, window_bounds = array<i64: 16, 32, 200>}, {pipeline_mode = #tpu.pipeline_mode<synchronous>, transform_indices = @transform_4, window_bounds = array<i64: 16, 32, 64>}, {pipeline_mode = #tpu.pipeline_mode<synchronous>, transform_indices = @transform_5, window_bounds = array<i64: 1, 64>}, {pipeline_mode = #tpu.pipeline_mode<synchronous>, transform_indices = @transform_6, window_bounds = array<i64: 9, 8, 32>}, {pipeline_mode = #tpu.pipeline_mode<synchronous>, transform_indices = @transform_7, window_bounds = array<i64: 9, 64, 64>}, {pipeline_mode = #tpu.pipeline_mode<synchronous>, transform_indices = @transform_8, window_bounds = array<i64: 1, 64>}, {pipeline_mode = #tpu.pipeline_mode<synchronous>, transform_indices = @transform_9, window_bounds = array<i64: 4, 2, 8>}, {pipeline_mode = #tpu.pipeline_mode<synchronous>, transform_indices = @transform_10, window_bounds = array<i64: 4, 64, 256>}, {pipeline_mode = #tpu.pipeline_mode<synchronous>, transform_indices = @transform_11, window_bounds = array<i64: 1, 256>}, {pipeline_mode = #tpu.pipeline_mode<synchronous>, transform_indices = @transform_12, window_bounds = array<i64: 256, 1>}, {pipeline_mode = #tpu.pipeline_mode<synchronous>, transform_indices = @transform_13, window_bounds = array<i64: 1, 1>}, {pipeline_mode = #tpu.pipeline_mode<synchronous>, transform_indices = @transform_14, window_bounds = array<i64: 2, 1>}]} {
    %c0 = arith.constant 0 : index
    %c0_0 = arith.constant 0 : index
    %0 = vector.load %arg1[%c0, %c0_0] : memref<200x256xf32, #tpu.memory_space<vmem>>, vector<200x256xf32>
    %c0_1 = arith.constant 0 : index
    %c0_2 = arith.constant 0 : index
    %1 = vector.load %arg2[%c0_1, %c0_2] : memref<256x32xf32, #tpu.memory_space<vmem>>, vector<256x32xf32>
    %cst = arith.constant dense<0.000000e+00> : vector<200x32xf32>
    %2 = tpu.matmul %0, %1, %cst {dimension_numbers = #tpu.dot_dimension_numbers<[1], [0], [0], [1], [0, 0, 1, 1], [], []>} : vector<200x256xf32>, vector<256x32xf32>, vector<200x32xf32> -> vector<200x32xf32>
    %c0_3 = arith.constant 0 : index
    %c0_4 = arith.constant 0 : index
    %3 = vector.load %arg3[%c0_3, %c0_4] : memref<1x32xf32, #tpu.memory_space<vmem>>, vector<1x32xf32>
    %4 = vector.broadcast %3 : vector<1x32xf32> to vector<200x32xf32>
    %5 = arith.addf %2, %4 : vector<200x32xf32>
    %cst_5 = arith.constant 0.000000e+00 : f32
    %6 = vector.broadcast %cst_5 : f32 to vector<200x32xf32>
    %7 = arith.maximumf %5, %6 : vector<200x32xf32>
    %cst_6 = arith.constant 0.000000e+00 : f32
    %8 = vector.broadcast %cst_6 : f32 to vector<32x64xf32>
    %c0_7 = arith.constant 0 : index
    %c0_8 = arith.constant 0 : index
    %9 = vector.load %arg6[%c0_7, %c0_8] : memref<1x64xf32, #tpu.memory_space<vmem>>, vector<1x64xf32>
    %10 = vector.broadcast %9 : vector<1x64xf32> to vector<32x64xf32>
    %11 = arith.addf %8, %10 : vector<32x64xf32>
    %c0_9 = arith.constant 0 : index
    %c0_10 = arith.constant 0 : index
    %c0_11 = arith.constant 0 : index
    %12 = vector.load %arg4[%c0_9, %c0_10, %c0_11] : memref<16x32x200xf32, #tpu.memory_space<vmem>>, vector<1x32x200xf32>
    %13 = vector.shape_cast %12 : vector<1x32x200xf32> to vector<32x200xf32>
    %cst_12 = arith.constant dense<0.000000e+00> : vector<32x32xf32>
    %14 = tpu.matmul %13, %7, %cst_12 {dimension_numbers = #tpu.dot_dimension_numbers<[1], [0], [0], [1], [0, 0, 1, 1], [], []>} : vector<32x200xf32>, vector<200x32xf32>, vector<32x32xf32> -> vector<32x32xf32>
    %c0_13 = arith.constant 0 : index
    %c0_14 = arith.constant 0 : index
    %c0_15 = arith.constant 0 : index
    %15 = vector.load %arg5[%c0_13, %c0_14, %c0_15] : memref<16x32x64xf32, #tpu.memory_space<vmem>>, vector<1x32x64xf32>
    %16 = vector.shape_cast %15 : vector<1x32x64xf32> to vector<32x64xf32>
    %cst_16 = arith.constant dense<0.000000e+00> : vector<32x64xf32>
    %17 = tpu.matmul %14, %16, %cst_16 {dimension_numbers = #tpu.dot_dimension_numbers<[1], [0], [0], [1], [0, 0, 1, 1], [], []>} : vector<32x32xf32>, vector<32x64xf32>, vector<32x64xf32> -> vector<32x64xf32>
    %18 = arith.addf %11, %17 : vector<32x64xf32>
    %c1 = arith.constant 1 : index
    %c0_17 = arith.constant 0 : index
    %c0_18 = arith.constant 0 : index
    %19 = vector.load %arg4[%c1, %c0_17, %c0_18] : memref<16x32x200xf32, #tpu.memory_space<vmem>>, vector<1x32x200xf32>
    %20 = vector.shape_cast %19 : vector<1x32x200xf32> to vector<32x200xf32>
    %cst_19 = arith.constant dense<0.000000e+00> : vector<32x32xf32>
    %21 = tpu.matmul %20, %7, %cst_19 {dimension_numbers = #tpu.dot_dimension_numbers<[1], [0], [0], [1], [0, 0, 1, 1], [], []>} : vector<32x200xf32>, vector<200x32xf32>, vector<32x32xf32> -> vector<32x32xf32>
    %c1_20 = arith.constant 1 : index
    %c0_21 = arith.constant 0 : index
    %c0_22 = arith.constant 0 : index
    %22 = vector.load %arg5[%c1_20, %c0_21, %c0_22] : memref<16x32x64xf32, #tpu.memory_space<vmem>>, vector<1x32x64xf32>
    %23 = vector.shape_cast %22 : vector<1x32x64xf32> to vector<32x64xf32>
    %cst_23 = arith.constant dense<0.000000e+00> : vector<32x64xf32>
    %24 = tpu.matmul %21, %23, %cst_23 {dimension_numbers = #tpu.dot_dimension_numbers<[1], [0], [0], [1], [0, 0, 1, 1], [], []>} : vector<32x32xf32>, vector<32x64xf32>, vector<32x64xf32> -> vector<32x64xf32>
    %25 = arith.addf %18, %24 : vector<32x64xf32>
    %c2 = arith.constant 2 : index
    %c0_24 = arith.constant 0 : index
    %c0_25 = arith.constant 0 : index
    %26 = vector.load %arg4[%c2, %c0_24, %c0_25] : memref<16x32x200xf32, #tpu.memory_space<vmem>>, vector<1x32x200xf32>
    %27 = vector.shape_cast %26 : vector<1x32x200xf32> to vector<32x200xf32>
    %cst_26 = arith.constant dense<0.000000e+00> : vector<32x32xf32>
    %28 = tpu.matmul %27, %7, %cst_26 {dimension_numbers = #tpu.dot_dimension_numbers<[1], [0], [0], [1], [0, 0, 1, 1], [], []>} : vector<32x200xf32>, vector<200x32xf32>, vector<32x32xf32> -> vector<32x32xf32>
    %c2_27 = arith.constant 2 : index
    %c0_28 = arith.constant 0 : index
    %c0_29 = arith.constant 0 : index
    %29 = vector.load %arg5[%c2_27, %c0_28, %c0_29] : memref<16x32x64xf32, #tpu.memory_space<vmem>>, vector<1x32x64xf32>
    %30 = vector.shape_cast %29 : vector<1x32x64xf32> to vector<32x64xf32>
    %cst_30 = arith.constant dense<0.000000e+00> : vector<32x64xf32>
    %31 = tpu.matmul %28, %30, %cst_30 {dimension_numbers = #tpu.dot_dimension_numbers<[1], [0], [0], [1], [0, 0, 1, 1], [], []>} : vector<32x32xf32>, vector<32x64xf32>, vector<32x64xf32> -> vector<32x64xf32>
    %32 = arith.addf %25, %31 : vector<32x64xf32>
    %c3 = arith.constant 3 : index
    %c0_31 = arith.constant 0 : index
    %c0_32 = arith.constant 0 : index
    %33 = vector.load %arg4[%c3, %c0_31, %c0_32] : memref<16x32x200xf32, #tpu.memory_space<vmem>>, vector<1x32x200xf32>
    %34 = vector.shape_cast %33 : vector<1x32x200xf32> to vector<32x200xf32>
    %cst_33 = arith.constant dense<0.000000e+00> : vector<32x32xf32>
    %35 = tpu.matmul %34, %7, %cst_33 {dimension_numbers = #tpu.dot_dimension_numbers<[1], [0], [0], [1], [0, 0, 1, 1], [], []>} : vector<32x200xf32>, vector<200x32xf32>, vector<32x32xf32> -> vector<32x32xf32>
    %c3_34 = arith.constant 3 : index
    %c0_35 = arith.constant 0 : index
    %c0_36 = arith.constant 0 : index
    %36 = vector.load %arg5[%c3_34, %c0_35, %c0_36] : memref<16x32x64xf32, #tpu.memory_space<vmem>>, vector<1x32x64xf32>
    %37 = vector.shape_cast %36 : vector<1x32x64xf32> to vector<32x64xf32>
    %cst_37 = arith.constant dense<0.000000e+00> : vector<32x64xf32>
    %38 = tpu.matmul %35, %37, %cst_37 {dimension_numbers = #tpu.dot_dimension_numbers<[1], [0], [0], [1], [0, 0, 1, 1], [], []>} : vector<32x32xf32>, vector<32x64xf32>, vector<32x64xf32> -> vector<32x64xf32>
    %39 = arith.addf %32, %38 : vector<32x64xf32>
    %c4 = arith.constant 4 : index
    %c0_38 = arith.constant 0 : index
    %c0_39 = arith.constant 0 : index
    %40 = vector.load %arg4[%c4, %c0_38, %c0_39] : memref<16x32x200xf32, #tpu.memory_space<vmem>>, vector<1x32x200xf32>
    %41 = vector.shape_cast %40 : vector<1x32x200xf32> to vector<32x200xf32>
    %cst_40 = arith.constant dense<0.000000e+00> : vector<32x32xf32>
    %42 = tpu.matmul %41, %7, %cst_40 {dimension_numbers = #tpu.dot_dimension_numbers<[1], [0], [0], [1], [0, 0, 1, 1], [], []>} : vector<32x200xf32>, vector<200x32xf32>, vector<32x32xf32> -> vector<32x32xf32>
    %c4_41 = arith.constant 4 : index
    %c0_42 = arith.constant 0 : index
    %c0_43 = arith.constant 0 : index
    %43 = vector.load %arg5[%c4_41, %c0_42, %c0_43] : memref<16x32x64xf32, #tpu.memory_space<vmem>>, vector<1x32x64xf32>
    %44 = vector.shape_cast %43 : vector<1x32x64xf32> to vector<32x64xf32>
    %cst_44 = arith.constant dense<0.000000e+00> : vector<32x64xf32>
    %45 = tpu.matmul %42, %44, %cst_44 {dimension_numbers = #tpu.dot_dimension_numbers<[1], [0], [0], [1], [0, 0, 1, 1], [], []>} : vector<32x32xf32>, vector<32x64xf32>, vector<32x64xf32> -> vector<32x64xf32>
    %46 = arith.addf %39, %45 : vector<32x64xf32>
    %c5 = arith.constant 5 : index
    %c0_45 = arith.constant 0 : index
    %c0_46 = arith.constant 0 : index
    %47 = vector.load %arg4[%c5, %c0_45, %c0_46] : memref<16x32x200xf32, #tpu.memory_space<vmem>>, vector<1x32x200xf32>
    %48 = vector.shape_cast %47 : vector<1x32x200xf32> to vector<32x200xf32>
    %cst_47 = arith.constant dense<0.000000e+00> : vector<32x32xf32>
    %49 = tpu.matmul %48, %7, %cst_47 {dimension_numbers = #tpu.dot_dimension_numbers<[1], [0], [0], [1], [0, 0, 1, 1], [], []>} : vector<32x200xf32>, vector<200x32xf32>, vector<32x32xf32> -> vector<32x32xf32>
    %c5_48 = arith.constant 5 : index
    %c0_49 = arith.constant 0 : index
    %c0_50 = arith.constant 0 : index
    %50 = vector.load %arg5[%c5_48, %c0_49, %c0_50] : memref<16x32x64xf32, #tpu.memory_space<vmem>>, vector<1x32x64xf32>
    %51 = vector.shape_cast %50 : vector<1x32x64xf32> to vector<32x64xf32>
    %cst_51 = arith.constant dense<0.000000e+00> : vector<32x64xf32>
    %52 = tpu.matmul %49, %51, %cst_51 {dimension_numbers = #tpu.dot_dimension_numbers<[1], [0], [0], [1], [0, 0, 1, 1], [], []>} : vector<32x32xf32>, vector<32x64xf32>, vector<32x64xf32> -> vector<32x64xf32>
    %53 = arith.addf %46, %52 : vector<32x64xf32>
    %c6 = arith.constant 6 : index
    %c0_52 = arith.constant 0 : index
    %c0_53 = arith.constant 0 : index
    %54 = vector.load %arg4[%c6, %c0_52, %c0_53] : memref<16x32x200xf32, #tpu.memory_space<vmem>>, vector<1x32x200xf32>
    %55 = vector.shape_cast %54 : vector<1x32x200xf32> to vector<32x200xf32>
    %cst_54 = arith.constant dense<0.000000e+00> : vector<32x32xf32>
    %56 = tpu.matmul %55, %7, %cst_54 {dimension_numbers = #tpu.dot_dimension_numbers<[1], [0], [0], [1], [0, 0, 1, 1], [], []>} : vector<32x200xf32>, vector<200x32xf32>, vector<32x32xf32> -> vector<32x32xf32>
    %c6_55 = arith.constant 6 : index
    %c0_56 = arith.constant 0 : index
    %c0_57 = arith.constant 0 : index
    %57 = vector.load %arg5[%c6_55, %c0_56, %c0_57] : memref<16x32x64xf32, #tpu.memory_space<vmem>>, vector<1x32x64xf32>
    %58 = vector.shape_cast %57 : vector<1x32x64xf32> to vector<32x64xf32>
    %cst_58 = arith.constant dense<0.000000e+00> : vector<32x64xf32>
    %59 = tpu.matmul %56, %58, %cst_58 {dimension_numbers = #tpu.dot_dimension_numbers<[1], [0], [0], [1], [0, 0, 1, 1], [], []>} : vector<32x32xf32>, vector<32x64xf32>, vector<32x64xf32> -> vector<32x64xf32>
    %60 = arith.addf %53, %59 : vector<32x64xf32>
    %c7 = arith.constant 7 : index
    %c0_59 = arith.constant 0 : index
    %c0_60 = arith.constant 0 : index
    %61 = vector.load %arg4[%c7, %c0_59, %c0_60] : memref<16x32x200xf32, #tpu.memory_space<vmem>>, vector<1x32x200xf32>
    %62 = vector.shape_cast %61 : vector<1x32x200xf32> to vector<32x200xf32>
    %cst_61 = arith.constant dense<0.000000e+00> : vector<32x32xf32>
    %63 = tpu.matmul %62, %7, %cst_61 {dimension_numbers = #tpu.dot_dimension_numbers<[1], [0], [0], [1], [0, 0, 1, 1], [], []>} : vector<32x200xf32>, vector<200x32xf32>, vector<32x32xf32> -> vector<32x32xf32>
    %c7_62 = arith.constant 7 : index
    %c0_63 = arith.constant 0 : index
    %c0_64 = arith.constant 0 : index
    %64 = vector.load %arg5[%c7_62, %c0_63, %c0_64] : memref<16x32x64xf32, #tpu.memory_space<vmem>>, vector<1x32x64xf32>
    %65 = vector.shape_cast %64 : vector<1x32x64xf32> to vector<32x64xf32>
    %cst_65 = arith.constant dense<0.000000e+00> : vector<32x64xf32>
    %66 = tpu.matmul %63, %65, %cst_65 {dimension_numbers = #tpu.dot_dimension_numbers<[1], [0], [0], [1], [0, 0, 1, 1], [], []>} : vector<32x32xf32>, vector<32x64xf32>, vector<32x64xf32> -> vector<32x64xf32>
    %67 = arith.addf %60, %66 : vector<32x64xf32>
    %c8 = arith.constant 8 : index
    %c0_66 = arith.constant 0 : index
    %c0_67 = arith.constant 0 : index
    %68 = vector.load %arg4[%c8, %c0_66, %c0_67] : memref<16x32x200xf32, #tpu.memory_space<vmem>>, vector<1x32x200xf32>
    %69 = vector.shape_cast %68 : vector<1x32x200xf32> to vector<32x200xf32>
    %cst_68 = arith.constant dense<0.000000e+00> : vector<32x32xf32>
    %70 = tpu.matmul %69, %7, %cst_68 {dimension_numbers = #tpu.dot_dimension_numbers<[1], [0], [0], [1], [0, 0, 1, 1], [], []>} : vector<32x200xf32>, vector<200x32xf32>, vector<32x32xf32> -> vector<32x32xf32>
    %c8_69 = arith.constant 8 : index
    %c0_70 = arith.constant 0 : index
    %c0_71 = arith.constant 0 : index
    %71 = vector.load %arg5[%c8_69, %c0_70, %c0_71] : memref<16x32x64xf32, #tpu.memory_space<vmem>>, vector<1x32x64xf32>
    %72 = vector.shape_cast %71 : vector<1x32x64xf32> to vector<32x64xf32>
    %cst_72 = arith.constant dense<0.000000e+00> : vector<32x64xf32>
    %73 = tpu.matmul %70, %72, %cst_72 {dimension_numbers = #tpu.dot_dimension_numbers<[1], [0], [0], [1], [0, 0, 1, 1], [], []>} : vector<32x32xf32>, vector<32x64xf32>, vector<32x64xf32> -> vector<32x64xf32>
    %74 = arith.addf %67, %73 : vector<32x64xf32>
    %c9 = arith.constant 9 : index
    %c0_73 = arith.constant 0 : index
    %c0_74 = arith.constant 0 : index
    %75 = vector.load %arg4[%c9, %c0_73, %c0_74] : memref<16x32x200xf32, #tpu.memory_space<vmem>>, vector<1x32x200xf32>
    %76 = vector.shape_cast %75 : vector<1x32x200xf32> to vector<32x200xf32>
    %cst_75 = arith.constant dense<0.000000e+00> : vector<32x32xf32>
    %77 = tpu.matmul %76, %7, %cst_75 {dimension_numbers = #tpu.dot_dimension_numbers<[1], [0], [0], [1], [0, 0, 1, 1], [], []>} : vector<32x200xf32>, vector<200x32xf32>, vector<32x32xf32> -> vector<32x32xf32>
    %c9_76 = arith.constant 9 : index
    %c0_77 = arith.constant 0 : index
    %c0_78 = arith.constant 0 : index
    %78 = vector.load %arg5[%c9_76, %c0_77, %c0_78] : memref<16x32x64xf32, #tpu.memory_space<vmem>>, vector<1x32x64xf32>
    %79 = vector.shape_cast %78 : vector<1x32x64xf32> to vector<32x64xf32>
    %cst_79 = arith.constant dense<0.000000e+00> : vector<32x64xf32>
    %80 = tpu.matmul %77, %79, %cst_79 {dimension_numbers = #tpu.dot_dimension_numbers<[1], [0], [0], [1], [0, 0, 1, 1], [], []>} : vector<32x32xf32>, vector<32x64xf32>, vector<32x64xf32> -> vector<32x64xf32>
    %81 = arith.addf %74, %80 : vector<32x64xf32>
    %c10 = arith.constant 10 : index
    %c0_80 = arith.constant 0 : index
    %c0_81 = arith.constant 0 : index
    %82 = vector.load %arg4[%c10, %c0_80, %c0_81] : memref<16x32x200xf32, #tpu.memory_space<vmem>>, vector<1x32x200xf32>
    %83 = vector.shape_cast %82 : vector<1x32x200xf32> to vector<32x200xf32>
    %cst_82 = arith.constant dense<0.000000e+00> : vector<32x32xf32>
    %84 = tpu.matmul %83, %7, %cst_82 {dimension_numbers = #tpu.dot_dimension_numbers<[1], [0], [0], [1], [0, 0, 1, 1], [], []>} : vector<32x200xf32>, vector<200x32xf32>, vector<32x32xf32> -> vector<32x32xf32>
    %c10_83 = arith.constant 10 : index
    %c0_84 = arith.constant 0 : index
    %c0_85 = arith.constant 0 : index
    %85 = vector.load %arg5[%c10_83, %c0_84, %c0_85] : memref<16x32x64xf32, #tpu.memory_space<vmem>>, vector<1x32x64xf32>
    %86 = vector.shape_cast %85 : vector<1x32x64xf32> to vector<32x64xf32>
    %cst_86 = arith.constant dense<0.000000e+00> : vector<32x64xf32>
    %87 = tpu.matmul %84, %86, %cst_86 {dimension_numbers = #tpu.dot_dimension_numbers<[1], [0], [0], [1], [0, 0, 1, 1], [], []>} : vector<32x32xf32>, vector<32x64xf32>, vector<32x64xf32> -> vector<32x64xf32>
    %88 = arith.addf %81, %87 : vector<32x64xf32>
    %c11 = arith.constant 11 : index
    %c0_87 = arith.constant 0 : index
    %c0_88 = arith.constant 0 : index
    %89 = vector.load %arg4[%c11, %c0_87, %c0_88] : memref<16x32x200xf32, #tpu.memory_space<vmem>>, vector<1x32x200xf32>
    %90 = vector.shape_cast %89 : vector<1x32x200xf32> to vector<32x200xf32>
    %cst_89 = arith.constant dense<0.000000e+00> : vector<32x32xf32>
    %91 = tpu.matmul %90, %7, %cst_89 {dimension_numbers = #tpu.dot_dimension_numbers<[1], [0], [0], [1], [0, 0, 1, 1], [], []>} : vector<32x200xf32>, vector<200x32xf32>, vector<32x32xf32> -> vector<32x32xf32>
    %c11_90 = arith.constant 11 : index
    %c0_91 = arith.constant 0 : index
    %c0_92 = arith.constant 0 : index
    %92 = vector.load %arg5[%c11_90, %c0_91, %c0_92] : memref<16x32x64xf32, #tpu.memory_space<vmem>>, vector<1x32x64xf32>
    %93 = vector.shape_cast %92 : vector<1x32x64xf32> to vector<32x64xf32>
    %cst_93 = arith.constant dense<0.000000e+00> : vector<32x64xf32>
    %94 = tpu.matmul %91, %93, %cst_93 {dimension_numbers = #tpu.dot_dimension_numbers<[1], [0], [0], [1], [0, 0, 1, 1], [], []>} : vector<32x32xf32>, vector<32x64xf32>, vector<32x64xf32> -> vector<32x64xf32>
    %95 = arith.addf %88, %94 : vector<32x64xf32>
    %c12 = arith.constant 12 : index
    %c0_94 = arith.constant 0 : index
    %c0_95 = arith.constant 0 : index
    %96 = vector.load %arg4[%c12, %c0_94, %c0_95] : memref<16x32x200xf32, #tpu.memory_space<vmem>>, vector<1x32x200xf32>
    %97 = vector.shape_cast %96 : vector<1x32x200xf32> to vector<32x200xf32>
    %cst_96 = arith.constant dense<0.000000e+00> : vector<32x32xf32>
    %98 = tpu.matmul %97, %7, %cst_96 {dimension_numbers = #tpu.dot_dimension_numbers<[1], [0], [0], [1], [0, 0, 1, 1], [], []>} : vector<32x200xf32>, vector<200x32xf32>, vector<32x32xf32> -> vector<32x32xf32>
    %c12_97 = arith.constant 12 : index
    %c0_98 = arith.constant 0 : index
    %c0_99 = arith.constant 0 : index
    %99 = vector.load %arg5[%c12_97, %c0_98, %c0_99] : memref<16x32x64xf32, #tpu.memory_space<vmem>>, vector<1x32x64xf32>
    %100 = vector.shape_cast %99 : vector<1x32x64xf32> to vector<32x64xf32>
    %cst_100 = arith.constant dense<0.000000e+00> : vector<32x64xf32>
    %101 = tpu.matmul %98, %100, %cst_100 {dimension_numbers = #tpu.dot_dimension_numbers<[1], [0], [0], [1], [0, 0, 1, 1], [], []>} : vector<32x32xf32>, vector<32x64xf32>, vector<32x64xf32> -> vector<32x64xf32>
    %102 = arith.addf %95, %101 : vector<32x64xf32>
    %c13 = arith.constant 13 : index
    %c0_101 = arith.constant 0 : index
    %c0_102 = arith.constant 0 : index
    %103 = vector.load %arg4[%c13, %c0_101, %c0_102] : memref<16x32x200xf32, #tpu.memory_space<vmem>>, vector<1x32x200xf32>
    %104 = vector.shape_cast %103 : vector<1x32x200xf32> to vector<32x200xf32>
    %cst_103 = arith.constant dense<0.000000e+00> : vector<32x32xf32>
    %105 = tpu.matmul %104, %7, %cst_103 {dimension_numbers = #tpu.dot_dimension_numbers<[1], [0], [0], [1], [0, 0, 1, 1], [], []>} : vector<32x200xf32>, vector<200x32xf32>, vector<32x32xf32> -> vector<32x32xf32>
    %c13_104 = arith.constant 13 : index
    %c0_105 = arith.constant 0 : index
    %c0_106 = arith.constant 0 : index
    %106 = vector.load %arg5[%c13_104, %c0_105, %c0_106] : memref<16x32x64xf32, #tpu.memory_space<vmem>>, vector<1x32x64xf32>
    %107 = vector.shape_cast %106 : vector<1x32x64xf32> to vector<32x64xf32>
    %cst_107 = arith.constant dense<0.000000e+00> : vector<32x64xf32>
    %108 = tpu.matmul %105, %107, %cst_107 {dimension_numbers = #tpu.dot_dimension_numbers<[1], [0], [0], [1], [0, 0, 1, 1], [], []>} : vector<32x32xf32>, vector<32x64xf32>, vector<32x64xf32> -> vector<32x64xf32>
    %109 = arith.addf %102, %108 : vector<32x64xf32>
    %c14 = arith.constant 14 : index
    %c0_108 = arith.constant 0 : index
    %c0_109 = arith.constant 0 : index
    %110 = vector.load %arg4[%c14, %c0_108, %c0_109] : memref<16x32x200xf32, #tpu.memory_space<vmem>>, vector<1x32x200xf32>
    %111 = vector.shape_cast %110 : vector<1x32x200xf32> to vector<32x200xf32>
    %cst_110 = arith.constant dense<0.000000e+00> : vector<32x32xf32>
    %112 = tpu.matmul %111, %7, %cst_110 {dimension_numbers = #tpu.dot_dimension_numbers<[1], [0], [0], [1], [0, 0, 1, 1], [], []>} : vector<32x200xf32>, vector<200x32xf32>, vector<32x32xf32> -> vector<32x32xf32>
    %c14_111 = arith.constant 14 : index
    %c0_112 = arith.constant 0 : index
    %c0_113 = arith.constant 0 : index
    %113 = vector.load %arg5[%c14_111, %c0_112, %c0_113] : memref<16x32x64xf32, #tpu.memory_space<vmem>>, vector<1x32x64xf32>
    %114 = vector.shape_cast %113 : vector<1x32x64xf32> to vector<32x64xf32>
    %cst_114 = arith.constant dense<0.000000e+00> : vector<32x64xf32>
    %115 = tpu.matmul %112, %114, %cst_114 {dimension_numbers = #tpu.dot_dimension_numbers<[1], [0], [0], [1], [0, 0, 1, 1], [], []>} : vector<32x32xf32>, vector<32x64xf32>, vector<32x64xf32> -> vector<32x64xf32>
    %116 = arith.addf %109, %115 : vector<32x64xf32>
    %c15 = arith.constant 15 : index
    %c0_115 = arith.constant 0 : index
    %c0_116 = arith.constant 0 : index
    %117 = vector.load %arg4[%c15, %c0_115, %c0_116] : memref<16x32x200xf32, #tpu.memory_space<vmem>>, vector<1x32x200xf32>
    %118 = vector.shape_cast %117 : vector<1x32x200xf32> to vector<32x200xf32>
    %cst_117 = arith.constant dense<0.000000e+00> : vector<32x32xf32>
    %119 = tpu.matmul %118, %7, %cst_117 {dimension_numbers = #tpu.dot_dimension_numbers<[1], [0], [0], [1], [0, 0, 1, 1], [], []>} : vector<32x200xf32>, vector<200x32xf32>, vector<32x32xf32> -> vector<32x32xf32>
    %c15_118 = arith.constant 15 : index
    %c0_119 = arith.constant 0 : index
    %c0_120 = arith.constant 0 : index
    %120 = vector.load %arg5[%c15_118, %c0_119, %c0_120] : memref<16x32x64xf32, #tpu.memory_space<vmem>>, vector<1x32x64xf32>
    %121 = vector.shape_cast %120 : vector<1x32x64xf32> to vector<32x64xf32>
    %cst_121 = arith.constant dense<0.000000e+00> : vector<32x64xf32>
    %122 = tpu.matmul %119, %121, %cst_121 {dimension_numbers = #tpu.dot_dimension_numbers<[1], [0], [0], [1], [0, 0, 1, 1], [], []>} : vector<32x32xf32>, vector<32x64xf32>, vector<32x64xf32> -> vector<32x64xf32>
    %123 = arith.addf %116, %122 : vector<32x64xf32>
    %cst_122 = arith.constant 0.000000e+00 : f32
    %124 = vector.broadcast %cst_122 : f32 to vector<32x64xf32>
    %125 = arith.maximumf %123, %124 : vector<32x64xf32>
    %cst_123 = arith.constant 0.000000e+00 : f32
    %126 = vector.broadcast %cst_123 : f32 to vector<8x64xf32>
    %c0_124 = arith.constant 0 : index
    %c0_125 = arith.constant 0 : index
    %127 = vector.load %arg9[%c0_124, %c0_125] : memref<1x64xf32, #tpu.memory_space<vmem>>, vector<1x64xf32>
    %128 = vector.broadcast %127 : vector<1x64xf32> to vector<8x64xf32>
    %129 = arith.addf %126, %128 : vector<8x64xf32>
    %c0_126 = arith.constant 0 : index
    %c0_127 = arith.constant 0 : index
    %c0_128 = arith.constant 0 : index
    %130 = vector.load %arg7[%c0_126, %c0_127, %c0_128] : memref<9x8x32xf32, #tpu.memory_space<vmem>>, vector<1x8x32xf32>
    %131 = vector.shape_cast %130 : vector<1x8x32xf32> to vector<8x32xf32>
    %cst_129 = arith.constant dense<0.000000e+00> : vector<8x64xf32>
    %132 = tpu.matmul %131, %125, %cst_129 {dimension_numbers = #tpu.dot_dimension_numbers<[1], [0], [0], [1], [0, 0, 1, 1], [], []>} : vector<8x32xf32>, vector<32x64xf32>, vector<8x64xf32> -> vector<8x64xf32>
    %c0_130 = arith.constant 0 : index
    %c0_131 = arith.constant 0 : index
    %c0_132 = arith.constant 0 : index
    %133 = vector.load %arg8[%c0_130, %c0_131, %c0_132] : memref<9x64x64xf32, #tpu.memory_space<vmem>>, vector<1x64x64xf32>
    %134 = vector.shape_cast %133 : vector<1x64x64xf32> to vector<64x64xf32>
    %cst_133 = arith.constant dense<0.000000e+00> : vector<8x64xf32>
    %135 = tpu.matmul %132, %134, %cst_133 {dimension_numbers = #tpu.dot_dimension_numbers<[1], [0], [0], [1], [0, 0, 1, 1], [], []>} : vector<8x64xf32>, vector<64x64xf32>, vector<8x64xf32> -> vector<8x64xf32>
    %136 = arith.addf %129, %135 : vector<8x64xf32>
    %c1_134 = arith.constant 1 : index
    %c0_135 = arith.constant 0 : index
    %c0_136 = arith.constant 0 : index
    %137 = vector.load %arg7[%c1_134, %c0_135, %c0_136] : memref<9x8x32xf32, #tpu.memory_space<vmem>>, vector<1x8x32xf32>
    %138 = vector.shape_cast %137 : vector<1x8x32xf32> to vector<8x32xf32>
    %cst_137 = arith.constant dense<0.000000e+00> : vector<8x64xf32>
    %139 = tpu.matmul %138, %125, %cst_137 {dimension_numbers = #tpu.dot_dimension_numbers<[1], [0], [0], [1], [0, 0, 1, 1], [], []>} : vector<8x32xf32>, vector<32x64xf32>, vector<8x64xf32> -> vector<8x64xf32>
    %c1_138 = arith.constant 1 : index
    %c0_139 = arith.constant 0 : index
    %c0_140 = arith.constant 0 : index
    %140 = vector.load %arg8[%c1_138, %c0_139, %c0_140] : memref<9x64x64xf32, #tpu.memory_space<vmem>>, vector<1x64x64xf32>
    %141 = vector.shape_cast %140 : vector<1x64x64xf32> to vector<64x64xf32>
    %cst_141 = arith.constant dense<0.000000e+00> : vector<8x64xf32>
    %142 = tpu.matmul %139, %141, %cst_141 {dimension_numbers = #tpu.dot_dimension_numbers<[1], [0], [0], [1], [0, 0, 1, 1], [], []>} : vector<8x64xf32>, vector<64x64xf32>, vector<8x64xf32> -> vector<8x64xf32>
    %143 = arith.addf %136, %142 : vector<8x64xf32>
    %c2_142 = arith.constant 2 : index
    %c0_143 = arith.constant 0 : index
    %c0_144 = arith.constant 0 : index
    %144 = vector.load %arg7[%c2_142, %c0_143, %c0_144] : memref<9x8x32xf32, #tpu.memory_space<vmem>>, vector<1x8x32xf32>
    %145 = vector.shape_cast %144 : vector<1x8x32xf32> to vector<8x32xf32>
    %cst_145 = arith.constant dense<0.000000e+00> : vector<8x64xf32>
    %146 = tpu.matmul %145, %125, %cst_145 {dimension_numbers = #tpu.dot_dimension_numbers<[1], [0], [0], [1], [0, 0, 1, 1], [], []>} : vector<8x32xf32>, vector<32x64xf32>, vector<8x64xf32> -> vector<8x64xf32>
    %c2_146 = arith.constant 2 : index
    %c0_147 = arith.constant 0 : index
    %c0_148 = arith.constant 0 : index
    %147 = vector.load %arg8[%c2_146, %c0_147, %c0_148] : memref<9x64x64xf32, #tpu.memory_space<vmem>>, vector<1x64x64xf32>
    %148 = vector.shape_cast %147 : vector<1x64x64xf32> to vector<64x64xf32>
    %cst_149 = arith.constant dense<0.000000e+00> : vector<8x64xf32>
    %149 = tpu.matmul %146, %148, %cst_149 {dimension_numbers = #tpu.dot_dimension_numbers<[1], [0], [0], [1], [0, 0, 1, 1], [], []>} : vector<8x64xf32>, vector<64x64xf32>, vector<8x64xf32> -> vector<8x64xf32>
    %150 = arith.addf %143, %149 : vector<8x64xf32>
    %c3_150 = arith.constant 3 : index
    %c0_151 = arith.constant 0 : index
    %c0_152 = arith.constant 0 : index
    %151 = vector.load %arg7[%c3_150, %c0_151, %c0_152] : memref<9x8x32xf32, #tpu.memory_space<vmem>>, vector<1x8x32xf32>
    %152 = vector.shape_cast %151 : vector<1x8x32xf32> to vector<8x32xf32>
    %cst_153 = arith.constant dense<0.000000e+00> : vector<8x64xf32>
    %153 = tpu.matmul %152, %125, %cst_153 {dimension_numbers = #tpu.dot_dimension_numbers<[1], [0], [0], [1], [0, 0, 1, 1], [], []>} : vector<8x32xf32>, vector<32x64xf32>, vector<8x64xf32> -> vector<8x64xf32>
    %c3_154 = arith.constant 3 : index
    %c0_155 = arith.constant 0 : index
    %c0_156 = arith.constant 0 : index
    %154 = vector.load %arg8[%c3_154, %c0_155, %c0_156] : memref<9x64x64xf32, #tpu.memory_space<vmem>>, vector<1x64x64xf32>
    %155 = vector.shape_cast %154 : vector<1x64x64xf32> to vector<64x64xf32>
    %cst_157 = arith.constant dense<0.000000e+00> : vector<8x64xf32>
    %156 = tpu.matmul %153, %155, %cst_157 {dimension_numbers = #tpu.dot_dimension_numbers<[1], [0], [0], [1], [0, 0, 1, 1], [], []>} : vector<8x64xf32>, vector<64x64xf32>, vector<8x64xf32> -> vector<8x64xf32>
    %157 = arith.addf %150, %156 : vector<8x64xf32>
    %c4_158 = arith.constant 4 : index
    %c0_159 = arith.constant 0 : index
    %c0_160 = arith.constant 0 : index
    %158 = vector.load %arg7[%c4_158, %c0_159, %c0_160] : memref<9x8x32xf32, #tpu.memory_space<vmem>>, vector<1x8x32xf32>
    %159 = vector.shape_cast %158 : vector<1x8x32xf32> to vector<8x32xf32>
    %cst_161 = arith.constant dense<0.000000e+00> : vector<8x64xf32>
    %160 = tpu.matmul %159, %125, %cst_161 {dimension_numbers = #tpu.dot_dimension_numbers<[1], [0], [0], [1], [0, 0, 1, 1], [], []>} : vector<8x32xf32>, vector<32x64xf32>, vector<8x64xf32> -> vector<8x64xf32>
    %c4_162 = arith.constant 4 : index
    %c0_163 = arith.constant 0 : index
    %c0_164 = arith.constant 0 : index
    %161 = vector.load %arg8[%c4_162, %c0_163, %c0_164] : memref<9x64x64xf32, #tpu.memory_space<vmem>>, vector<1x64x64xf32>
    %162 = vector.shape_cast %161 : vector<1x64x64xf32> to vector<64x64xf32>
    %cst_165 = arith.constant dense<0.000000e+00> : vector<8x64xf32>
    %163 = tpu.matmul %160, %162, %cst_165 {dimension_numbers = #tpu.dot_dimension_numbers<[1], [0], [0], [1], [0, 0, 1, 1], [], []>} : vector<8x64xf32>, vector<64x64xf32>, vector<8x64xf32> -> vector<8x64xf32>
    %164 = arith.addf %157, %163 : vector<8x64xf32>
    %c5_166 = arith.constant 5 : index
    %c0_167 = arith.constant 0 : index
    %c0_168 = arith.constant 0 : index
    %165 = vector.load %arg7[%c5_166, %c0_167, %c0_168] : memref<9x8x32xf32, #tpu.memory_space<vmem>>, vector<1x8x32xf32>
    %166 = vector.shape_cast %165 : vector<1x8x32xf32> to vector<8x32xf32>
    %cst_169 = arith.constant dense<0.000000e+00> : vector<8x64xf32>
    %167 = tpu.matmul %166, %125, %cst_169 {dimension_numbers = #tpu.dot_dimension_numbers<[1], [0], [0], [1], [0, 0, 1, 1], [], []>} : vector<8x32xf32>, vector<32x64xf32>, vector<8x64xf32> -> vector<8x64xf32>
    %c5_170 = arith.constant 5 : index
    %c0_171 = arith.constant 0 : index
    %c0_172 = arith.constant 0 : index
    %168 = vector.load %arg8[%c5_170, %c0_171, %c0_172] : memref<9x64x64xf32, #tpu.memory_space<vmem>>, vector<1x64x64xf32>
    %169 = vector.shape_cast %168 : vector<1x64x64xf32> to vector<64x64xf32>
    %cst_173 = arith.constant dense<0.000000e+00> : vector<8x64xf32>
    %170 = tpu.matmul %167, %169, %cst_173 {dimension_numbers = #tpu.dot_dimension_numbers<[1], [0], [0], [1], [0, 0, 1, 1], [], []>} : vector<8x64xf32>, vector<64x64xf32>, vector<8x64xf32> -> vector<8x64xf32>
    %171 = arith.addf %164, %170 : vector<8x64xf32>
    %c6_174 = arith.constant 6 : index
    %c0_175 = arith.constant 0 : index
    %c0_176 = arith.constant 0 : index
    %172 = vector.load %arg7[%c6_174, %c0_175, %c0_176] : memref<9x8x32xf32, #tpu.memory_space<vmem>>, vector<1x8x32xf32>
    %173 = vector.shape_cast %172 : vector<1x8x32xf32> to vector<8x32xf32>
    %cst_177 = arith.constant dense<0.000000e+00> : vector<8x64xf32>
    %174 = tpu.matmul %173, %125, %cst_177 {dimension_numbers = #tpu.dot_dimension_numbers<[1], [0], [0], [1], [0, 0, 1, 1], [], []>} : vector<8x32xf32>, vector<32x64xf32>, vector<8x64xf32> -> vector<8x64xf32>
    %c6_178 = arith.constant 6 : index
    %c0_179 = arith.constant 0 : index
    %c0_180 = arith.constant 0 : index
    %175 = vector.load %arg8[%c6_178, %c0_179, %c0_180] : memref<9x64x64xf32, #tpu.memory_space<vmem>>, vector<1x64x64xf32>
    %176 = vector.shape_cast %175 : vector<1x64x64xf32> to vector<64x64xf32>
    %cst_181 = arith.constant dense<0.000000e+00> : vector<8x64xf32>
    %177 = tpu.matmul %174, %176, %cst_181 {dimension_numbers = #tpu.dot_dimension_numbers<[1], [0], [0], [1], [0, 0, 1, 1], [], []>} : vector<8x64xf32>, vector<64x64xf32>, vector<8x64xf32> -> vector<8x64xf32>
    %178 = arith.addf %171, %177 : vector<8x64xf32>
    %c7_182 = arith.constant 7 : index
    %c0_183 = arith.constant 0 : index
    %c0_184 = arith.constant 0 : index
    %179 = vector.load %arg7[%c7_182, %c0_183, %c0_184] : memref<9x8x32xf32, #tpu.memory_space<vmem>>, vector<1x8x32xf32>
    %180 = vector.shape_cast %179 : vector<1x8x32xf32> to vector<8x32xf32>
    %cst_185 = arith.constant dense<0.000000e+00> : vector<8x64xf32>
    %181 = tpu.matmul %180, %125, %cst_185 {dimension_numbers = #tpu.dot_dimension_numbers<[1], [0], [0], [1], [0, 0, 1, 1], [], []>} : vector<8x32xf32>, vector<32x64xf32>, vector<8x64xf32> -> vector<8x64xf32>
    %c7_186 = arith.constant 7 : index
    %c0_187 = arith.constant 0 : index
    %c0_188 = arith.constant 0 : index
    %182 = vector.load %arg8[%c7_186, %c0_187, %c0_188] : memref<9x64x64xf32, #tpu.memory_space<vmem>>, vector<1x64x64xf32>
    %183 = vector.shape_cast %182 : vector<1x64x64xf32> to vector<64x64xf32>
    %cst_189 = arith.constant dense<0.000000e+00> : vector<8x64xf32>
    %184 = tpu.matmul %181, %183, %cst_189 {dimension_numbers = #tpu.dot_dimension_numbers<[1], [0], [0], [1], [0, 0, 1, 1], [], []>} : vector<8x64xf32>, vector<64x64xf32>, vector<8x64xf32> -> vector<8x64xf32>
    %185 = arith.addf %178, %184 : vector<8x64xf32>
    %c8_190 = arith.constant 8 : index
    %c0_191 = arith.constant 0 : index
    %c0_192 = arith.constant 0 : index
    %186 = vector.load %arg7[%c8_190, %c0_191, %c0_192] : memref<9x8x32xf32, #tpu.memory_space<vmem>>, vector<1x8x32xf32>
    %187 = vector.shape_cast %186 : vector<1x8x32xf32> to vector<8x32xf32>
    %cst_193 = arith.constant dense<0.000000e+00> : vector<8x64xf32>
    %188 = tpu.matmul %187, %125, %cst_193 {dimension_numbers = #tpu.dot_dimension_numbers<[1], [0], [0], [1], [0, 0, 1, 1], [], []>} : vector<8x32xf32>, vector<32x64xf32>, vector<8x64xf32> -> vector<8x64xf32>
    %c8_194 = arith.constant 8 : index
    %c0_195 = arith.constant 0 : index
    %c0_196 = arith.constant 0 : index
    %189 = vector.load %arg8[%c8_194, %c0_195, %c0_196] : memref<9x64x64xf32, #tpu.memory_space<vmem>>, vector<1x64x64xf32>
    %190 = vector.shape_cast %189 : vector<1x64x64xf32> to vector<64x64xf32>
    %cst_197 = arith.constant dense<0.000000e+00> : vector<8x64xf32>
    %191 = tpu.matmul %188, %190, %cst_197 {dimension_numbers = #tpu.dot_dimension_numbers<[1], [0], [0], [1], [0, 0, 1, 1], [], []>} : vector<8x64xf32>, vector<64x64xf32>, vector<8x64xf32> -> vector<8x64xf32>
    %192 = arith.addf %185, %191 : vector<8x64xf32>
    %cst_198 = arith.constant 0.000000e+00 : f32
    %193 = vector.broadcast %cst_198 : f32 to vector<8x64xf32>
    %194 = arith.maximumf %192, %193 : vector<8x64xf32>
    %cst_199 = arith.constant 0.000000e+00 : f32
    %195 = vector.broadcast %cst_199 : f32 to vector<2x256xf32>
    %c0_200 = arith.constant 0 : index
    %c0_201 = arith.constant 0 : index
    %196 = vector.load %arg12[%c0_200, %c0_201] : memref<1x256xf32, #tpu.memory_space<vmem>>, vector<1x256xf32>
    %197 = vector.broadcast %196 : vector<1x256xf32> to vector<2x256xf32>
    %198 = arith.addf %195, %197 : vector<2x256xf32>
    %c0_202 = arith.constant 0 : index
    %c0_203 = arith.constant 0 : index
    %c0_204 = arith.constant 0 : index
    %199 = vector.load %arg10[%c0_202, %c0_203, %c0_204] : memref<4x2x8xf32, #tpu.memory_space<vmem>>, vector<1x2x8xf32>
    %200 = vector.shape_cast %199 : vector<1x2x8xf32> to vector<2x8xf32>
    %cst_205 = arith.constant dense<0.000000e+00> : vector<2x64xf32>
    %201 = tpu.matmul %200, %194, %cst_205 {dimension_numbers = #tpu.dot_dimension_numbers<[1], [0], [0], [1], [0, 0, 1, 1], [], []>} : vector<2x8xf32>, vector<8x64xf32>, vector<2x64xf32> -> vector<2x64xf32>
    %c0_206 = arith.constant 0 : index
    %c0_207 = arith.constant 0 : index
    %c0_208 = arith.constant 0 : index
    %202 = vector.load %arg11[%c0_206, %c0_207, %c0_208] : memref<4x64x256xf32, #tpu.memory_space<vmem>>, vector<1x64x256xf32>
    %203 = vector.shape_cast %202 : vector<1x64x256xf32> to vector<64x256xf32>
    %cst_209 = arith.constant dense<0.000000e+00> : vector<2x256xf32>
    %204 = tpu.matmul %201, %203, %cst_209 {dimension_numbers = #tpu.dot_dimension_numbers<[1], [0], [0], [1], [0, 0, 1, 1], [], []>} : vector<2x64xf32>, vector<64x256xf32>, vector<2x256xf32> -> vector<2x256xf32>
    %205 = arith.addf %198, %204 : vector<2x256xf32>
    %c1_210 = arith.constant 1 : index
    %c0_211 = arith.constant 0 : index
    %c0_212 = arith.constant 0 : index
    %206 = vector.load %arg10[%c1_210, %c0_211, %c0_212] : memref<4x2x8xf32, #tpu.memory_space<vmem>>, vector<1x2x8xf32>
    %207 = vector.shape_cast %206 : vector<1x2x8xf32> to vector<2x8xf32>
    %cst_213 = arith.constant dense<0.000000e+00> : vector<2x64xf32>
    %208 = tpu.matmul %207, %194, %cst_213 {dimension_numbers = #tpu.dot_dimension_numbers<[1], [0], [0], [1], [0, 0, 1, 1], [], []>} : vector<2x8xf32>, vector<8x64xf32>, vector<2x64xf32> -> vector<2x64xf32>
    %c1_214 = arith.constant 1 : index
    %c0_215 = arith.constant 0 : index
    %c0_216 = arith.constant 0 : index
    %209 = vector.load %arg11[%c1_214, %c0_215, %c0_216] : memref<4x64x256xf32, #tpu.memory_space<vmem>>, vector<1x64x256xf32>
    %210 = vector.shape_cast %209 : vector<1x64x256xf32> to vector<64x256xf32>
    %cst_217 = arith.constant dense<0.000000e+00> : vector<2x256xf32>
    %211 = tpu.matmul %208, %210, %cst_217 {dimension_numbers = #tpu.dot_dimension_numbers<[1], [0], [0], [1], [0, 0, 1, 1], [], []>} : vector<2x64xf32>, vector<64x256xf32>, vector<2x256xf32> -> vector<2x256xf32>
    %212 = arith.addf %205, %211 : vector<2x256xf32>
    %c2_218 = arith.constant 2 : index
    %c0_219 = arith.constant 0 : index
    %c0_220 = arith.constant 0 : index
    %213 = vector.load %arg10[%c2_218, %c0_219, %c0_220] : memref<4x2x8xf32, #tpu.memory_space<vmem>>, vector<1x2x8xf32>
    %214 = vector.shape_cast %213 : vector<1x2x8xf32> to vector<2x8xf32>
    %cst_221 = arith.constant dense<0.000000e+00> : vector<2x64xf32>
    %215 = tpu.matmul %214, %194, %cst_221 {dimension_numbers = #tpu.dot_dimension_numbers<[1], [0], [0], [1], [0, 0, 1, 1], [], []>} : vector<2x8xf32>, vector<8x64xf32>, vector<2x64xf32> -> vector<2x64xf32>
    %c2_222 = arith.constant 2 : index
    %c0_223 = arith.constant 0 : index
    %c0_224 = arith.constant 0 : index
    %216 = vector.load %arg11[%c2_222, %c0_223, %c0_224] : memref<4x64x256xf32, #tpu.memory_space<vmem>>, vector<1x64x256xf32>
    %217 = vector.shape_cast %216 : vector<1x64x256xf32> to vector<64x256xf32>
    %cst_225 = arith.constant dense<0.000000e+00> : vector<2x256xf32>
    %218 = tpu.matmul %215, %217, %cst_225 {dimension_numbers = #tpu.dot_dimension_numbers<[1], [0], [0], [1], [0, 0, 1, 1], [], []>} : vector<2x64xf32>, vector<64x256xf32>, vector<2x256xf32> -> vector<2x256xf32>
    %219 = arith.addf %212, %218 : vector<2x256xf32>
    %c3_226 = arith.constant 3 : index
    %c0_227 = arith.constant 0 : index
    %c0_228 = arith.constant 0 : index
    %220 = vector.load %arg10[%c3_226, %c0_227, %c0_228] : memref<4x2x8xf32, #tpu.memory_space<vmem>>, vector<1x2x8xf32>
    %221 = vector.shape_cast %220 : vector<1x2x8xf32> to vector<2x8xf32>
    %cst_229 = arith.constant dense<0.000000e+00> : vector<2x64xf32>
    %222 = tpu.matmul %221, %194, %cst_229 {dimension_numbers = #tpu.dot_dimension_numbers<[1], [0], [0], [1], [0, 0, 1, 1], [], []>} : vector<2x8xf32>, vector<8x64xf32>, vector<2x64xf32> -> vector<2x64xf32>
    %c3_230 = arith.constant 3 : index
    %c0_231 = arith.constant 0 : index
    %c0_232 = arith.constant 0 : index
    %223 = vector.load %arg11[%c3_230, %c0_231, %c0_232] : memref<4x64x256xf32, #tpu.memory_space<vmem>>, vector<1x64x256xf32>
    %224 = vector.shape_cast %223 : vector<1x64x256xf32> to vector<64x256xf32>
    %cst_233 = arith.constant dense<0.000000e+00> : vector<2x256xf32>
    %225 = tpu.matmul %222, %224, %cst_233 {dimension_numbers = #tpu.dot_dimension_numbers<[1], [0], [0], [1], [0, 0, 1, 1], [], []>} : vector<2x64xf32>, vector<64x256xf32>, vector<2x256xf32> -> vector<2x256xf32>
    %226 = arith.addf %219, %225 : vector<2x256xf32>
    %cst_234 = arith.constant 0.000000e+00 : f32
    %227 = vector.broadcast %cst_234 : f32 to vector<2x256xf32>
    %228 = arith.maximumf %226, %227 : vector<2x256xf32>
    %c0_235 = arith.constant 0 : index
    %c0_236 = arith.constant 0 : index
    %229 = vector.load %arg13[%c0_235, %c0_236] : memref<256x1xf32, #tpu.memory_space<vmem>>, vector<256x1xf32>
    %cst_237 = arith.constant dense<0.000000e+00> : vector<2x1xf32>
    %230 = tpu.matmul %228, %229, %cst_237 {dimension_numbers = #tpu.dot_dimension_numbers<[1], [0], [0], [1], [0, 0, 1, 1], [], []>} : vector<2x256xf32>, vector<256x1xf32>, vector<2x1xf32> -> vector<2x1xf32>
    %c0_238 = arith.constant 0 : index
    %c0_239 = arith.constant 0 : index
    %231 = vector.load %arg14[%c0_238, %c0_239] : memref<1x1xf32, #tpu.memory_space<vmem>>, vector<1x1xf32>
    %232 = vector.broadcast %231 : vector<1x1xf32> to vector<2x1xf32>
    %233 = arith.addf %230, %232 : vector<2x1xf32>
    %c0_240 = arith.constant 0 : index
    %c0_241 = arith.constant 0 : index
    %234 = vector.load %arg15[%c0_240, %c0_241] : memref<2x1xf32, #tpu.memory_space<vmem>>, vector<2x1xf32>
    tpu.vector_store %arg15[%c0_240, %c0_241], %233 {strides = array<i32>} : memref<2x1xf32, #tpu.memory_space<vmem>>, vector<2x1xf32>,
    return
  }
  func.func @transform_0(%arg0: i32) -> (i32, i32) {
    %c0_i32 = arith.constant 0 : i32
    %c0_i32_0 = arith.constant 0 : i32
    %c0_i32_1 = arith.constant 0 : i32
    return %c0_i32, %c0_i32_0 : i32, i32
  }
  func.func @transform_1(%arg0: i32) -> (i32, i32) {
    %c0_i32 = arith.constant 0 : i32
    %c0_i32_0 = arith.constant 0 : i32
    %c0_i32_1 = arith.constant 0 : i32
    return %c0_i32, %c0_i32_0 : i32, i32
  }
  func.func @transform_2(%arg0: i32) -> (i32, i32) {
    %c0_i32 = arith.constant 0 : i32
    %c0_i32_0 = arith.constant 0 : i32
    %c0_i32_1 = arith.constant 0 : i32
    return %c0_i32, %c0_i32_0 : i32, i32
  }
  func.func @transform_3(%arg0: i32) -> (i32, i32, i32) {
    %c0_i32 = arith.constant 0 : i32
    %c0_i32_0 = arith.constant 0 : i32
    %c0_i32_1 = arith.constant 0 : i32
    %c0_i32_2 = arith.constant 0 : i32
    return %c0_i32, %c0_i32_0, %c0_i32_1 : i32, i32, i32
  }
  func.func @transform_4(%arg0: i32) -> (i32, i32, i32) {
    %c0_i32 = arith.constant 0 : i32
    %c0_i32_0 = arith.constant 0 : i32
    %c0_i32_1 = arith.constant 0 : i32
    %c0_i32_2 = arith.constant 0 : i32
    return %c0_i32, %c0_i32_0, %c0_i32_1 : i32, i32, i32
  }
  func.func @transform_5(%arg0: i32) -> (i32, i32) {
    %c0_i32 = arith.constant 0 : i32
    %c0_i32_0 = arith.constant 0 : i32
    %c0_i32_1 = arith.constant 0 : i32
    return %c0_i32, %c0_i32_0 : i32, i32
  }
  func.func @transform_6(%arg0: i32) -> (i32, i32, i32) {
    %c0_i32 = arith.constant 0 : i32
    %c0_i32_0 = arith.constant 0 : i32
    %c0_i32_1 = arith.constant 0 : i32
    %c0_i32_2 = arith.constant 0 : i32
    return %c0_i32, %c0_i32_0, %c0_i32_1 : i32, i32, i32
  }
  func.func @transform_7(%arg0: i32) -> (i32, i32, i32) {
    %c0_i32 = arith.constant 0 : i32
    %c0_i32_0 = arith.constant 0 : i32
    %c0_i32_1 = arith.constant 0 : i32
    %c0_i32_2 = arith.constant 0 : i32
    return %c0_i32, %c0_i32_0, %c0_i32_1 : i32, i32, i32
  }
  func.func @transform_8(%arg0: i32) -> (i32, i32) {
    %c0_i32 = arith.constant 0 : i32
    %c0_i32_0 = arith.constant 0 : i32
    %c0_i32_1 = arith.constant 0 : i32
    return %c0_i32, %c0_i32_0 : i32, i32
  }
  func.func @transform_9(%arg0: i32) -> (i32, i32, i32) {
    %c0_i32 = arith.constant 0 : i32
    %c0_i32_0 = arith.constant 0 : i32
    %c0_i32_1 = arith.constant 0 : i32
    %c0_i32_2 = arith.constant 0 : i32
    return %c0_i32, %c0_i32_0, %c0_i32_1 : i32, i32, i32
  }
  func.func @transform_10(%arg0: i32) -> (i32, i32, i32) {
    %c0_i32 = arith.constant 0 : i32
    %c0_i32_0 = arith.constant 0 : i32
    %c0_i32_1 = arith.constant 0 : i32
    %c0_i32_2 = arith.constant 0 : i32
    return %c0_i32, %c0_i32_0, %c0_i32_1 : i32, i32, i32
  }
  func.func @transform_11(%arg0: i32) -> (i32, i32) {
    %c0_i32 = arith.constant 0 : i32
    %c0_i32_0 = arith.constant 0 : i32
    %c0_i32_1 = arith.constant 0 : i32
    return %c0_i32, %c0_i32_0 : i32, i32
  }
  func.func @transform_12(%arg0: i32) -> (i32, i32) {
    %c0_i32 = arith.constant 0 : i32
    %c0_i32_0 = arith.constant 0 : i32
    %c0_i32_1 = arith.constant 0 : i32
    return %c0_i32, %c0_i32_0 : i32, i32
  }
  func.func @transform_13(%arg0: i32) -> (i32, i32) {
    %c0_i32 = arith.constant 0 : i32
    %c0_i32_0 = arith.constant 0 : i32
    %c0_i32_1 = arith.constant 0 : i32
    return %c0_i32, %c0_i32_0 : i32, i32
  }
  func.func @transform_14(%arg0: i32) -> (i32, i32) {
    %c0_i32 = arith.constant 0 : i32
    %c0_i32_0 = arith.constant 0 : i32
    %c0_i32_1 = arith.constant 0 : i32
    return %c0_i32, %c0_i32_0 : i32, i32
  }
}

</mosaic_0001>

<bundles_post_ra>
// kernel: convolutional_critic_forward.1
= control target key start
LH: loop header
LB: loop body
LE: loop exit
PB: predicated region body
PF: predicated region fallthrough
CT: control target
= control target key end

     0   :  { %v8362_v0 = vmov 0.0|0.0   ;;  %vm369_vm0 = vcmask 588800   ;;  %vm471_vm1 = vcmask 261120   ;;  %vm8364_vm2 = vmmov 0   ;;  %s10611_s1 = inlined_call_operand.vmem [shape: f32[256,32], index: 1, kind: input, shape index: {}]   ;;  %s10612_s0 = inlined_call_operand.vmem [shape: f32[200,256], index: 0, kind: input, shape index: {}]   ;;  %s10613_s3 = inlined_call_operand.vmem [shape: f32[16,32,200], index: 3, kind: input, shape index: {}]   ;;  %s10614_s2 = inlined_call_operand.vmem [shape: f32[1,32], index: 2, kind: input, shape index: {}]   ;;  %s10615_s4 = inlined_call_operand.vmem [shape: f32[16,32,64], index: 4, kind: input, shape index: {}]   ;;  %s10616_s7 = inlined_call_operand.vmem [shape: f32[9,64,64], index: 7, kind: input, shape index: {}]   ;;  %s10617_s5 = inlined_call_operand.vmem [shape: f32[1,64], index: 5, kind: input, shape index: {}]   ;;  %s10618_s6 = inlined_call_operand.vmem [shape: f32[9,8,32], index: 6, kind: input, shape index: {}]   ;;  %s10619_s10 = inlined_call_operand.vmem [shape: f32[4,64,256], index: 10, kind: input, shape index: {}]   ;;  %s10620_s8 = inlined_call_operand.vmem [shape: f32[1,64], index: 8, kind: input, shape index: {}]   ;;  %s10621_s9 = inlined_call_operand.vmem [shape: f32[4,2,8], index: 9, kind: input, shape index: {}]   ;;  %s10622_s12 = inlined_call_operand.vmem [shape: f32[256,1], index: 12, kind: input, shape index: {}]   ;;  %s10623_s11 = inlined_call_operand.vmem [shape: f32[1,256], index: 11, kind: input, shape index: {}]   ;;  %s10624_s13 = inlined_call_operand.<no memory space> [shape: f32[1,1], index: 13, kind: input, shape index: {}]   ;;  %s10625_s14 = inlined_call_operand.vmem [shape: f32[2,1], index: 14, kind: output, shape index: {}]  }
   0x1   :  { %7261 = vmatprep.subr.bf16.mxu0 %v8362_v0  ;;  %v99_v1 = vld [vmem:[%s10611_s1] sm:$0xff]  ;;  %v100_v2 = vld [vmem:[%s10611_s1 + $0x8] sm:$0xff]  ;;  %v101_v3 = vld [vmem:[%s10611_s1 + $0x10] sm:$0xff]  ;;  %7309 = vmatprep.subr.bf16.mxu1 %v8362_v0  ;;  %vm3847_vm3 = vcmask 523264   ;;  %vm5202_vm4 = vcmask 64512   ;;  %vm5983_vm5 = vcmask 1024  }
   0x2   :  { %v7262_v4 = vpack.c.bf16 %v100_v2, %v99_v1  ;;  %v102_v5 = vld [vmem:[%s10611_s1 + $0x18] sm:$0xff]  ;;  %v103_v7 = vld [vmem:[%s10611_s1 + $0x20] sm:$0xff]  ;;  %v104_v8 = vld [vmem:[%s10611_s1 + $0x28] sm:$0xff] }
   0x3   :  { %v7265_v6 = vpack.c.bf16 %v102_v5, %v101_v3  ;;  %v7268_v9 = vpack.c.bf16 %v104_v8, %v103_v7  ;;  %v105_v10 = vld [vmem:[%s10611_s1 + $0x30] sm:$0xff]  ;;  %v106_v11 = vld [vmem:[%s10611_s1 + $0x38] sm:$0xff]  ;;  %v50_v12 = vld [vmem:[%s10612_s0 + $0x8] sm:$0xff] }
   0x4   :  { %7263 = vmatpush1.bf16.msra.mxu0 %v7262_v4  ;;  %v7271_v13 = vpack.c.bf16 %v106_v11, %v105_v10  ;;  %202 = vmatprep.mubr.f32.mxu0 %v50_v12  ;;  %v107_v14 = vld [vmem:[%s10611_s1 + $0x40] sm:$0xff]  ;;  %v108_v15 = vld [vmem:[%s10611_s1 + $0x48] sm:$0xff]  ;;  %v109_v17 = vld [vmem:[%s10611_s1 + $0x50] sm:$0xff] }
   0x5   :  { %7264 = vmatprep.subr.bf16.mxu0 %v8362_v0  ;;  %v7274_v16 = vpack.c.bf16 %v108_v15, %v107_v14  ;;  %v110_v18 = vld [vmem:[%s10611_s1 + $0x58] sm:$0xff]  ;;  %v111_v20 = vld [vmem:[%s10611_s1 + $0x60] sm:$0xff]  ;;  %v112_v21 = vld [vmem:[%s10611_s1 + $0x68] sm:$0xff] }
   0x6   :  { %v7277_v19 = vpack.c.bf16 %v110_v18, %v109_v17  ;;  %v7280_v22 = vpack.c.bf16 %v112_v21, %v111_v20  ;;  %v113_v23 = vld [vmem:[%s10611_s1 + $0x70] sm:$0xff]  ;;  %v114_v24 = vld [vmem:[%s10611_s1 + $0x78] sm:$0xff]  ;;  %v115_v26 = vld [vmem:[%s10611_s1 + $0x80] sm:$0xff] }
   0x7   :  { %v7283_v25 = vpack.c.bf16 %v114_v24, %v113_v23  ;;  %v116_v27 = vld [vmem:[%s10611_s1 + $0x88] sm:$0xff]  ;;  %v117_v29 = vld [vmem:[%s10611_s1 + $0x90] sm:$0xff]  ;;  %v118_v30 = vld [vmem:[%s10611_s1 + $0x98] sm:$0xff] }
   0x8   :  { %7266 = vmatpush1.bf16.msra.mxu0 %v7265_v6  ;;  %v7286_v28 = vpack.c.bf16 %v116_v27, %v115_v26  ;;  %v7289_v31 = vpack.c.bf16 %v118_v30, %v117_v29  ;;  %v119_v32 = vld [vmem:[%s10611_s1 + $0xa0] sm:$0xff]  ;;  %v120_v33 = vld [vmem:[%s10611_s1 + $0xa8] sm:$0xff]  ;;  %v121_v35 = vld [vmem:[%s10611_s1 + $0xb0] sm:$0xff] }
   0x9   :  { %7267 = vmatprep.subr.bf16.mxu0 %v8362_v0  ;;  %v7292_v34 = vpack.c.bf16 %v120_v33, %v119_v32  ;;  %v122_v36 = vld [vmem:[%s10611_s1 + $0xb8] sm:$0xff]  ;;  %v123_v38 = vld [vmem:[%s10611_s1 + $0xc0] sm:$0xff]  ;;  %v124_v39 = vld [vmem:[%s10611_s1 + $0xc8] sm:$0xff] }
   0xa   :  { %v7295_v37 = vpack.c.bf16 %v122_v36, %v121_v35  ;;  %v7298_v40 = vpack.c.bf16 %v124_v39, %v123_v38  ;;  %v125_v41 = vld [vmem:[%s10611_s1 + $0xd0] sm:$0xff]  ;;  %v126_v42 = vld [vmem:[%s10611_s1 + $0xd8] sm:$0xff]  ;;  %v127_v44 = vld [vmem:[%s10611_s1 + $0xe0] sm:$0xff] }
   0xb   :  { %v7301_v43 = vpack.c.bf16 %v126_v42, %v125_v41  ;;  %v128_v45 = vld [vmem:[%s10611_s1 + $0xe8] sm:$0xff]  ;;  %v129_v47 = vld [vmem:[%s10611_s1 + $0xf0] sm:$0xff]  ;;  %v130_v48 = vld [vmem:[%s10611_s1 + $0xf8] sm:$0xff] }
   0xc   :  { %7269 = vmatpush1.bf16.msra.mxu0 %v7268_v9  ;;  %v7304_v46 = vpack.c.bf16 %v128_v45, %v127_v44  ;;  %v7307_v49 = vpack.c.bf16 %v130_v48, %v129_v47  ;;  %v49_v50 = vld [vmem:[%s10612_s0] sm:$0xff]  ;;  %v52_v51 = vld [vmem:[%s10612_s0 + $0x18] sm:$0xff]  ;;  %v51_v52 = vld [vmem:[%s10612_s0 + $0x10] sm:$0xff] }
   0xd   :  { %7270 = vmatprep.subr.bf16.mxu0 %v8362_v0  ;;  %v54_v53 = vld [vmem:[%s10612_s0 + $0x28] sm:$0xff]  ;;  %v53_v54 = vld [vmem:[%s10612_s0 + $0x20] sm:$0xff]  ;;  %v56_v55 = vld [vmem:[%s10612_s0 + $0x38] sm:$0xff] }
   0xe   :  { %v55_v56 = vld [vmem:[%s10612_s0 + $0x30] sm:$0xff]  ;;  %v58_v57 = vld [vmem:[%s10612_s0 + $0x48] sm:$0xff]  ;;  %v57_v58 = vld [vmem:[%s10612_s0 + $0x40] sm:$0xff] }
   0xf   :  { %v60_v59 = vld [vmem:[%s10612_s0 + $0x58] sm:$0xff]  ;;  %v59_v60 = vld [vmem:[%s10612_s0 + $0x50] sm:$0xff]  ;;  %v62_v61 = vld [vmem:[%s10612_s0 + $0x68] sm:$0xff] }
  0x10   :  { %7272 = vmatpush1.bf16.msra.mxu0 %v7271_v13  ;;  %v61_v62 = vld [vmem:[%s10612_s0 + $0x60] sm:$0xff]  ;;  %v64_v63 = vld [vmem:[%s10612_s0 + $0x78] sm:$0xff]  ;;  %v63_v1 = vld [vmem:[%s10612_s0 + $0x70] sm:$0xff] }
  0x11   :  { %7273 = vmatprep.subr.bf16.mxu0 %v8362_v0  ;;  %v66_v2 = vld [vmem:[%s10612_s0 + $0x88] sm:$0xff]  ;;  %v65_v3 = vld [vmem:[%s10612_s0 + $0x80] sm:$0xff]  ;;  %v68_v4 = vld [vmem:[%s10612_s0 + $0x98] sm:$0xff] }
  0x12   :  { %v67_v5 = vld [vmem:[%s10612_s0 + $0x90] sm:$0xff]  ;;  %v70_v6 = vld [vmem:[%s10612_s0 + $0xa8] sm:$0xff]  ;;  %v69_v7 = vld [vmem:[%s10612_s0 + $0xa0] sm:$0xff] }
  0x13   :  { %v72_v8 = vld [vmem:[%s10612_s0 + $0xb8] sm:$0xff]  ;;  %v71_v9 = vld [vmem:[%s10612_s0 + $0xb0] sm:$0xff]  ;;  %v74_v10 = vld [vmem:[%s10612_s0 + $0xc8] sm:$0xff] }
  0x14   :  { %7275 = vmatpush1.bf16.msra.mxu0 %v7274_v16  ;;  %v73_v11 = vld [vmem:[%s10612_s0 + $0xc0] sm:$0xff]  ;;  %v76_v12 = vld [vmem:[%s10612_s0 + $0xd8] sm:$0xff]  ;;  %v75_v13 = vld [vmem:[%s10612_s0 + $0xd0] sm:$0xff] }
  0x15   :  { %7276 = vmatprep.subr.bf16.mxu0 %v8362_v0  ;;  %v78_v14 = vld [vmem:[%s10612_s0 + $0xe8] sm:$0xff]  ;;  %v77_v15 = vld [vmem:[%s10612_s0 + $0xe0] sm:$0xff]  ;;  %v80_v16 = vld [vmem:[%s10612_s0 + $0xf8] sm:$0xff] }
  0x16   :  { %v79_v17 = vld [vmem:[%s10612_s0 + $0xf0] sm:$0xff]  ;;  %v82_v18 = vld [vmem:[%s10612_s0 + $0x108] sm:$0xff]  ;;  %v84_v20 = vld [vmem:[%s10612_s0 + $0x118] sm:$0xff] }
  0x17   :  { %v83_v21 = vld [vmem:[%s10612_s0 + $0x110] sm:$0xff]  ;;  %v85_v23 = vld [vmem:[%s10612_s0 + $0x120] sm:$0xff]  ;;  %v88_v24 = vld [vmem:[%s10612_s0 + $0x138] sm:$0xff] }
  0x18   :  { %7278 = vmatpush1.bf16.msra.mxu0 %v7277_v19  ;;  %v81_v19 = vld [vmem:[%s10612_s0 + $0x100] sm:$0xff]  ;;  %v90_v26 = vld [vmem:[%s10612_s0 + $0x148] sm:$0xff]  ;;  %v91_v29 = vld [vmem:[%s10612_s0 + $0x150] sm:$0xff] }
  0x19   :  { %7279 = vmatprep.subr.bf16.mxu0 %v8362_v0  ;;  %v89_v27 = vld [vmem:[%s10612_s0 + $0x140] sm:$0xff]  ;;  %v94_v30 = vld [vmem:[%s10612_s0 + $0x168] sm:$0xff]  ;;  %v96_v32 = vld [vmem:[%s10612_s0 + $0x178] sm:$0xff] }
  0x1a   :  { %v95_v33 = vld [vmem:[%s10612_s0 + $0x170] sm:$0xff]  ;;  %v97_v35 = vld [vmem:[%s10612_s0 + $0x180] sm:$0xff]  ;;  %v362_v36 = vld [vmem:[%s10613_s3 + $0x8] sm:$0xff] }
  0x1b   :  { %5991 = vmatprep.mubr.msk.f32.mxu1 %vm369_vm0, %v362_v36  ;;  %v8715_v38 = vld [vmem:[%s10614_s2] ss:$0 sm:$0xff] }
  0x1c   :  { %7281 = vmatpush1.bf16.msra.mxu0 %v7280_v22  ;;  %v86_v22 = vld [vmem:[%s10612_s0 + $0x128] sm:$0xff] }
  0x1d   :  { %7282 = vmatprep.subr.bf16.mxu0 %v8362_v0 }
  0x20   :  { %7284 = vmatpush1.bf16.msra.mxu0 %v7283_v25  ;;  %v87_v25 = vld [vmem:[%s10612_s0 + $0x130] sm:$0xff] }
  0x21   :  { %7285 = vmatprep.subr.bf16.mxu0 %v8362_v0 }
  0x24   :  { %7287 = vmatpush1.bf16.msra.mxu0 %v7286_v28  ;;  %v92_v28 = vld [vmem:[%s10612_s0 + $0x158] sm:$0xff] }
  0x25   :  { %7288 = vmatprep.subr.bf16.mxu0 %v8362_v0 }
  0x28   :  { %7290 = vmatpush1.bf16.msra.mxu0 %v7289_v31  ;;  %v93_v31 = vld [vmem:[%s10612_s0 + $0x160] sm:$0xff] }
  0x29   :  { %7291 = vmatprep.subr.bf16.mxu0 %v8362_v0 }
  0x2c   :  { %7293 = vmatpush1.bf16.msra.mxu0 %v7292_v34  ;;  %v98_v34 = vld [vmem:[%s10612_s0 + $0x188] sm:$0xff] }
  0x2d   :  { %7294 = vmatprep.subr.bf16.mxu0 %v8362_v0 }
  0x30   :  { %7296 = vmatpush1.bf16.msra.mxu0 %v7295_v37  ;;  %v6020_v37 = vld [vmem:[%s10613_s3 + $0x88] sm:$0xff] }
  0x31   :  { %7297 = vmatprep.subr.bf16.mxu0 %v8362_v0 }
  0x34   :  { %7299 = vmatpush1.bf16.msra.mxu0 %v7298_v40 }
  0x35   :  { %7300 = vmatprep.subr.bf16.mxu0 %v8362_v0 }
  0x38   :  { %7302 = vmatpush1.bf16.msra.mxu0 %v7301_v43 }
  0x39   :  { %7303 = vmatprep.subr.bf16.mxu0 %v8362_v0 }
  0x3c   :  { %7305 = vmatpush1.bf16.msra.mxu0 %v7304_v46 }
  0x3d   :  { %7306 = vmatprep.subr.bf16.mxu0 %v8362_v0 }
  0x40   :  { %7308 = vmatpush1.bf16.msra.mxu0 %v7307_v49 }
  0x41   :  { %7397 = vmatprep.subr.bf16.mxu0 %v8362_v0 }
  0x43   :  { %203 = vmatmul.mubr.f32.vlgmr.msra.gmra.mrb[0].mxu0 %v49_v50 }
  0x44   :  { %207 = vmatprep.mubr.f32.mxu0 %v52_v51 }
  0x47   :  { %208 = vmatmul.mubr.f32.gmra.mrb[2].mxu0 %v51_v52 }
  0x48   :  { %212 = vmatprep.mubr.f32.mxu0 %v54_v53 }
  0x4b   :  { %213 = vmatmul.mubr.f32.gmra.mrb[4].mxu0 %v53_v54 }
  0x4c   :  { %217 = vmatprep.mubr.f32.mxu0 %v56_v55 }
  0x4f   :  { %218 = vmatmul.mubr.f32.gmra.mrb[6].mxu0 %v55_v56 }
  0x50   :  { %222 = vmatprep.mubr.f32.mxu0 %v58_v57 }
  0x53   :  { %223 = vmatmul.mubr.f32.gmra.mrb[8].mxu0 %v57_v58 }
  0x54   :  { %227 = vmatprep.mubr.f32.mxu0 %v60_v59 }
  0x57   :  { %228 = vmatmul.mubr.f32.gmra.mrb[10].mxu0 %v59_v60 }
  0x58   :  { %232 = vmatprep.mubr.f32.mxu0 %v62_v61 }
  0x5b   :  { %233 = vmatmul.mubr.f32.gmra.mrb[12].mxu0 %v61_v62 }
  0x5c   :  { %237 = vmatprep.mubr.f32.mxu0 %v64_v63 }
  0x5f   :  { %238 = vmatmul.mubr.f32.gmra.mrb[14].mxu0 %v63_v1 }
  0x60   :  { %242 = vmatprep.mubr.f32.mxu0 %v66_v2 }
  0x63   :  { %243 = vmatmul.mubr.f32.gmra.mrb[16].mxu0 %v65_v3 }
  0x64   :  { %247 = vmatprep.mubr.f32.mxu0 %v68_v4 }
  0x67   :  { %248 = vmatmul.mubr.f32.gmra.mrb[18].mxu0 %v67_v5 }
  0x68   :  { %252 = vmatprep.mubr.f32.mxu0 %v70_v6 }
  0x6b   :  { %253 = vmatmul.mubr.f32.gmra.mrb[20].mxu0 %v69_v7 }
  0x6c   :  { %257 = vmatprep.mubr.f32.mxu0 %v72_v8 }
  0x6f   :  { %258 = vmatmul.mubr.f32.gmra.mrb[22].mxu0 %v71_v9 }
  0x70   :  { %262 = vmatprep.mubr.f32.mxu0 %v74_v10 }
  0x73   :  { %263 = vmatmul.mubr.f32.gmra.mrb[24].mxu0 %v73_v11 }
  0x74   :  { %267 = vmatprep.mubr.f32.mxu0 %v76_v12 }
  0x77   :  { %268 = vmatmul.mubr.f32.gmra.mrb[26].mxu0 %v75_v13 }
  0x78   :  { %272 = vmatprep.mubr.f32.mxu0 %v78_v14 }
  0x7b   :  { %273 = vmatmul.mubr.f32.gmra.mrb[28].mxu0 %v77_v15 }
  0x7c   :  { %277 = vmatprep.mubr.f32.mxu0 %v80_v16 }
  0x7f   :  { %278 = vmatmul.mubr.f32.gmra.mrb[30].mxu0 %v79_v17 }
  0x80   :  { %282 = vmatprep.mubr.f32.mxu0 %v82_v18 }
  0x83   :  { %283 = vmatmul.mubr.f32.gmra.mrb[32].mxu0 %v81_v19 }
  0x84   :  { %287 = vmatprep.mubr.f32.mxu0 %v84_v20 }
  0x87   :  { %288 = vmatmul.mubr.f32.gmra.mrb[34].mxu0 %v83_v21 }
  0x88   :  { %292 = vmatprep.mubr.f32.mxu0 %v86_v22 }
  0x8b   :  { %293 = vmatmul.mubr.f32.gmra.mrb[36].mxu0 %v85_v23 }
  0x8c   :  { %297 = vmatprep.mubr.f32.mxu0 %v88_v24 }
  0x8f   :  { %298 = vmatmul.mubr.f32.gmra.mrb[38].mxu0 %v87_v25 }
  0x90   :  { %302 = vmatprep.mubr.f32.mxu0 %v90_v26 }
  0x93   :  { %303 = vmatmul.mubr.f32.gmra.mrb[40].mxu0 %v89_v27 }
  0x94   :  { %307 = vmatprep.mubr.f32.mxu0 %v92_v28 }
  0x97   :  { %308 = vmatmul.mubr.f32.gmra.mrb[42].mxu0 %v91_v29 }
  0x98   :  { %312 = vmatprep.mubr.f32.mxu0 %v94_v30 }
  0x9b   :  { %313 = vmatmul.mubr.f32.gmra.mrb[44].mxu0 %v93_v31 }
  0x9c   :  { %317 = vmatprep.mubr.f32.mxu0 %v96_v32 }
  0x9f   :  { %318 = vmatmul.mubr.f32.gmra.mrb[46].mxu0 %v95_v33 }
  0xa0   :  { %322 = vmatprep.mubr.f32.mxu0 %v98_v34 }
  0xa3   :  { %323 = vmatmul.mubr.f32.gmra.mrb[48].mxu0 %v97_v35 }
  0xa4   :  { %6027 = vmatprep.mubr.msk.f32.mxu0 %vm369_vm0, %v6020_v37 }
 0x116   :  { %v204_v39 = vpop.f32.mrb[0].mxu0 }
 0x117   :  { %v206_v40 = vpop.f32.mrb[1].mxu0  ;;  %v205_v41 = vadd.f32 %v8715_v38, %v204_v39 }
 0x119   :  { %v328_v45 = vmax.f32 %v205_v41, 0.0 }
 0x11a   :  { %v209_v42 = vpop.f32.mrb[2].mxu0 }
 0x11b   :  { %v210_v43 = vadd.f32 %v8715_v38, %v209_v42  ;;  %v211_v44 = vpop.f32.mrb[3].mxu0 }
 0x11d   :  { %v329_v46 = vmax.f32 %v210_v43, 0.0 }
 0x11e   :  { %v214_v47 = vpop.f32.mrb[4].mxu0 }
 0x11f   :  { %v8719_v48 = vpack.c.bf16 %v329_v46, %v328_v45  ;;  %v216_v49 = vpop.f32.mrb[5].mxu0  ;;  %v215_v50 = vadd.f32 %v8715_v38, %v214_v47 }
 0x121   :  { %7311 = vmatpush1.bf16.msra.mxu1 %v8719_v48  ;;  %7399 = vmatpush1.bf16.msra.mxu0 %v8719_v48  ;;  %v330_v54 = vmax.f32 %v215_v50, 0.0 }
 0x122   :  { %v219_v51 = vpop.f32.mrb[6].mxu0  ;;  %7312 = vmatprep.subr.bf16.mxu1 %v8362_v0  ;;  %7400 = vmatprep.subr.bf16.mxu0 %v8362_v0 }
 0x123   :  { %v220_v52 = vadd.f32 %v8715_v38, %v219_v51  ;;  %v221_v53 = vpop.f32.mrb[7].mxu0 }
 0x125   :  { %v331_v55 = vmax.f32 %v220_v52, 0.0 }
 0x126   :  { %v224_v56 = vpop.f32.mrb[8].mxu0 }
 0x127   :  { %v8727_v57 = vpack.c.bf16 %v331_v55, %v330_v54  ;;  %v226_v58 = vpop.f32.mrb[9].mxu0  ;;  %v225_v59 = vadd.f32 %v8715_v38, %v224_v56 }
 0x129   :  { %7314 = vmatpush1.bf16.msra.mxu1 %v8727_v57  ;;  %7402 = vmatpush1.bf16.msra.mxu0 %v8727_v57  ;;  %v332_v63 = vmax.f32 %v225_v59, 0.0 }
 0x12a   :  { %v229_v60 = vpop.f32.mrb[10].mxu0  ;;  %7315 = vmatprep.subr.bf16.mxu1 %v8362_v0  ;;  %7403 = vmatprep.subr.bf16.mxu0 %v8362_v0 }
 0x12b   :  { %v230_v61 = vadd.f32 %v8715_v38, %v229_v60  ;;  %v231_v62 = vpop.f32.mrb[11].mxu0 }
 0x12d   :  { %v333_v1 = vmax.f32 %v230_v61, 0.0 }
 0x12e   :  { %v234_v2 = vpop.f32.mrb[12].mxu0 }
 0x12f   :  { %v8735_v3 = vpack.c.bf16 %v333_v1, %v332_v63  ;;  %v236_v4 = vpop.f32.mrb[13].mxu0  ;;  %v235_v5 = vadd.f32 %v8715_v38, %v234_v2 }
 0x131   :  { %7317 = vmatpush1.bf16.msra.mxu1 %v8735_v3  ;;  %7405 = vmatpush1.bf16.msra.mxu0 %v8735_v3  ;;  %v334_v9 = vmax.f32 %v235_v5, 0.0 }
 0x132   :  { %v239_v6 = vpop.f32.mrb[14].mxu0  ;;  %7318 = vmatprep.subr.bf16.mxu1 %v8362_v0  ;;  %7406 = vmatprep.subr.bf16.mxu0 %v8362_v0 }
 0x133   :  { %v240_v7 = vadd.f32 %v8715_v38, %v239_v6  ;;  %v241_v8 = vpop.f32.mrb[15].mxu0 }
 0x135   :  { %v335_v10 = vmax.f32 %v240_v7, 0.0 }
 0x136   :  { %v244_v11 = vpop.f32.mrb[16].mxu0 }
 0x137   :  { %v8743_v12 = vpack.c.bf16 %v335_v10, %v334_v9  ;;  %v246_v13 = vpop.f32.mrb[17].mxu0  ;;  %v245_v14 = vadd.f32 %v8715_v38, %v244_v11 }
 0x139   :  { %7320 = vmatpush1.bf16.msra.mxu1 %v8743_v12  ;;  %7408 = vmatpush1.bf16.msra.mxu0 %v8743_v12  ;;  %v336_v18 = vmax.f32 %v245_v14, 0.0 }
 0x13a   :  { %v249_v15 = vpop.f32.mrb[18].mxu0  ;;  %7321 = vmatprep.subr.bf16.mxu1 %v8362_v0  ;;  %7409 = vmatprep.subr.bf16.mxu0 %v8362_v0 }
 0x13b   :  { %v250_v16 = vadd.f32 %v8715_v38, %v249_v15  ;;  %v251_v17 = vpop.f32.mrb[19].mxu0 }
 0x13d   :  { %v337_v19 = vmax.f32 %v250_v16, 0.0 }
 0x13e   :  { %v254_v20 = vpop.f32.mrb[20].mxu0 }
 0x13f   :  { %v8751_v21 = vpack.c.bf16 %v337_v19, %v336_v18  ;;  %v256_v22 = vpop.f32.mrb[21].mxu0  ;;  %v255_v23 = vadd.f32 %v8715_v38, %v254_v20 }
 0x141   :  { %7323 = vmatpush1.bf16.msra.mxu1 %v8751_v21  ;;  %7411 = vmatpush1.bf16.msra.mxu0 %v8751_v21  ;;  %v338_v27 = vmax.f32 %v255_v23, 0.0 }
 0x142   :  { %v259_v24 = vpop.f32.mrb[22].mxu0  ;;  %7324 = vmatprep.subr.bf16.mxu1 %v8362_v0  ;;  %7412 = vmatprep.subr.bf16.mxu0 %v8362_v0 }
 0x143   :  { %v260_v25 = vadd.f32 %v8715_v38, %v259_v24  ;;  %v261_v26 = vpop.f32.mrb[23].mxu0 }
 0x145   :  { %v339_v28 = vmax.f32 %v260_v25, 0.0 }
 0x146   :  { %v264_v29 = vpop.f32.mrb[24].mxu0 }
 0x147   :  { %v8759_v30 = vpack.c.bf16 %v339_v28, %v338_v27  ;;  %v266_v31 = vpop.f32.mrb[25].mxu0  ;;  %v265_v32 = vadd.f32 %v8715_v38, %v264_v29 }
 0x149   :  { %7326 = vmatpush1.bf16.msra.mxu1 %v8759_v30  ;;  %7414 = vmatpush1.bf16.msra.mxu0 %v8759_v30  ;;  %v340_v36 = vmax.f32 %v265_v32, 0.0  ;;  %v8363_v32 = vmov 0.0  }
 0x14a   :  { %v269_v33 = vpop.f32.mrb[26].mxu0  ;;  %7327 = vmatprep.subr.bf16.mxu1 %v8362_v0  ;;  %7415 = vmatprep.subr.bf16.mxu0 %v8362_v0 }
 0x14b   :  { %v270_v34 = vadd.f32 %v8715_v38, %v269_v33  ;;  %v271_v35 = vpop.f32.mrb[27].mxu0  ;;  %v361_v33 = vld [vmem:[%s10613_s3] sm:$0xff] }
 0x14c   :  { %v6022_v35 = vld [vmem:[%s10613_s3 + $0x98] sm:$0xff] }
 0x14d   :  { %v341_v37 = vmax.f32 %v270_v34, 0.0  ;;  %v364_v34 = vld [vmem:[%s10613_s3 + $0x18] sm:$0xff] }
 0x14e   :  { %v274_v39 = vpop.f32.mrb[28].mxu0 }
 0x14f   :  { %v8767_v40 = vpack.c.bf16 %v341_v37, %v340_v36  ;;  %v276_v41 = vpop.f32.mrb[29].mxu0  ;;  %v275_v42 = vadd.f32 %v8715_v38, %v274_v39  ;;  %v363_v36 = vld [vmem:[%s10613_s3 + $0x10] sm:$0xff]  ;;  %v366_v39 = vld [vmem:[%s10613_s3 + $0x28] sm:$0xff] }
 0x150   :  { %v6021_v37 = vld [vmem:[%s10613_s3 + $0x90] sm:$0xff]  ;;  %v6024_v41 = vld [vmem:[%s10613_s3 + $0xa8] sm:$0xff] }
 0x151   :  { %7329 = vmatpush1.bf16.msra.mxu1 %v8767_v40  ;;  %7417 = vmatpush1.bf16.msra.mxu0 %v8767_v40  ;;  %v342_v46 = vmax.f32 %v275_v42, 0.0  ;;  %v365_v42 = vld [vmem:[%s10613_s3 + $0x20] sm:$0xff] }
 0x152   :  { %v279_v43 = vpop.f32.mrb[30].mxu0  ;;  %7330 = vmatprep.subr.bf16.mxu1 %v8362_v0  ;;  %7418 = vmatprep.subr.bf16.mxu0 %v8362_v0 }
 0x153   :  { %v280_v44 = vadd.f32 %v8715_v38, %v279_v43  ;;  %v281_v45 = vpop.f32.mrb[31].mxu0  ;;  %v6023_v43 = vld [vmem:[%s10613_s3 + $0xa0] sm:$0xff] }
 0x154   :  { %v6026_v45 = vld [vmem:[%s10613_s3 + $0xb8] sm:$0xff] }
 0x155   :  { %v343_v47 = vmax.f32 %v280_v44, 0.0  ;;  %v368_v44 = vld [vmem:[%s10613_s3 + $0x38] sm:$0xff] }
 0x156   :  { %v284_v49 = vpop.f32.mrb[32].mxu0 }
 0x157   :  { %v8775_v50 = vpack.c.bf16 %v343_v47, %v342_v46  ;;  %v286_v51 = vpop.f32.mrb[33].mxu0  ;;  %v285_v52 = vadd.f32 %v8715_v38, %v284_v49  ;;  %v367_v46 = vld [vmem:[%s10613_s3 + $0x30] sm:$0xff]  ;;  %v6060_v49 = vld [vmem:[%s10613_s3 + $0x108] sm:$0xff] }
 0x158   :  { %v6025_v47 = vld [vmem:[%s10613_s3 + $0xb0] sm:$0xff]  ;;  %v6059_v51 = vld [vmem:[%s10613_s3 + $0x100] sm:$0xff] }
 0x159   :  { %7332 = vmatpush1.bf16.msra.mxu1 %v8775_v50  ;;  %7420 = vmatpush1.bf16.msra.mxu0 %v8775_v50  ;;  %v344_v56 = vmax.f32 %v285_v52, 0.0  ;;  %v6062_v52 = vld [vmem:[%s10613_s3 + $0x118] sm:$0xff] }
 0x15a   :  { %v289_v53 = vpop.f32.mrb[34].mxu0  ;;  %7333 = vmatprep.subr.bf16.mxu1 %v8362_v0  ;;  %7421 = vmatprep.subr.bf16.mxu0 %v8362_v0 }
 0x15b   :  { %v290_v54 = vadd.f32 %v8715_v38, %v289_v53  ;;  %v291_v55 = vpop.f32.mrb[35].mxu0  ;;  %v6061_v53 = vld [vmem:[%s10613_s3 + $0x110] sm:$0xff] }
 0x15c   :  { %v6063_v55 = vld [vmem:[%s10613_s3 + $0x120] sm:$0xff] }
 0x15d   :  { %v345_v58 = vmax.f32 %v290_v54, 0.0  ;;  %v6064_v54 = vld [vmem:[%s10613_s3 + $0x128] sm:$0xff] }
 0x15e   :  { %v294_v59 = vpop.f32.mrb[36].mxu0 }
 0x15f   :  { %v8783_v60 = vpack.c.bf16 %v345_v58, %v344_v56  ;;  %v296_v61 = vpop.f32.mrb[37].mxu0  ;;  %v295_v62 = vadd.f32 %v8715_v38, %v294_v59  ;;  %v6066_v56 = vld [vmem:[%s10613_s3 + $0x138] sm:$0xff]  ;;  %v6065_v58 = vld [vmem:[%s10613_s3 + $0x130] sm:$0xff]  ;;  %v6080_v59 = vld [vmem:[%s10613_s3 + $0x148] sm:$0xff] }
 0x160   :  { %v467_v61 = vld [vmem:[%s10615_s4] sm:$0xff] }
 0x161   :  { %7335 = vmatpush1.bf16.msra.mxu1 %v8783_v60  ;;  %7423 = vmatpush1.bf16.msra.mxu0 %v8783_v60  ;;  %v346_v4 = vmax.f32 %v295_v62, 0.0  ;;  %v468_v62 = vld [vmem:[%s10615_s4 + $0x8] sm:$0xff] }
 0x162   :  { %v299_v63 = vpop.f32.mrb[38].mxu0  ;;  %7336 = vmatprep.subr.bf16.mxu1 %v8362_v0  ;;  %7424 = vmatprep.subr.bf16.mxu0 %v8362_v0 }
 0x163   :  { %v300_v1 = vadd.f32 %v8715_v38, %v299_v63  ;;  %v301_v2 = vpop.f32.mrb[39].mxu0  ;;  %v7345_v63 = vpack.c.bf16 %v468_v62, %v467_v61  ;;  %v6001_v61 = vld [vmem:[%s10613_s3 + $0x50] sm:$0xff]  ;;  %v6004_v62 = vld [vmem:[%s10613_s3 + $0x68] sm:$0xff] }
 0x164   :  { %v470_v2 = vld [vmem:[%s10615_s4 + $0x18] sm:$0xff] }
 0x165   :  { %v347_v5 = vmax.f32 %v300_v1, 0.0  ;;  %v469_v1 = vld [vmem:[%s10615_s4 + $0x10] sm:$0xff] }
 0x166   :  { %v304_v6 = vpop.f32.mrb[40].mxu0 }
 0x167   :  { %v8791_v7 = vpack.c.bf16 %v347_v5, %v346_v4  ;;  %v306_v8 = vpop.f32.mrb[41].mxu0  ;;  %v305_v9 = vadd.f32 %v8715_v38, %v304_v6  ;;  %v7349_v4 = vpack.c.bf16 %v470_v2, %v469_v1  ;;  %v6079_v5 = vld [vmem:[%s10613_s3 + $0x140] sm:$0xff]  ;;  %v6082_v6 = vld [vmem:[%s10613_s3 + $0x158] sm:$0xff] }
 0x168   :  { %v6081_v8 = vld [vmem:[%s10613_s3 + $0x150] sm:$0xff]  ;;  %v6006_v1 = vld [vmem:[%s10613_s3 + $0x78] sm:$0xff]  ;;  %v6011_v2 = vld [vmem:[%s10615_s4 + $0x20] sm:$0xff] }
 0x169   :  { %7338 = vmatpush1.bf16.msra.mxu1 %v8791_v7  ;;  %7426 = vmatpush1.bf16.msra.mxu0 %v8791_v7  ;;  %v348_v14 = vmax.f32 %v305_v9, 0.0  ;;  %v6084_v9 = vld [vmem:[%s10613_s3 + $0x168] sm:$0xff] }
 0x16a   :  { %v309_v10 = vpop.f32.mrb[42].mxu0  ;;  %7339 = vmatprep.subr.bf16.mxu1 %v8362_v0  ;;  %7427 = vmatprep.subr.bf16.mxu0 %v8362_v0 }
 0x16b   :  { %v310_v11 = vadd.f32 %v8715_v38, %v309_v10  ;;  %v311_v13 = vpop.f32.mrb[43].mxu0  ;;  %v6083_v10 = vld [vmem:[%s10613_s3 + $0x160] sm:$0xff] }
 0x16c   :  { %v6085_v13 = vld [vmem:[%s10613_s3 + $0x170] sm:$0xff] }
 0x16d   :  { %v349_v15 = vmax.f32 %v310_v11, 0.0  ;;  %v6086_v11 = vld [vmem:[%s10613_s3 + $0x178] sm:$0xff] }
 0x16e   :  { %v314_v16 = vpop.f32.mrb[44].mxu0 }
 0x16f   :  { %v8799_v17 = vpack.c.bf16 %v349_v15, %v348_v14  ;;  %v316_v18 = vpop.f32.mrb[45].mxu0  ;;  %v315_v19 = vadd.f32 %v8715_v38, %v314_v16  ;;  %v6120_v14 = vld [vmem:[%s10613_s3 + $0x1c8] sm:$0xff]  ;;  %v6119_v15 = vld [vmem:[%s10613_s3 + $0x1c0] sm:$0xff]  ;;  %v6122_v16 = vld [vmem:[%s10613_s3 + $0x1d8] sm:$0xff] }
 0x170   :  { %v6121_v18 = vld [vmem:[%s10613_s3 + $0x1d0] sm:$0xff] }
 0x171   :  { %7341 = vmatpush1.bf16.msra.mxu1 %v8799_v17  ;;  %7429 = vmatpush1.bf16.msra.mxu0 %v8799_v17  ;;  %v350_v24 = vmax.f32 %v315_v19, 0.0  ;;  %v6124_v19 = vld [vmem:[%s10613_s3 + $0x1e8] sm:$0xff] }
 0x172   :  { %v319_v20 = vpop.f32.mrb[46].mxu0  ;;  %7342 = vmatprep.subr.bf16.mxu1 %v8362_v0  ;;  %7430 = vmatprep.subr.bf16.mxu0 %v8362_v0 }
 0x173   :  { %v320_v22 = vadd.f32 %v8715_v38, %v319_v20  ;;  %v321_v23 = vpop.f32.mrb[47].mxu0  ;;  %v6123_v20 = vld [vmem:[%s10613_s3 + $0x1e0] sm:$0xff] }
 0x174   :  { %v6125_v23 = vld [vmem:[%s10613_s3 + $0x1f0] sm:$0xff] }
 0x175   :  { %v351_v25 = vmax.f32 %v320_v22, 0.0  ;;  %v6126_v22 = vld [vmem:[%s10613_s3 + $0x1f8] sm:$0xff] }
 0x176   :  { %v324_v26 = vpop.f32.mrb[48].mxu0 }
 0x177   :  { %v8807_v27 = vpack.c.bf16 %v351_v25, %v350_v24  ;;  %v325_v28 = vadd.f32 %v8715_v38, %v324_v26  ;;  %v326_v29 = vpop.f32.mrb[49].mxu0  ;;  %v6019_v38 = vld [vmem:[%s10613_s3 + $0x80] sm:$0xff]  ;;  %v6160_v24 = vld [vmem:[%s10613_s3 + $0x248] sm:$0xff]  ;;  %v6162_v26 = vld [vmem:[%s10613_s3 + $0x258] sm:$0xff] }
 0x178   :  { %v6159_v25 = vld [vmem:[%s10613_s3 + $0x240] sm:$0xff]  ;;  %v6164_v29 = vld [vmem:[%s10613_s3 + $0x268] sm:$0xff] }
 0x179   :  { %v8810_v31 = vmax.f32 %v325_v28, 0.0  ;;  %7344 = vmatpush1.bf16.msra.mxu1 %v8807_v27  ;;  %7432 = vmatpush1.bf16.msra.mxu0 %v8807_v27  ;;  %v6161_v28 = vld [vmem:[%s10613_s3 + $0x250] sm:$0xff] }
 0x17a   :  { %430 = vmatprep.subr.mxu1 %v8363_v32  ;;  %854 = vmatprep.subr.mxu0 %v8363_v32 }
 0x17d   :  { %431 = vmatpush1.msra.mxu1 %v8810_v31  ;;  %855 = vmatpush1.msra.mxu0 %v8810_v31 }
 0x17e   :  { %447 = vmatmul.mubr.f32.vlgmr.msra.gmra.mrb[0].mxu1 %v361_v33  ;;  %7485 = vmatprep.subr.bf16.mxu0 %v8362_v0  ;;  %v6163_v33 = vld [vmem:[%s10613_s3 + $0x260] sm:$0xff] }
 0x17f   :  { %871 = vmatmul.mubr.f32.vlgmr.msra.gmra.mrb[50].mxu0 %v6019_v38  ;;  %5992 = vmatprep.mubr.msk.f32.mxu1 %vm369_vm0, %v364_v34  ;;  %v6166_v38 = vld [vmem:[%s10613_s3 + $0x278] sm:$0xff]  ;;  %v6165_v34 = vld [vmem:[%s10613_s3 + $0x270] sm:$0xff] }
 0x180   :  { %7487 = vmatpush1.bf16.msra.mxu0 %v8719_v48  ;;  %6028 = vmatprep.mubr.msk.f32.mxu0 %vm369_vm0, %v6022_v35 }
 0x181   :  { %7488 = vmatprep.subr.bf16.mxu0 %v8362_v0  ;;  %7346 = vmatprep.subr.bf16.mxu1 %v7345_v63 }
 0x182   :  { %452 = vmatmul.mubr.f32.gmra.mrb[2].mxu1 %v363_v36  ;;  %v6180_v36 = vld [vmem:[%s10613_s3 + $0x288] sm:$0xff] }
 0x183   :  { %876 = vmatmul.mubr.f32.gmra.mrb[52].mxu0 %v6021_v37  ;;  %5993 = vmatprep.mubr.msk.f32.mxu1 %vm369_vm0, %v366_v39 }
 0x184   :  { %7490 = vmatpush1.bf16.msra.mxu0 %v8727_v57  ;;  %6029 = vmatprep.mubr.msk.f32.mxu0 %vm369_vm0, %v6024_v41 }
 0x185   :  { %7491 = vmatprep.subr.bf16.mxu0 %v8362_v0  ;;  %7348 = vmatpush3.bf16.msra.mxu1 %v7345_v63  ;;  %v6003_v63 = vld [vmem:[%s10613_s3 + $0x60] sm:$0xff] }
 0x186   :  { %457 = vmatmul.mubr.f32.gmra.mrb[4].mxu1 %v365_v42  ;;  %7350 = vmatprep.subr.bf16.mxu1 %v7349_v4 }
 0x187   :  { %881 = vmatmul.mubr.f32.gmra.mrb[54].mxu0 %v6023_v43  ;;  %5994 = vmatprep.mubr.msk.f32.mxu1 %vm369_vm0, %v368_v44  ;;  %v6000_v44 = vld [vmem:[%s10613_s3 + $0x48] sm:$0xff] }
 0x188   :  { %7493 = vmatpush1.bf16.msra.mxu0 %v8735_v3  ;;  %6030 = vmatprep.mubr.msk.f32.mxu0 %vm369_vm0, %v6026_v45 }
 0x189   :  { %7494 = vmatprep.subr.bf16.mxu0 %v8362_v0  ;;  %7352 = vmatpush3.bf16.msra.mxu1 %v7349_v4  ;;  %v6012_v4 = vld [vmem:[%s10615_s4 + $0x28] sm:$0xff] }
 0x18a   :  { %462 = vmatmul.mubr.f32.gmra.mrb[6].mxu1 %v367_v46  ;;  %7353 = vmatprep.subr.bf16.mxu1 %v8362_v0 }
 0x18b   :  { %886 = vmatmul.mubr.f32.gmra.mrb[56].mxu0 %v6025_v47  ;;  %v6179_v47 = vld [vmem:[%s10613_s3 + $0x280] sm:$0xff] }
 0x18c   :  { %7496 = vmatpush1.bf16.msra.mxu0 %v8743_v12  ;;  %6067 = vmatprep.mubr.msk.f32.mxu0 %vm369_vm0, %v6060_v49  ;;  %v6182_v49 = vld [vmem:[%s10613_s3 + $0x298] sm:$0xff] }
 0x18d   :  { %7497 = vmatprep.subr.bf16.mxu0 %v8362_v0 }
 0x190   :  { %7499 = vmatpush1.bf16.msra.mxu0 %v8751_v21 }
 0x191   :  { %7500 = vmatprep.subr.bf16.mxu0 %v8362_v0 }
 0x194   :  { %7502 = vmatpush1.bf16.msra.mxu0 %v8759_v30 }
 0x195   :  { %7503 = vmatprep.subr.bf16.mxu0 %v8362_v0 }
 0x198   :  { %7505 = vmatpush1.bf16.msra.mxu0 %v8767_v40 }
 0x199   :  { %7506 = vmatprep.subr.bf16.mxu0 %v8362_v0 }
 0x19c   :  { %7508 = vmatpush1.bf16.msra.mxu0 %v8775_v50 }
 0x19d   :  { %7509 = vmatprep.subr.bf16.mxu0 %v8362_v0 }
 0x1a0   :  { %7511 = vmatpush1.bf16.msra.mxu0 %v8783_v60 }
 0x1a1   :  { %7512 = vmatprep.subr.bf16.mxu0 %v8362_v0 }
 0x1a4   :  { %7514 = vmatpush1.bf16.msra.mxu0 %v8791_v7 }
 0x1a5   :  { %7515 = vmatprep.subr.bf16.mxu0 %v8362_v0 }
 0x1a8   :  { %7517 = vmatpush1.bf16.msra.mxu0 %v8799_v17 }
 0x1a9   :  { %7518 = vmatprep.subr.bf16.mxu0 %v8362_v0 }
 0x1ac   :  { %7520 = vmatpush1.bf16.msra.mxu0 %v8807_v27 }
 0x1ad   :  { %1278 = vmatprep.subr.mxu0 %v8363_v32 }
 0x1b0   :  { %1279 = vmatpush1.msra.mxu0 %v8810_v31 }
 0x1b1   :  { %7529 = vmatprep.subr.bf16.mxu0 %v8362_v0  ;;  %1295 = vmatmul.mubr.f32.vlgmr.msra.gmra.mrb[58].mxu0 %v6059_v51  ;;  %v6181_v51 = vld [vmem:[%s10613_s3 + $0x290] sm:$0xff] }
 0x1b2   :  { %7531 = vmatpush1.bf16.msra.mxu0 %v8719_v48  ;;  %6068 = vmatprep.mubr.msk.f32.mxu0 %vm369_vm0, %v6062_v52  ;;  %v6184_v52 = vld [vmem:[%s10613_s3 + $0x2a8] sm:$0xff] }
 0x1b3   :  { %7532 = vmatprep.subr.bf16.mxu0 %v8362_v0 }
 0x1b5   :  { %1300 = vmatmul.mubr.f32.gmra.mrb[60].mxu0 %v6061_v53  ;;  %v6183_v53 = vld [vmem:[%s10613_s3 + $0x2a0] sm:$0xff] }
 0x1b6   :  { %7534 = vmatpush1.bf16.msra.mxu0 %v8727_v57  ;;  %6069 = vmatprep.mubr.msk.f32.mxu0 %vm369_vm0, %v6064_v54  ;;  %v6186_v54 = vld [vmem:[%s10613_s3 + $0x2b8] sm:$0xff] }
 0x1b7   :  { %7535 = vmatprep.subr.bf16.mxu0 %v8362_v0 }
 0x1b9   :  { %1305 = vmatmul.mubr.f32.gmra.mrb[62].mxu0 %v6063_v55  ;;  %v6185_v55 = vld [vmem:[%s10613_s3 + $0x2b0] sm:$0xff] }
 0x1ba   :  { %7537 = vmatpush1.bf16.msra.mxu0 %v8735_v3  ;;  %6070 = vmatprep.mubr.msk.f32.mxu0 %vm369_vm0, %v6066_v56  ;;  %v6220_v56 = vld [vmem:[%s10613_s3 + $0x308] sm:$0xff] }
 0x1bb   :  { %7538 = vmatprep.subr.bf16.mxu0 %v8362_v0 }
 0x1bd   :  { %1310 = vmatmul.mubr.f32.gmra.mrb[64].mxu0 %v6065_v58  ;;  %v5999_v58 = vld [vmem:[%s10613_s3 + $0x40] sm:$0xff] }
 0x1be   :  { %7540 = vmatpush1.bf16.msra.mxu0 %v8743_v12  ;;  %6087 = vmatprep.mubr.msk.f32.mxu0 %vm369_vm0, %v6080_v59  ;;  %v6002_v59 = vld [vmem:[%s10613_s3 + $0x58] sm:$0xff] }
 0x1bf   :  { %7541 = vmatprep.subr.bf16.mxu0 %v8362_v0 }
 0x1c2   :  { %7543 = vmatpush1.bf16.msra.mxu0 %v8751_v21 }
 0x1c3   :  { %7544 = vmatprep.subr.bf16.mxu0 %v8362_v0 }
 0x1c6   :  { %7546 = vmatpush1.bf16.msra.mxu0 %v8759_v30 }
 0x1c7   :  { %7547 = vmatprep.subr.bf16.mxu0 %v8362_v0 }
 0x1ca   :  { %7549 = vmatpush1.bf16.msra.mxu0 %v8767_v40 }
 0x1cb   :  { %7550 = vmatprep.subr.bf16.mxu0 %v8362_v0 }
 0x1ce   :  { %7552 = vmatpush1.bf16.msra.mxu0 %v8775_v50 }
 0x1cf   :  { %7553 = vmatprep.subr.bf16.mxu0 %v8362_v0 }
 0x1d2   :  { %7555 = vmatpush1.bf16.msra.mxu0 %v8783_v60 }
 0x1d3   :  { %7556 = vmatprep.subr.bf16.mxu0 %v8362_v0 }
 0x1d6   :  { %7558 = vmatpush1.bf16.msra.mxu0 %v8791_v7 }
 0x1d7   :  { %7559 = vmatprep.subr.bf16.mxu0 %v8362_v0 }
 0x1da   :  { %7561 = vmatpush1.bf16.msra.mxu0 %v8799_v17 }
 0x1db   :  { %7562 = vmatprep.subr.bf16.mxu0 %v8362_v0 }
 0x1de   :  { %7564 = vmatpush1.bf16.msra.mxu0 %v8807_v27 }
 0x1df   :  { %1490 = vmatprep.subr.mxu0 %v8363_v32 }
 0x1e2   :  { %1491 = vmatpush1.msra.mxu0 %v8810_v31 }
 0x1e3   :  { %7617 = vmatprep.subr.bf16.mxu0 %v8362_v0  ;;  %1507 = vmatmul.mubr.f32.vlgmr.msra.gmra.mrb[66].mxu0 %v6079_v5  ;;  %v7389_v5 = vpack.c.bf16 %v6012_v4, %v6011_v2  ;;  %v6046_v2 = vld [vmem:[%s10613_s3 + $0xf8] sm:$0xff]  ;;  %v6045_v4 = vld [vmem:[%s10613_s3 + $0xf0] sm:$0xff] }
 0x1e4   :  { %7619 = vmatpush1.bf16.msra.mxu0 %v8719_v48  ;;  %6088 = vmatprep.mubr.msk.f32.mxu0 %vm369_vm0, %v6082_v6  ;;  %v6005_v6 = vld [vmem:[%s10613_s3 + $0x70] sm:$0xff] }
 0x1e5   :  { %7620 = vmatprep.subr.bf16.mxu0 %v8362_v0 }
 0x1e7   :  { %1512 = vmatmul.mubr.f32.gmra.mrb[68].mxu0 %v6081_v8  ;;  %v6219_v8 = vld [vmem:[%s10613_s3 + $0x300] sm:$0xff] }
 0x1e8   :  { %7622 = vmatpush1.bf16.msra.mxu0 %v8727_v57  ;;  %6089 = vmatprep.mubr.msk.f32.mxu0 %vm369_vm0, %v6084_v9  ;;  %v6222_v9 = vld [vmem:[%s10613_s3 + $0x318] sm:$0xff] }
 0x1e9   :  { %7623 = vmatprep.subr.bf16.mxu0 %v8362_v0 }
 0x1eb   :  { %1517 = vmatmul.mubr.f32.gmra.mrb[70].mxu0 %v6083_v10  ;;  %v6221_v10 = vld [vmem:[%s10613_s3 + $0x310] sm:$0xff] }
 0x1ec   :  { %7625 = vmatpush1.bf16.msra.mxu0 %v8735_v3  ;;  %6090 = vmatprep.mubr.msk.f32.mxu0 %vm369_vm0, %v6086_v11  ;;  %v6224_v11 = vld [vmem:[%s10613_s3 + $0x328] sm:$0xff] }
 0x1ed   :  { %7626 = vmatprep.subr.bf16.mxu0 %v8362_v0 }
 0x1ef   :  { %1522 = vmatmul.mubr.f32.gmra.mrb[72].mxu0 %v6085_v13  ;;  %v6223_v13 = vld [vmem:[%s10613_s3 + $0x320] sm:$0xff] }
 0x1f0   :  { %7628 = vmatpush1.bf16.msra.mxu0 %v8743_v12  ;;  %6127 = vmatprep.mubr.msk.f32.mxu0 %vm369_vm0, %v6120_v14  ;;  %v6226_v14 = vld [vmem:[%s10613_s3 + $0x338] sm:$0xff] }
 0x1f1   :  { %7629 = vmatprep.subr.bf16.mxu0 %v8362_v0 }
 0x1f4   :  { %7631 = vmatpush1.bf16.msra.mxu0 %v8751_v21 }
 0x1f5   :  { %7632 = vmatprep.subr.bf16.mxu0 %v8362_v0 }
 0x1f8   :  { %7634 = vmatpush1.bf16.msra.mxu0 %v8759_v30 }
 0x1f9   :  { %7635 = vmatprep.subr.bf16.mxu0 %v8362_v0 }
 0x1fc   :  { %7637 = vmatpush1.bf16.msra.mxu0 %v8767_v40 }
 0x1fd   :  { %7638 = vmatprep.subr.bf16.mxu0 %v8362_v0 }
 0x200   :  { %7640 = vmatpush1.bf16.msra.mxu0 %v8775_v50 }
 0x201   :  { %7641 = vmatprep.subr.bf16.mxu0 %v8362_v0 }
 0x204   :  { %7643 = vmatpush1.bf16.msra.mxu0 %v8783_v60 }
 0x205   :  { %7644 = vmatprep.subr.bf16.mxu0 %v8362_v0 }
 0x208   :  { %7646 = vmatpush1.bf16.msra.mxu0 %v8791_v7 }
 0x209   :  { %7647 = vmatprep.subr.bf16.mxu0 %v8362_v0 }
 0x20c   :  { %7649 = vmatpush1.bf16.msra.mxu0 %v8799_v17 }
 0x20d   :  { %7650 = vmatprep.subr.bf16.mxu0 %v8362_v0 }
 0x210   :  { %7652 = vmatpush1.bf16.msra.mxu0 %v8807_v27 }
 0x211   :  { %1914 = vmatprep.subr.mxu0 %v8363_v32 }
 0x214   :  { %1915 = vmatpush1.msra.mxu0 %v8810_v31 }
 0x215   :  { %7705 = vmatprep.subr.bf16.mxu0 %v8362_v0  ;;  %1931 = vmatmul.mubr.f32.vlgmr.msra.gmra.mrb[74].mxu0 %v6119_v15  ;;  %v6225_v15 = vld [vmem:[%s10613_s3 + $0x330] sm:$0xff] }
 0x216   :  { %7707 = vmatpush1.bf16.msra.mxu0 %v8719_v48  ;;  %6128 = vmatprep.mubr.msk.f32.mxu0 %vm369_vm0, %v6122_v16  ;;  %v6260_v16 = vld [vmem:[%s10613_s3 + $0x388] sm:$0xff] }
 0x217   :  { %7708 = vmatprep.subr.bf16.mxu0 %v8362_v0 }
 0x219   :  { %1936 = vmatmul.mubr.f32.gmra.mrb[76].mxu0 %v6121_v18  ;;  %v6013_v18 = vld [vmem:[%s10615_s4 + $0x30] sm:$0xff] }
 0x21a   :  { %7710 = vmatpush1.bf16.msra.mxu0 %v8727_v57  ;;  %6129 = vmatprep.mubr.msk.f32.mxu0 %vm369_vm0, %v6124_v19  ;;  %v6014_v19 = vld [vmem:[%s10615_s4 + $0x38] sm:$0xff] }
 0x21b   :  { %7711 = vmatprep.subr.bf16.mxu0 %v8362_v0 }
 0x21d   :  { %1941 = vmatmul.mubr.f32.gmra.mrb[78].mxu0 %v6123_v20  ;;  %v6259_v20 = vld [vmem:[%s10613_s3 + $0x380] sm:$0xff] }
 0x21e   :  { %7713 = vmatpush1.bf16.msra.mxu0 %v8735_v3  ;;  %6130 = vmatprep.mubr.msk.f32.mxu0 %vm369_vm0, %v6126_v22  ;;  %v7393_v22 = vpack.c.bf16 %v6014_v19, %v6013_v18 }
 0x21f   :  { %7714 = vmatprep.subr.bf16.mxu0 %v8362_v0 }
 0x221   :  { %1946 = vmatmul.mubr.f32.gmra.mrb[80].mxu0 %v6125_v23  ;;  %v6031_v23 = vld [vmem:[%s10615_s4 + $0x40] sm:$0xff] }
 0x222   :  { %7716 = vmatpush1.bf16.msra.mxu0 %v8743_v12  ;;  %6167 = vmatprep.mubr.msk.f32.mxu0 %vm369_vm0, %v6160_v24  ;;  %v6032_v24 = vld [vmem:[%s10615_s4 + $0x48] sm:$0xff] }
 0x223   :  { %7717 = vmatprep.subr.bf16.mxu0 %v8362_v0 }
 0x226   :  { %7719 = vmatpush1.bf16.msra.mxu0 %v8751_v21 }
 0x227   :  { %7720 = vmatprep.subr.bf16.mxu0 %v8362_v0 }
 0x22a   :  { %7722 = vmatpush1.bf16.msra.mxu0 %v8759_v30 }
 0x22b   :  { %7723 = vmatprep.subr.bf16.mxu0 %v8362_v0 }
 0x22e   :  { %7725 = vmatpush1.bf16.msra.mxu0 %v8767_v40 }
 0x22f   :  { %7726 = vmatprep.subr.bf16.mxu0 %v8362_v0 }
 0x232   :  { %7728 = vmatpush1.bf16.msra.mxu0 %v8775_v50 }
 0x233   :  { %7729 = vmatprep.subr.bf16.mxu0 %v8362_v0 }
 0x236   :  { %7731 = vmatpush1.bf16.msra.mxu0 %v8783_v60 }
 0x237   :  { %7732 = vmatprep.subr.bf16.mxu0 %v8362_v0 }
 0x23a   :  { %7734 = vmatpush1.bf16.msra.mxu0 %v8791_v7 }
 0x23b   :  { %7735 = vmatprep.subr.bf16.mxu0 %v8362_v0 }
 0x23e   :  { %7737 = vmatpush1.bf16.msra.mxu0 %v8799_v17 }
 0x23f   :  { %7738 = vmatprep.subr.bf16.mxu0 %v8362_v0 }
 0x242   :  { %7740 = vmatpush1.bf16.msra.mxu0 %v8807_v27 }
 0x243   :  { %2338 = vmatprep.subr.mxu0 %v8363_v32 }
 0x246   :  { %2339 = vmatpush1.msra.mxu0 %v8810_v31 }
 0x247   :  { %7749 = vmatprep.subr.bf16.mxu0 %v8362_v0  ;;  %2355 = vmatmul.mubr.f32.vlgmr.msra.gmra.mrb[82].mxu0 %v6159_v25  ;;  %v7433_v25 = vpack.c.bf16 %v6032_v24, %v6031_v23 }
 0x248   :  { %7751 = vmatpush1.bf16.msra.mxu0 %v8719_v48  ;;  %6168 = vmatprep.mubr.msk.f32.mxu0 %vm369_vm0, %v6162_v26 }
 0x249   :  { %7752 = vmatprep.subr.bf16.mxu0 %v8362_v0 }
 0x24b   :  { %2360 = vmatmul.mubr.f32.gmra.mrb[84].mxu0 %v6161_v28 }
 0x24c   :  { %7754 = vmatpush1.bf16.msra.mxu0 %v8727_v57  ;;  %6169 = vmatprep.mubr.msk.f32.mxu0 %vm369_vm0, %v6164_v29 }
 0x24d   :  { %7755 = vmatprep.subr.bf16.mxu0 %v8362_v0 }
 0x24f   :  { %2365 = vmatmul.mubr.f32.gmra.mrb[86].mxu0 %v6163_v33 }
 0x250   :  { %7757 = vmatpush1.bf16.msra.mxu0 %v8735_v3  ;;  %6170 = vmatprep.mubr.msk.f32.mxu0 %vm369_vm0, %v6166_v38 }
 0x251   :  { %v448_v35 = vpop.f32.mrb[0].mxu1  ;;  %7758 = vmatprep.subr.bf16.mxu0 %v8362_v0 }
 0x252   :  { %v450_v37 = vpop.f32.mrb[1].mxu1  ;;  %6755 = vmatprep.mubr.msk.f32.mxu1 %vm471_vm1, %v448_v35  ;;  %v872_v26 = vpop.f32.mrb[50].mxu0 }
 0x253   :  { %2370 = vmatmul.mubr.f32.gmra.mrb[88].mxu0 %v6165_v34  ;;  %v874_v28 = vpop.f32.mrb[51].mxu0 }
 0x254   :  { %7760 = vmatpush1.bf16.msra.mxu0 %v8743_v12  ;;  %6187 = vmatprep.mubr.msk.f32.mxu0 %vm369_vm0, %v6180_v36 }
 0x255   :  { %v453_v39 = vpop.f32.mrb[2].mxu1  ;;  %7761 = vmatprep.subr.bf16.mxu0 %v8362_v0 }
 0x256   :  { %v455_v41 = vpop.f32.mrb[3].mxu1  ;;  %6756 = vmatmul.mubr.msk.f32.vlgmr.msra.gmra.mrb[8].mxu1 %vm471_vm1, %v453_v39  ;;  %v877_v29 = vpop.f32.mrb[52].mxu0 }
 0x257   :  { %7355 = vmatpush1.bf16.msra.mxu1 %v8719_v48  ;;  %v879_v33 = vpop.f32.mrb[53].mxu0 }
 0x258   :  { %7763 = vmatpush1.bf16.msra.mxu0 %v8751_v21  ;;  %7356 = vmatprep.subr.bf16.mxu1 %v8362_v0 }
 0x259   :  { %7764 = vmatprep.subr.bf16.mxu0 %v8362_v0  ;;  %v458_v42 = vpop.f32.mrb[4].mxu1 }
 0x25a   :  { %v460_v43 = vpop.f32.mrb[5].mxu1  ;;  %6758 = vmatprep.mubr.msk.f32.mxu1 %vm471_vm1, %v458_v42  ;;  %v882_v38 = vpop.f32.mrb[54].mxu0  ;;  %v6033_v42 = vld [vmem:[%s10615_s4 + $0x50] sm:$0xff] }
 0x25b   :  { %7358 = vmatpush1.bf16.msra.mxu1 %v8727_v57  ;;  %v884_v34 = vpop.f32.mrb[55].mxu0  ;;  %v6034_v43 = vld [vmem:[%s10615_s4 + $0x58] sm:$0xff] }
 0x25c   :  { %7766 = vmatpush1.bf16.msra.mxu0 %v8759_v30  ;;  %7359 = vmatprep.subr.bf16.mxu1 %v8362_v0  ;;  %v6074_v34 = vld [vmem:[%s10615_s4 + $0x98] sm:$0xff] }
 0x25d   :  { %7767 = vmatprep.subr.bf16.mxu0 %v8362_v0  ;;  %v463_v45 = vpop.f32.mrb[6].mxu1 }
 0x25e   :  { %v465_v46 = vpop.f32.mrb[7].mxu1  ;;  %6759 = vmatmul.mubr.msk.f32.gmra.mrb[10].mxu1 %vm471_vm1, %v463_v45  ;;  %v887_v35 = vpop.f32.mrb[56].mxu0  ;;  %v7437_v45 = vpack.c.bf16 %v6034_v43, %v6033_v42  ;;  %v6092_v42 = vld [vmem:[%s10615_s4 + $0xa8] sm:$0xff] }
 0x25f   :  { %7361 = vmatpush1.bf16.msra.mxu1 %v8735_v3  ;;  %6007 = vmatprep.mubr.msk.f32.mxu1 %vm369_vm0, %v6000_v44  ;;  %v889_v36 = vpop.f32.mrb[57].mxu0 }
 0x260   :  { %7769 = vmatpush1.bf16.msra.mxu0 %v8767_v40  ;;  %7362 = vmatprep.subr.bf16.mxu1 %v8362_v0 }
 0x261   :  { %7770 = vmatprep.subr.bf16.mxu0 %v8362_v0 }
 0x263   :  { %7364 = vmatpush1.bf16.msra.mxu1 %v8743_v12 }
 0x264   :  { %7772 = vmatpush1.bf16.msra.mxu0 %v8775_v50  ;;  %7365 = vmatprep.subr.bf16.mxu1 %v8362_v0 }
 0x265   :  { %7773 = vmatprep.subr.bf16.mxu0 %v8362_v0 }
 0x267   :  { %7367 = vmatpush1.bf16.msra.mxu1 %v8751_v21 }
 0x268   :  { %7775 = vmatpush1.bf16.msra.mxu0 %v8783_v60  ;;  %7368 = vmatprep.subr.bf16.mxu1 %v8362_v0 }
 0x269   :  { %7776 = vmatprep.subr.bf16.mxu0 %v8362_v0 }
 0x26b   :  { %7370 = vmatpush1.bf16.msra.mxu1 %v8759_v30 }
 0x26c   :  { %7778 = vmatpush1.bf16.msra.mxu0 %v8791_v7  ;;  %7371 = vmatprep.subr.bf16.mxu1 %v8362_v0 }
 0x26d   :  { %7779 = vmatprep.subr.bf16.mxu0 %v8362_v0 }
 0x26f   :  { %7373 = vmatpush1.bf16.msra.mxu1 %v8767_v40 }
 0x270   :  { %7781 = vmatpush1.bf16.msra.mxu0 %v8799_v17  ;;  %7374 = vmatprep.subr.bf16.mxu1 %v8362_v0 }
 0x271   :  { %7782 = vmatprep.subr.bf16.mxu0 %v8362_v0 }
 0x273   :  { %7376 = vmatpush1.bf16.msra.mxu1 %v8775_v50 }
 0x274   :  { %7784 = vmatpush1.bf16.msra.mxu0 %v8807_v27  ;;  %7377 = vmatprep.subr.bf16.mxu1 %v8362_v0 }
 0x275   :  { %2550 = vmatprep.subr.mxu0 %v8363_v32 }
 0x277   :  { %7379 = vmatpush1.bf16.msra.mxu1 %v8783_v60 }
 0x278   :  { %2551 = vmatpush1.msra.mxu0 %v8810_v31  ;;  %7380 = vmatprep.subr.bf16.mxu1 %v8362_v0 }
 0x279   :  { %7837 = vmatprep.subr.bf16.mxu0 %v8362_v0  ;;  %2567 = vmatmul.mubr.f32.vlgmr.msra.gmra.mrb[90].mxu0 %v6179_v47 }
 0x27a   :  { %7839 = vmatpush1.bf16.msra.mxu0 %v8719_v48  ;;  %6188 = vmatprep.mubr.msk.f32.mxu0 %vm369_vm0, %v6182_v49 }
 0x27b   :  { %7382 = vmatpush1.bf16.msra.mxu1 %v8791_v7  ;;  %7840 = vmatprep.subr.bf16.mxu0 %v8362_v0 }
 0x27c   :  { %7383 = vmatprep.subr.bf16.mxu1 %v8362_v0 }
 0x27d   :  { %2572 = vmatmul.mubr.f32.gmra.mrb[92].mxu0 %v6181_v51 }
 0x27e   :  { %7842 = vmatpush1.bf16.msra.mxu0 %v8727_v57  ;;  %6189 = vmatprep.mubr.msk.f32.mxu0 %vm369_vm0, %v6184_v52 }
 0x27f   :  { %7385 = vmatpush1.bf16.msra.mxu1 %v8799_v17  ;;  %7843 = vmatprep.subr.bf16.mxu0 %v8362_v0 }
 0x280   :  { %7386 = vmatprep.subr.bf16.mxu1 %v8362_v0 }
 0x281   :  { %2577 = vmatmul.mubr.f32.gmra.mrb[94].mxu0 %v6183_v53 }
 0x282   :  { %7845 = vmatpush1.bf16.msra.mxu0 %v8735_v3  ;;  %6190 = vmatprep.mubr.msk.f32.mxu0 %vm369_vm0, %v6186_v54  ;;  %v6040_v54 = vld [vmem:[%s10613_s3 + $0xc8] sm:$0xff] }
 0x283   :  { %7388 = vmatpush1.bf16.msra.mxu1 %v8807_v27  ;;  %7846 = vmatprep.subr.bf16.mxu0 %v8362_v0 }
 0x284   :  { %642 = vmatprep.subr.mxu1 %v8363_v32  ;;  %v9338_v37 = vpop.f32.mrb[58].mxu0 }
 0x285   :  { %2582 = vmatmul.mubr.f32.gmra.mrb[96].mxu0 %v6185_v55  ;;  %v1298_v39 = vpop.f32.mrb[59].mxu0  ;;  %v6051_v55 = vld [vmem:[%s10615_s4 + $0x60] sm:$0xff] }
 0x286   :  { %7848 = vmatpush1.bf16.msra.mxu0 %v8743_v12  ;;  %6227 = vmatprep.mubr.msk.f32.mxu0 %vm369_vm0, %v6220_v56  ;;  %v6052_v56 = vld [vmem:[%s10615_s4 + $0x68] sm:$0xff] }
 0x287   :  { %643 = vmatpush1.msra.mxu1 %v8810_v31  ;;  %7849 = vmatprep.subr.bf16.mxu0 %v8362_v0 }
 0x288   :  { %659 = vmatmul.mubr.f32.vlgmr.msra.gmra.mrb[12].mxu1 %v5999_v58  ;;  %7390 = vmatprep.subr.bf16.mxu1 %v7389_v5  ;;  %v7477_v58 = vpack.c.bf16 %v6052_v56, %v6051_v55  ;;  %v6112_v55 = vld [vmem:[%s10615_s4 + $0xc8] sm:$0xff] }
 0x289   :  { %6008 = vmatprep.mubr.msk.f32.mxu1 %vm369_vm0, %v6002_v59  ;;  %7392 = vmatpush3.bf16.msra.mxu1 %v7389_v5  ;;  %v6039_v59 = vld [vmem:[%s10613_s3 + $0xc0] sm:$0xff]  ;;  %v6053_v5 = vld [vmem:[%s10615_s4 + $0x70] sm:$0xff] }
 0x28a   :  { %7851 = vmatpush1.bf16.msra.mxu0 %v8751_v21  ;;  %7394 = vmatprep.subr.bf16.mxu1 %v7393_v22 }
 0x28b   :  { %7852 = vmatprep.subr.bf16.mxu0 %v8362_v0 }
 0x28c   :  { %664 = vmatmul.mubr.f32.gmra.mrb[14].mxu1 %v6001_v61  ;;  %v6042_v61 = vld [vmem:[%s10613_s3 + $0xd8] sm:$0xff] }
 0x28d   :  { %6009 = vmatprep.mubr.msk.f32.mxu1 %vm369_vm0, %v6004_v62  ;;  %7396 = vmatpush3.bf16.msra.mxu1 %v7393_v22  ;;  %v6041_v62 = vld [vmem:[%s10613_s3 + $0xd0] sm:$0xff] }
 0x28e   :  { %7854 = vmatpush1.bf16.msra.mxu0 %v8759_v30  ;;  %7434 = vmatprep.subr.bf16.mxu1 %v7433_v25 }
 0x28f   :  { %7855 = vmatprep.subr.bf16.mxu0 %v8362_v0 }
 0x290   :  { %669 = vmatmul.mubr.f32.gmra.mrb[16].mxu1 %v6003_v63  ;;  %v6044_v63 = vld [vmem:[%s10613_s3 + $0xe8] sm:$0xff] }
 0x291   :  { %6010 = vmatprep.mubr.msk.f32.mxu1 %vm369_vm0, %v6006_v1  ;;  %v6043_v1 = vld [vmem:[%s10613_s3 + $0xe0] sm:$0xff] }
 0x292   :  { %7857 = vmatpush1.bf16.msra.mxu0 %v8767_v40 }
 0x293   :  { %7858 = vmatprep.subr.bf16.mxu0 %v8362_v0 }
 0x294   :  { %674 = vmatmul.mubr.f32.gmra.mrb[18].mxu1 %v6005_v6  ;;  %v6054_v6 = vld [vmem:[%s10615_s4 + $0x78] sm:$0xff] }
 0x296   :  { %7860 = vmatpush1.bf16.msra.mxu0 %v8775_v50 }
 0x297   :  { %7861 = vmatprep.subr.bf16.mxu0 %v8362_v0 }
 0x29a   :  { %7863 = vmatpush1.bf16.msra.mxu0 %v8783_v60 }
 0x29b   :  { %7864 = vmatprep.subr.bf16.mxu0 %v8362_v0 }
 0x29e   :  { %7866 = vmatpush1.bf16.msra.mxu0 %v8791_v7 }
 0x29f   :  { %7867 = vmatprep.subr.bf16.mxu0 %v8362_v0 }
 0x2a2   :  { %7869 = vmatpush1.bf16.msra.mxu0 %v8799_v17 }
 0x2a3   :  { %7870 = vmatprep.subr.bf16.mxu0 %v8362_v0 }
 0x2a6   :  { %7872 = vmatpush1.bf16.msra.mxu0 %v8807_v27 }
 0x2a7   :  { %2974 = vmatprep.subr.mxu0 %v8363_v32 }
 0x2aa   :  { %2975 = vmatpush1.msra.mxu0 %v8810_v31 }
 0x2ab   :  { %7925 = vmatprep.subr.bf16.mxu0 %v8362_v0  ;;  %2991 = vmatmul.mubr.f32.vlgmr.msra.gmra.mrb[98].mxu0 %v6219_v8  ;;  %v7481_v8 = vpack.c.bf16 %v6054_v6, %v6053_v5  ;;  %v6114_v5 = vld [vmem:[%s10615_s4 + $0xd8] sm:$0xff] }
 0x2ac   :  { %7927 = vmatpush1.bf16.msra.mxu0 %v8719_v48  ;;  %6228 = vmatprep.mubr.msk.f32.mxu0 %vm369_vm0, %v6222_v9  ;;  %v1301_v9 = vpop.f32.mrb[60].mxu0 }
 0x2ad   :  { %7928 = vmatprep.subr.bf16.mxu0 %v8362_v0 }
 0x2af   :  { %2996 = vmatmul.mubr.f32.gmra.mrb[100].mxu0 %v6221_v10  ;;  %v6071_v10 = vld [vmem:[%s10615_s4 + $0x80] sm:$0xff] }
 0x2b0   :  { %7930 = vmatpush1.bf16.msra.mxu0 %v8727_v57  ;;  %6229 = vmatprep.mubr.msk.f32.mxu0 %vm369_vm0, %v6224_v11  ;;  %v6072_v11 = vld [vmem:[%s10615_s4 + $0x88] sm:$0xff] }
 0x2b1   :  { %7931 = vmatprep.subr.bf16.mxu0 %v8362_v0 }
 0x2b3   :  { %3001 = vmatmul.mubr.f32.gmra.mrb[102].mxu0 %v6223_v13  ;;  %v1303_v13 = vpop.f32.mrb[61].mxu0 }
 0x2b4   :  { %7933 = vmatpush1.bf16.msra.mxu0 %v8735_v3  ;;  %6230 = vmatprep.mubr.msk.f32.mxu0 %vm369_vm0, %v6226_v14  ;;  %v7521_v14 = vpack.c.bf16 %v6072_v11, %v6071_v10 }
 0x2b5   :  { %7934 = vmatprep.subr.bf16.mxu0 %v8362_v0 }
 0x2b7   :  { %3006 = vmatmul.mubr.f32.gmra.mrb[104].mxu0 %v6225_v15  ;;  %v1306_v15 = vpop.f32.mrb[62].mxu0 }
 0x2b8   :  { %7936 = vmatpush1.bf16.msra.mxu0 %v8743_v12  ;;  %6267 = vmatprep.mubr.msk.f32.mxu0 %vm369_vm0, %v6260_v16  ;;  %v1308_v16 = vpop.f32.mrb[63].mxu0 }
 0x2b9   :  { %7937 = vmatprep.subr.bf16.mxu0 %v8362_v0  ;;  %v1311_v18 = vpop.f32.mrb[64].mxu0 }
 0x2ba   :  { %v1313_v19 = vpop.f32.mrb[65].mxu0 }
 0x2bc   :  { %7939 = vmatpush1.bf16.msra.mxu0 %v8751_v21 }
 0x2bd   :  { %7940 = vmatprep.subr.bf16.mxu0 %v8362_v0 }
 0x2c0   :  { %7942 = vmatpush1.bf16.msra.mxu0 %v8759_v30 }
 0x2c1   :  { %7943 = vmatprep.subr.bf16.mxu0 %v8362_v0 }
 0x2c4   :  { %7945 = vmatpush1.bf16.msra.mxu0 %v8767_v40 }
 0x2c5   :  { %7946 = vmatprep.subr.bf16.mxu0 %v8362_v0 }
 0x2c8   :  { %7948 = vmatpush1.bf16.msra.mxu0 %v8775_v50 }
 0x2c9   :  { %7949 = vmatprep.subr.bf16.mxu0 %v8362_v0 }
 0x2cc   :  { %7951 = vmatpush1.bf16.msra.mxu0 %v8783_v60 }
 0x2cd   :  { %7952 = vmatprep.subr.bf16.mxu0 %v8362_v0 }
 0x2d0   :  { %7954 = vmatpush1.bf16.msra.mxu0 %v8791_v7 }
 0x2d1   :  { %7955 = vmatprep.subr.bf16.mxu0 %v8362_v0 }
 0x2d4   :  { %7957 = vmatpush1.bf16.msra.mxu0 %v8799_v17 }
 0x2d5   :  { %7958 = vmatprep.subr.bf16.mxu0 %v8362_v0 }
 0x2d8   :  { %7960 = vmatpush1.bf16.msra.mxu0 %v8807_v27 }
 0x2d9   :  { %3398 = vmatprep.subr.mxu0 %v8363_v32 }
 0x2dc   :  { %3399 = vmatpush1.msra.mxu0 %v8810_v31 }
 0x2dd   :  { %7969 = vmatprep.subr.bf16.mxu0 %v8362_v0  ;;  %3415 = vmatmul.mubr.f32.vlgmr.msra.gmra.mrb[106].mxu0 %v6259_v20  ;;  %v1508_v20 = vpop.f32.mrb[66].mxu0 }
 0x2de   :  { %7971 = vmatpush1.bf16.msra.mxu0 %v8719_v48  ;;  %v1510_v22 = vpop.f32.mrb[67].mxu0 }
 0x2df   :  { %7972 = vmatprep.subr.bf16.mxu0 %v8362_v0  ;;  %v1513_v23 = vpop.f32.mrb[68].mxu0 }
 0x2e0   :  { %v1515_v24 = vpop.f32.mrb[69].mxu0 }
 0x2e2   :  { %7974 = vmatpush1.bf16.msra.mxu0 %v8727_v57 }
 0x2e3   :  { %7975 = vmatprep.subr.bf16.mxu0 %v8362_v0 }
 0x2e6   :  { %7977 = vmatpush1.bf16.msra.mxu0 %v8735_v3 }
 0x2e7   :  { %7978 = vmatprep.subr.bf16.mxu0 %v8362_v0 }
 0x2ea   :  { %7980 = vmatpush1.bf16.msra.mxu0 %v8743_v12 }
 0x2eb   :  { %7981 = vmatprep.subr.bf16.mxu0 %v8362_v0 }
 0x2ee   :  { %7983 = vmatpush1.bf16.msra.mxu0 %v8751_v21 }
 0x2ef   :  { %7984 = vmatprep.subr.bf16.mxu0 %v8362_v0 }
 0x2f2   :  { %7986 = vmatpush1.bf16.msra.mxu0 %v8759_v30 }
 0x2f3   :  { %7987 = vmatprep.subr.bf16.mxu0 %v8362_v0 }
 0x2f6   :  { %7989 = vmatpush1.bf16.msra.mxu0 %v8767_v40 }
 0x2f7   :  { %7990 = vmatprep.subr.bf16.mxu0 %v8362_v0 }
 0x2fa   :  { %7992 = vmatpush1.bf16.msra.mxu0 %v8775_v50 }
 0x2fb   :  { %7993 = vmatprep.subr.bf16.mxu0 %v8362_v0 }
 0x2fe   :  { %7995 = vmatpush1.bf16.msra.mxu0 %v8783_v60 }
 0x2ff   :  { %7996 = vmatprep.subr.bf16.mxu0 %v8362_v0 }
 0x302   :  { %7998 = vmatpush1.bf16.msra.mxu0 %v8791_v7 }
 0x303   :  { %7999 = vmatprep.subr.bf16.mxu0 %v8362_v0 }
 0x306   :  { %8001 = vmatpush1.bf16.msra.mxu0 %v8799_v17 }
 0x307   :  { %8002 = vmatprep.subr.bf16.mxu0 %v8362_v0 }
 0x30a   :  { %8004 = vmatpush1.bf16.msra.mxu0 %v8807_v27 }
 0x30b   :  { %3610 = vmatprep.subr.mxu0 %v8363_v32 }
 0x30e   :  { %3611 = vmatpush1.msra.mxu0 %v8810_v31 }
 0x30f   :  { %8019 = vmatprep.subr.bf16.mxu0 %v8362_v0 }
 0x35b   :  { %v660_v41 = vpop.f32.mrb[12].mxu1 }
 0x35c   :  { %v662_v44 = vpop.f32.mrb[13].mxu1  ;;  %6769 = vmatprep.mubr.msk.f32.mxu1 %vm471_vm1, %v660_v41  ;;  %v6091_v41 = vld [vmem:[%s10615_s4 + $0xa0] sm:$0xff] }
 0x35d   :  { %v7565_v44 = vpack.c.bf16 %v6092_v42, %v6091_v41  ;;  %v6140_v41 = vld [vmem:[%s10613_s3 + $0x208] sm:$0xff]  ;;  %v6151_v42 = vld [vmem:[%s10615_s4 + $0x100] sm:$0xff] }
 0x35f   :  { %v665_v46 = vpop.f32.mrb[14].mxu1 }
 0x360   :  { %v667_v47 = vpop.f32.mrb[15].mxu1  ;;  %6770 = vmatmul.mubr.msk.f32.vlgmr.msra.gmra.mrb[8].mxu1 %vm471_vm1, %v665_v46 }
 0x361   :  { %7436 = vmatpush3.bf16.msra.mxu1 %v7433_v25  ;;  %v1518_v25 = vpop.f32.mrb[70].mxu0 }
 0x362   :  { %7438 = vmatprep.subr.bf16.mxu1 %v7437_v45 }
 0x363   :  { %v670_v49 = vpop.f32.mrb[16].mxu1 }
 0x364   :  { %v672_v51 = vpop.f32.mrb[17].mxu1  ;;  %6772 = vmatprep.mubr.msk.f32.mxu1 %vm471_vm1, %v670_v49  ;;  %v6093_v49 = vld [vmem:[%s10615_s4 + $0xb0] sm:$0xff] }
 0x365   :  { %7440 = vmatpush3.bf16.msra.mxu1 %v7437_v45  ;;  %v6094_v51 = vld [vmem:[%s10615_s4 + $0xb8] sm:$0xff] }
 0x366   :  { %7441 = vmatprep.subr.bf16.mxu1 %v8362_v0 }
 0x367   :  { %v675_v52 = vpop.f32.mrb[18].mxu1 }
 0x368   :  { %v677_v53 = vpop.f32.mrb[19].mxu1  ;;  %6773 = vmatmul.mubr.msk.f32.gmra.mrb[10].mxu1 %vm471_vm1, %v675_v52 }
 0x369   :  { %6783 = vmatprep.mubr.msk.f32.mxu1 %vm471_vm1, %v872_v26  ;;  %v1520_v26 = vpop.f32.mrb[71].mxu0  ;;  %v7569_v53 = vpack.c.bf16 %v6094_v51, %v6093_v49  ;;  %v6144_v49 = vld [vmem:[%s10613_s3 + $0x228] sm:$0xff]  ;;  %v6143_v51 = vld [vmem:[%s10613_s3 + $0x220] sm:$0xff] }
 0x36a   :  { %v1523_v28 = vpop.f32.mrb[72].mxu0  ;;  %v6134_v26 = vld [vmem:[%s10615_s4 + $0xf8] sm:$0xff] }
 0x36c   :  { %6784 = vmatmul.mubr.msk.f32.vlgmr.msra.gmra.mrb[8].mxu1 %vm471_vm1, %v877_v29  ;;  %v1525_v29 = vpop.f32.mrb[73].mxu0 }
 0x36d   :  { %7443 = vmatpush1.bf16.msra.mxu1 %v8719_v48  ;;  %6786 = vmatprep.mubr.msk.f32.mxu1 %vm471_vm1, %v882_v38  ;;  %v6073_v38 = vld [vmem:[%s10615_s4 + $0x90] sm:$0xff]  ;;  %v1932_v11 = vpop.f32.mrb[74].mxu0 }
 0x36e   :  { %7444 = vmatprep.subr.bf16.mxu1 %v8362_v0  ;;  %v7525_v36 = vpack.c.bf16 %v6074_v34, %v6073_v38  ;;  %v1934_v13 = vpop.f32.mrb[75].mxu0 }
 0x370   :  { %6787 = vmatmul.mubr.msk.f32.gmra.mrb[10].mxu1 %vm471_vm1, %v887_v35 }
 0x371   :  { %7446 = vmatpush1.bf16.msra.mxu1 %v8727_v57  ;;  %6047 = vmatprep.mubr.msk.f32.mxu1 %vm369_vm0, %v6040_v54  ;;  %v6111_v54 = vld [vmem:[%s10615_s4 + $0xc0] sm:$0xff] }
 0x372   :  { %7447 = vmatprep.subr.bf16.mxu1 %v8362_v0  ;;  %v7609_v56 = vpack.c.bf16 %v6112_v55, %v6111_v54  ;;  %v6154_v54 = vld [vmem:[%s10615_s4 + $0x118] sm:$0xff] }
 0x375   :  { %7449 = vmatpush1.bf16.msra.mxu1 %v8735_v3 }
 0x376   :  { %7450 = vmatprep.subr.bf16.mxu1 %v8362_v0 }
 0x379   :  { %7452 = vmatpush1.bf16.msra.mxu1 %v8743_v12 }
 0x37a   :  { %7453 = vmatprep.subr.bf16.mxu1 %v8362_v0 }
 0x37d   :  { %7455 = vmatpush1.bf16.msra.mxu1 %v8751_v21 }
 0x37e   :  { %7456 = vmatprep.subr.bf16.mxu1 %v8362_v0 }
 0x381   :  { %7458 = vmatpush1.bf16.msra.mxu1 %v8759_v30 }
 0x382   :  { %7459 = vmatprep.subr.bf16.mxu1 %v8362_v0 }
 0x385   :  { %7461 = vmatpush1.bf16.msra.mxu1 %v8767_v40 }
 0x386   :  { %7462 = vmatprep.subr.bf16.mxu1 %v8362_v0 }
 0x389   :  { %7464 = vmatpush1.bf16.msra.mxu1 %v8775_v50 }
 0x38a   :  { %7465 = vmatprep.subr.bf16.mxu1 %v8362_v0 }
 0x38d   :  { %7467 = vmatpush1.bf16.msra.mxu1 %v8783_v60 }
 0x38e   :  { %7468 = vmatprep.subr.bf16.mxu1 %v8362_v0 }
 0x391   :  { %7470 = vmatpush1.bf16.msra.mxu1 %v8791_v7 }
 0x392   :  { %7471 = vmatprep.subr.bf16.mxu1 %v8362_v0 }
 0x395   :  { %7473 = vmatpush1.bf16.msra.mxu1 %v8799_v17 }
 0x396   :  { %7474 = vmatprep.subr.bf16.mxu1 %v8362_v0 }
 0x399   :  { %7476 = vmatpush1.bf16.msra.mxu1 %v8807_v27 }
 0x39a   :  { %1066 = vmatprep.subr.mxu1 %v8363_v32 }
 0x39d   :  { %1067 = vmatpush1.msra.mxu1 %v8810_v31 }
 0x39e   :  { %1083 = vmatmul.mubr.f32.vlgmr.msra.gmra.mrb[20].mxu1 %v6039_v59  ;;  %7478 = vmatprep.subr.bf16.mxu1 %v7477_v58  ;;  %v6102_v59 = vld [vmem:[%s10613_s3 + $0x198] sm:$0xff] }
 0x39f   :  { %6048 = vmatprep.mubr.msk.f32.mxu1 %vm369_vm0, %v6042_v61  ;;  %7480 = vmatpush3.bf16.msra.mxu1 %v7477_v58  ;;  %v6099_v58 = vld [vmem:[%s10613_s3 + $0x180] sm:$0xff]  ;;  %v6101_v61 = vld [vmem:[%s10613_s3 + $0x190] sm:$0xff] }
 0x3a0   :  { %7482 = vmatprep.subr.bf16.mxu1 %v7481_v8 }
 0x3a2   :  { %1088 = vmatmul.mubr.f32.gmra.mrb[22].mxu1 %v6041_v62  ;;  %v6104_v62 = vld [vmem:[%s10613_s3 + $0x1a8] sm:$0xff] }
 0x3a3   :  { %6049 = vmatprep.mubr.msk.f32.mxu1 %vm369_vm0, %v6044_v63  ;;  %7484 = vmatpush3.bf16.msra.mxu1 %v7481_v8  ;;  %v6103_v63 = vld [vmem:[%s10613_s3 + $0x1a0] sm:$0xff] }
 0x3a4   :  { %7522 = vmatprep.subr.bf16.mxu1 %v7521_v14  ;;  %v6131_v8 = vld [vmem:[%s10615_s4 + $0xe0] sm:$0xff] }
 0x3a6   :  { %1093 = vmatmul.mubr.f32.gmra.mrb[24].mxu1 %v6043_v1  ;;  %v6106_v1 = vld [vmem:[%s10613_s3 + $0x1b8] sm:$0xff] }
 0x3a7   :  { %6050 = vmatprep.mubr.msk.f32.mxu1 %vm369_vm0, %v6046_v2  ;;  %v6105_v2 = vld [vmem:[%s10613_s3 + $0x1b0] sm:$0xff] }
 0x3aa   :  { %1098 = vmatmul.mubr.f32.gmra.mrb[26].mxu1 %v6045_v4  ;;  %v6113_v4 = vld [vmem:[%s10615_s4 + $0xd0] sm:$0xff] }
 0x3ab   :  { %v7613_v6 = vpack.c.bf16 %v6114_v5, %v6113_v4 }
 0x471   :  { %v1084_v33 = vpop.f32.mrb[20].mxu1 }
 0x472   :  { %v1086_v35 = vpop.f32.mrb[21].mxu1  ;;  %6797 = vmatprep.mubr.msk.f32.mxu1 %vm471_vm1, %v1084_v33 }
 0x475   :  { %v1089_v39 = vpop.f32.mrb[22].mxu1 }
 0x476   :  { %v1091_v43 = vpop.f32.mrb[23].mxu1  ;;  %6798 = vmatmul.mubr.msk.f32.vlgmr.msra.gmra.mrb[8].mxu1 %vm471_vm1, %v1089_v39 }
 0x477   :  { %7524 = vmatpush3.bf16.msra.mxu1 %v7521_v14  ;;  %v1937_v14 = vpop.f32.mrb[76].mxu0  ;;  %v6152_v43 = vld [vmem:[%s10615_s4 + $0x108] sm:$0xff] }
 0x478   :  { %7526 = vmatprep.subr.bf16.mxu1 %v7525_v36 }
 0x479   :  { %v1094_v45 = vpop.f32.mrb[24].mxu1 }
 0x47a   :  { %v1096_v46 = vpop.f32.mrb[25].mxu1  ;;  %6800 = vmatprep.mubr.msk.f32.mxu1 %vm471_vm1, %v1094_v45  ;;  %v6139_v45 = vld [vmem:[%s10613_s3 + $0x200] sm:$0xff] }
 0x47b   :  { %7528 = vmatpush3.bf16.msra.mxu1 %v7525_v36  ;;  %v6142_v46 = vld [vmem:[%s10613_s3 + $0x218] sm:$0xff] }
 0x47c   :  { %7566 = vmatprep.subr.bf16.mxu1 %v7565_v44 }
 0x47d   :  { %v1099_v47 = vpop.f32.mrb[26].mxu1 }
 0x47e   :  { %v1101_v52 = vpop.f32.mrb[27].mxu1  ;;  %6801 = vmatmul.mubr.msk.f32.gmra.mrb[10].mxu1 %vm471_vm1, %v1099_v47  ;;  %v6141_v47 = vld [vmem:[%s10613_s3 + $0x210] sm:$0xff] }
 0x47f   :  { %6811 = vmatprep.mubr.msk.f32.mxu1 %vm471_vm1, %v9338_v37  ;;  %v6100_v37 = vld [vmem:[%s10613_s3 + $0x188] sm:$0xff]  ;;  %v6146_v52 = vld [vmem:[%s10613_s3 + $0x238] sm:$0xff] }
 0x482   :  { %6812 = vmatmul.mubr.msk.f32.vlgmr.msra.gmra.mrb[8].mxu1 %vm471_vm1, %v1301_v9  ;;  %v6132_v9 = vld [vmem:[%s10615_s4 + $0xe8] sm:$0xff] }
 0x483   :  { %7568 = vmatpush3.bf16.msra.mxu1 %v7565_v44  ;;  %6814 = vmatprep.mubr.msk.f32.mxu1 %vm471_vm1, %v1306_v15  ;;  %v7653_v10 = vpack.c.bf16 %v6132_v9, %v6131_v8  ;;  %v1939_v15 = vpop.f32.mrb[77].mxu0  ;;  %v7697_v44 = vpack.c.bf16 %v6152_v43, %v6151_v42  ;;  %v6212_v42 = vld [vmem:[%s10615_s4 + $0x168] sm:$0xff] }
 0x484   :  { %7570 = vmatprep.subr.bf16.mxu1 %v7569_v53  ;;  %v1942_v16 = vpop.f32.mrb[78].mxu0 }
 0x486   :  { %6815 = vmatmul.mubr.msk.f32.gmra.mrb[10].mxu1 %vm471_vm1, %v1311_v18  ;;  %v1944_v18 = vpop.f32.mrb[79].mxu0 }
 0x487   :  { %7572 = vmatpush3.bf16.msra.mxu1 %v7569_v53  ;;  %6825 = vmatprep.mubr.msk.f32.mxu1 %vm471_vm1, %v1508_v20  ;;  %v1947_v19 = vpop.f32.mrb[80].mxu0  ;;  %v6145_v53 = vld [vmem:[%s10613_s3 + $0x230] sm:$0xff]  ;;  %v6174_v18 = vld [vmem:[%s10615_s4 + $0x138] sm:$0xff] }
 0x488   :  { %7573 = vmatprep.subr.bf16.mxu1 %v8362_v0  ;;  %v1949_v20 = vpop.f32.mrb[81].mxu0 }
 0x489   :  { %v9529_v22 = vpop.f32.mrb[82].mxu0 }
 0x48a   :  { %6826 = vmatmul.mubr.msk.f32.vlgmr.msra.gmra.mrb[8].mxu1 %vm471_vm1, %v1513_v23  ;;  %v2358_v23 = vpop.f32.mrb[83].mxu0 }
 0x48b   :  { %7575 = vmatpush1.bf16.msra.mxu1 %v8719_v48  ;;  %6828 = vmatprep.mubr.msk.f32.mxu1 %vm471_vm1, %v1518_v25  ;;  %v6133_v25 = vld [vmem:[%s10615_s4 + $0xf0] sm:$0xff] }
 0x48c   :  { %7576 = vmatprep.subr.bf16.mxu1 %v8362_v0  ;;  %v7657_v29 = vpack.c.bf16 %v6134_v26, %v6133_v25  ;;  %v6192_v25 = vld [vmem:[%s10615_s4 + $0x148] sm:$0xff] }
 0x48e   :  { %6829 = vmatmul.mubr.msk.f32.gmra.mrb[10].mxu1 %vm471_vm1, %v1523_v28 }
 0x48f   :  { %7578 = vmatpush1.bf16.msra.mxu1 %v8727_v57  ;;  %6107 = vmatprep.mubr.msk.f32.mxu1 %vm369_vm0, %v6100_v37  ;;  %v6153_v37 = vld [vmem:[%s10615_s4 + $0x110] sm:$0xff] }
 0x490   :  { %7579 = vmatprep.subr.bf16.mxu1 %v8362_v0  ;;  %v7701_v55 = vpack.c.bf16 %v6154_v54, %v6153_v37  ;;  %v6214_v37 = vld [vmem:[%s10615_s4 + $0x178] sm:$0xff] }
 0x493   :  { %7581 = vmatpush1.bf16.msra.mxu1 %v8735_v3 }
 0x494   :  { %7582 = vmatprep.subr.bf16.mxu1 %v8362_v0 }
 0x497   :  { %7584 = vmatpush1.bf16.msra.mxu1 %v8743_v12 }
 0x498   :  { %7585 = vmatprep.subr.bf16.mxu1 %v8362_v0 }
 0x49b   :  { %7587 = vmatpush1.bf16.msra.mxu1 %v8751_v21 }
 0x49c   :  { %7588 = vmatprep.subr.bf16.mxu1 %v8362_v0 }
 0x49f   :  { %7590 = vmatpush1.bf16.msra.mxu1 %v8759_v30 }
 0x4a0   :  { %7591 = vmatprep.subr.bf16.mxu1 %v8362_v0 }
 0x4a3   :  { %7593 = vmatpush1.bf16.msra.mxu1 %v8767_v40 }
 0x4a4   :  { %7594 = vmatprep.subr.bf16.mxu1 %v8362_v0 }
 0x4a7   :  { %7596 = vmatpush1.bf16.msra.mxu1 %v8775_v50 }
 0x4a8   :  { %7597 = vmatprep.subr.bf16.mxu1 %v8362_v0 }
 0x4ab   :  { %7599 = vmatpush1.bf16.msra.mxu1 %v8783_v60 }
 0x4ac   :  { %7600 = vmatprep.subr.bf16.mxu1 %v8362_v0 }
 0x4af   :  { %7602 = vmatpush1.bf16.msra.mxu1 %v8791_v7 }
 0x4b0   :  { %7603 = vmatprep.subr.bf16.mxu1 %v8362_v0 }
 0x4b3   :  { %7605 = vmatpush1.bf16.msra.mxu1 %v8799_v17 }
 0x4b4   :  { %7606 = vmatprep.subr.bf16.mxu1 %v8362_v0 }
 0x4b7   :  { %7608 = vmatpush1.bf16.msra.mxu1 %v8807_v27 }
 0x4b8   :  { %1702 = vmatprep.subr.mxu1 %v8363_v32 }
 0x4bb   :  { %1703 = vmatpush1.msra.mxu1 %v8810_v31 }
 0x4bc   :  { %1719 = vmatmul.mubr.f32.vlgmr.msra.gmra.mrb[28].mxu1 %v6099_v58  ;;  %7610 = vmatprep.subr.bf16.mxu1 %v7609_v56  ;;  %v6171_v58 = vld [vmem:[%s10615_s4 + $0x120] sm:$0xff] }
 0x4bd   :  { %6108 = vmatprep.mubr.msk.f32.mxu1 %vm369_vm0, %v6102_v59  ;;  %7612 = vmatpush3.bf16.msra.mxu1 %v7609_v56  ;;  %v2361_v56 = vpop.f32.mrb[84].mxu0  ;;  %v6172_v59 = vld [vmem:[%s10615_s4 + $0x128] sm:$0xff] }
 0x4be   :  { %7614 = vmatprep.subr.bf16.mxu1 %v7613_v6 }
 0x4c0   :  { %1724 = vmatmul.mubr.f32.gmra.mrb[30].mxu1 %v6101_v61  ;;  %v2363_v61 = vpop.f32.mrb[85].mxu0 }
 0x4c1   :  { %6109 = vmatprep.mubr.msk.f32.mxu1 %vm369_vm0, %v6104_v62  ;;  %7616 = vmatpush3.bf16.msra.mxu1 %v7613_v6  ;;  %v7741_v62 = vpack.c.bf16 %v6172_v59, %v6171_v58 }
 0x4c2   :  { %7654 = vmatprep.subr.bf16.mxu1 %v7653_v10 }
 0x4c4   :  { %1729 = vmatmul.mubr.f32.gmra.mrb[32].mxu1 %v6103_v63  ;;  %v2366_v63 = vpop.f32.mrb[86].mxu0 }
 0x4c5   :  { %6110 = vmatprep.mubr.msk.f32.mxu1 %vm369_vm0, %v6106_v1  ;;  %v2368_v1 = vpop.f32.mrb[87].mxu0 }
 0x4c8   :  { %1734 = vmatmul.mubr.f32.gmra.mrb[34].mxu1 %v6105_v2  ;;  %v2371_v2 = vpop.f32.mrb[88].mxu0 }
 0x4c9   :  { %v2373_v4 = vpop.f32.mrb[89].mxu0 }
 0x4ca   :  { %v2568_v5 = vpop.f32.mrb[90].mxu0 }
 0x4cb   :  { %v2570_v6 = vpop.f32.mrb[91].mxu0 }
 0x4cc   :  { %v2573_v8 = vpop.f32.mrb[92].mxu0  ;;  %v6262_v6 = vld [vmem:[%s10613_s3 + $0x398] sm:$0xff] }
 0x4cd   :  { %v2575_v9 = vpop.f32.mrb[93].mxu0  ;;  %6268 = vmatprep.mubr.msk.f32.mxu0 %vm369_vm0, %v6262_v6 }
 0x4ce   :  { %v6264_v9 = vld [vmem:[%s10613_s3 + $0x3a8] sm:$0xff] }
 0x58f   :  { %v1720_v24 = vpop.f32.mrb[28].mxu1 }
 0x590   :  { %v1722_v28 = vpop.f32.mrb[29].mxu1  ;;  %6839 = vmatprep.mubr.msk.f32.mxu1 %vm471_vm1, %v1720_v24  ;;  %v6191_v24 = vld [vmem:[%s10615_s4 + $0x140] sm:$0xff] }
 0x591   :  { %v7785_v28 = vpack.c.bf16 %v6192_v25, %v6191_v24  ;;  %v6283_v24 = vld [vmem:[%s10613_s3 + $0x3e0] sm:$0xff]  ;;  %v6286_v25 = vld [vmem:[%s10613_s3 + $0x3f8] sm:$0xff] }
 0x593   :  { %v1725_v33 = vpop.f32.mrb[30].mxu1 }
 0x594   :  { %v1727_v38 = vpop.f32.mrb[31].mxu1  ;;  %6840 = vmatmul.mubr.msk.f32.vlgmr.msra.gmra.mrb[8].mxu1 %vm471_vm1, %v1725_v33 }
 0x595   :  { %7656 = vmatpush3.bf16.msra.mxu1 %v7653_v10  ;;  %v2578_v10 = vpop.f32.mrb[94].mxu0 }
 0x596   :  { %7658 = vmatprep.subr.bf16.mxu1 %v7657_v29 }
 0x597   :  { %v1730_v34 = vpop.f32.mrb[32].mxu1 }
 0x598   :  { %v1732_v35 = vpop.f32.mrb[33].mxu1  ;;  %6842 = vmatprep.mubr.msk.f32.mxu1 %vm471_vm1, %v1730_v34  ;;  %v6193_v34 = vld [vmem:[%s10615_s4 + $0x150] sm:$0xff] }
 0x599   :  { %7660 = vmatpush3.bf16.msra.mxu1 %v7657_v29  ;;  %v6194_v35 = vld [vmem:[%s10615_s4 + $0x158] sm:$0xff] }
 0x59a   :  { %7661 = vmatprep.subr.bf16.mxu1 %v8362_v0 }
 0x59b   :  { %v1735_v36 = vpop.f32.mrb[34].mxu1 }
 0x59c   :  { %v1737_v39 = vpop.f32.mrb[35].mxu1  ;;  %6843 = vmatmul.mubr.msk.f32.gmra.mrb[10].mxu1 %vm471_vm1, %v1735_v36 }
 0x59d   :  { %6853 = vmatprep.mubr.msk.f32.mxu1 %vm471_vm1, %v1932_v11  ;;  %v2580_v11 = vpop.f32.mrb[95].mxu0  ;;  %v7789_v39 = vpack.c.bf16 %v6194_v35, %v6193_v34 }
 0x59e   :  { %v2583_v13 = vpop.f32.mrb[96].mxu0  ;;  %v6266_v11 = vld [vmem:[%s10613_s3 + $0x3b8] sm:$0xff] }
 0x5a0   :  { %6854 = vmatmul.mubr.msk.f32.vlgmr.msra.gmra.mrb[8].mxu1 %vm471_vm1, %v1937_v14  ;;  %v2585_v14 = vpop.f32.mrb[97].mxu0 }
 0x5a1   :  { %7663 = vmatpush1.bf16.msra.mxu1 %v8719_v48  ;;  %6856 = vmatprep.mubr.msk.f32.mxu1 %vm471_vm1, %v1942_v16  ;;  %v6173_v16 = vld [vmem:[%s10615_s4 + $0x130] sm:$0xff]  ;;  %v2992_v59 = vpop.f32.mrb[98].mxu0  ;;  %v6280_v14 = vld [vmem:[%s10613_s3 + $0x3c8] sm:$0xff] }
 0x5a2   :  { %7664 = vmatprep.subr.bf16.mxu1 %v8362_v0  ;;  %v7745_v20 = vpack.c.bf16 %v6174_v18, %v6173_v16  ;;  %v2994_v61 = vpop.f32.mrb[99].mxu0  ;;  %v6282_v16 = vld [vmem:[%s10613_s3 + $0x3d8] sm:$0xff] }
 0x5a4   :  { %6857 = vmatmul.mubr.msk.f32.gmra.mrb[10].mxu1 %vm471_vm1, %v1947_v19 }
 0x5a5   :  { %7666 = vmatpush1.bf16.msra.mxu1 %v8727_v57  ;;  %6147 = vmatprep.mubr.msk.f32.mxu1 %vm369_vm0, %v6140_v41  ;;  %v6211_v41 = vld [vmem:[%s10615_s4 + $0x160] sm:$0xff] }
 0x5a6   :  { %7667 = vmatprep.subr.bf16.mxu1 %v8362_v0  ;;  %v7829_v43 = vpack.c.bf16 %v6212_v42, %v6211_v41 }
 0x5a9   :  { %7669 = vmatpush1.bf16.msra.mxu1 %v8735_v3 }
 0x5aa   :  { %7670 = vmatprep.subr.bf16.mxu1 %v8362_v0 }
 0x5ad   :  { %7672 = vmatpush1.bf16.msra.mxu1 %v8743_v12 }
 0x5ae   :  { %7673 = vmatprep.subr.bf16.mxu1 %v8362_v0 }
 0x5b1   :  { %7675 = vmatpush1.bf16.msra.mxu1 %v8751_v21 }
 0x5b2   :  { %7676 = vmatprep.subr.bf16.mxu1 %v8362_v0 }
 0x5b5   :  { %7678 = vmatpush1.bf16.msra.mxu1 %v8759_v30 }
 0x5b6   :  { %7679 = vmatprep.subr.bf16.mxu1 %v8362_v0 }
 0x5b9   :  { %7681 = vmatpush1.bf16.msra.mxu1 %v8767_v40 }
 0x5ba   :  { %7682 = vmatprep.subr.bf16.mxu1 %v8362_v0 }
 0x5bd   :  { %7684 = vmatpush1.bf16.msra.mxu1 %v8775_v50 }
 0x5be   :  { %7685 = vmatprep.subr.bf16.mxu1 %v8362_v0 }
 0x5c1   :  { %7687 = vmatpush1.bf16.msra.mxu1 %v8783_v60 }
 0x5c2   :  { %7688 = vmatprep.subr.bf16.mxu1 %v8362_v0 }
 0x5c5   :  { %7690 = vmatpush1.bf16.msra.mxu1 %v8791_v7 }
 0x5c6   :  { %7691 = vmatprep.subr.bf16.mxu1 %v8362_v0 }
 0x5c9   :  { %7693 = vmatpush1.bf16.msra.mxu1 %v8799_v17 }
 0x5ca   :  { %7694 = vmatprep.subr.bf16.mxu1 %v8362_v0 }
 0x5cd   :  { %7696 = vmatpush1.bf16.msra.mxu1 %v8807_v27 }
 0x5ce   :  { %2126 = vmatprep.subr.mxu1 %v8363_v32 }
 0x5d1   :  { %2127 = vmatpush1.msra.mxu1 %v8810_v31 }
 0x5d2   :  { %2143 = vmatmul.mubr.f32.vlgmr.msra.gmra.mrb[36].mxu1 %v6139_v45  ;;  %7698 = vmatprep.subr.bf16.mxu1 %v7697_v44  ;;  %v6202_v45 = vld [vmem:[%s10613_s3 + $0x2d8] sm:$0xff] }
 0x5d3   :  { %6148 = vmatprep.mubr.msk.f32.mxu1 %vm369_vm0, %v6142_v46  ;;  %7700 = vmatpush3.bf16.msra.mxu1 %v7697_v44  ;;  %v6199_v44 = vld [vmem:[%s10613_s3 + $0x2c0] sm:$0xff]  ;;  %v6201_v46 = vld [vmem:[%s10613_s3 + $0x2d0] sm:$0xff] }
 0x5d4   :  { %7702 = vmatprep.subr.bf16.mxu1 %v7701_v55 }
 0x5d6   :  { %2148 = vmatmul.mubr.f32.gmra.mrb[38].mxu1 %v6141_v47  ;;  %v6204_v47 = vld [vmem:[%s10613_s3 + $0x2e8] sm:$0xff] }
 0x5d7   :  { %6149 = vmatprep.mubr.msk.f32.mxu1 %vm369_vm0, %v6144_v49  ;;  %7704 = vmatpush3.bf16.msra.mxu1 %v7701_v55  ;;  %v6203_v49 = vld [vmem:[%s10613_s3 + $0x2e0] sm:$0xff] }
 0x5d8   :  { %7742 = vmatprep.subr.bf16.mxu1 %v7741_v62  ;;  %v6231_v55 = vld [vmem:[%s10615_s4 + $0x180] sm:$0xff] }
 0x5da   :  { %2153 = vmatmul.mubr.f32.gmra.mrb[40].mxu1 %v6143_v51  ;;  %v6206_v51 = vld [vmem:[%s10613_s3 + $0x2f8] sm:$0xff] }
 0x5db   :  { %6150 = vmatprep.mubr.msk.f32.mxu1 %vm369_vm0, %v6146_v52  ;;  %v6205_v52 = vld [vmem:[%s10613_s3 + $0x2f0] sm:$0xff] }
 0x5de   :  { %2158 = vmatmul.mubr.f32.gmra.mrb[42].mxu1 %v6145_v53  ;;  %v6213_v53 = vld [vmem:[%s10615_s4 + $0x170] sm:$0xff] }
 0x5df   :  { %v7833_v54 = vpack.c.bf16 %v6214_v37, %v6213_v53 }
 0x6a5   :  { %v2144_v15 = vpop.f32.mrb[36].mxu1 }
 0x6a6   :  { %v2146_v19 = vpop.f32.mrb[37].mxu1  ;;  %6867 = vmatprep.mubr.msk.f32.mxu1 %vm471_vm1, %v2144_v15  ;;  %v6279_v15 = vld [vmem:[%s10613_s3 + $0x3c0] sm:$0xff] }
 0x6a9   :  { %v2149_v23 = vpop.f32.mrb[38].mxu1 }
 0x6aa   :  { %v2151_v26 = vpop.f32.mrb[39].mxu1  ;;  %6868 = vmatmul.mubr.msk.f32.vlgmr.msra.gmra.mrb[8].mxu1 %vm471_vm1, %v2149_v23  ;;  %v6284_v23 = vld [vmem:[%s10613_s3 + $0x3e8] sm:$0xff] }
 0x6ab   :  { %7744 = vmatpush3.bf16.msra.mxu1 %v7741_v62  ;;  %v2997_v62 = vpop.f32.mrb[100].mxu0  ;;  %v6285_v26 = vld [vmem:[%s10613_s3 + $0x3f0] sm:$0xff] }
 0x6ac   :  { %7746 = vmatprep.subr.bf16.mxu1 %v7745_v20 }
 0x6ad   :  { %v2154_v29 = vpop.f32.mrb[40].mxu1 }
 0x6ae   :  { %v2156_v33 = vpop.f32.mrb[41].mxu1  ;;  %6870 = vmatprep.mubr.msk.f32.mxu1 %vm471_vm1, %v2154_v29  ;;  %v6233_v29 = vld [vmem:[%s10615_s4 + $0x190] sm:$0xff] }
 0x6af   :  { %7748 = vmatpush3.bf16.msra.mxu1 %v7745_v20  ;;  %v6281_v20 = vld [vmem:[%s10613_s3 + $0x3d0] sm:$0xff]  ;;  %v6234_v33 = vld [vmem:[%s10615_s4 + $0x198] sm:$0xff] }
 0x6b0   :  { %7786 = vmatprep.subr.bf16.mxu1 %v7785_v28  ;;  %v7877_v34 = vpack.c.bf16 %v6234_v33, %v6233_v29  ;;  %v3842_v29 = vld [vmem:[%s10616_s7 + $0x18] sm:$0xff] }
 0x6b1   :  { %v2159_v38 = vpop.f32.mrb[42].mxu1 }
 0x6b2   :  { %v2161_v36 = vpop.f32.mrb[43].mxu1  ;;  %6871 = vmatmul.mubr.msk.f32.gmra.mrb[10].mxu1 %vm471_vm1, %v2159_v38 }
 0x6b3   :  { %6881 = vmatprep.mubr.msk.f32.mxu1 %vm471_vm1, %v9529_v22  ;;  %v6200_v22 = vld [vmem:[%s10613_s3 + $0x2c8] sm:$0xff] }
 0x6b6   :  { %6882 = vmatmul.mubr.msk.f32.vlgmr.msra.gmra.mrb[8].mxu1 %vm471_vm1, %v2361_v56  ;;  %v6232_v56 = vld [vmem:[%s10615_s4 + $0x188] sm:$0xff] }
 0x6b7   :  { %7788 = vmatpush3.bf16.msra.mxu1 %v7785_v28  ;;  %6884 = vmatprep.mubr.msk.f32.mxu1 %vm471_vm1, %v2366_v63  ;;  %v7873_v58 = vpack.c.bf16 %v6232_v56, %v6231_v55  ;;  %v2999_v63 = vpop.f32.mrb[101].mxu0 }
 0x6b8   :  { %7790 = vmatprep.subr.bf16.mxu1 %v7789_v39  ;;  %v3002_v1 = vpop.f32.mrb[102].mxu0 }
 0x6ba   :  { %6885 = vmatmul.mubr.msk.f32.gmra.mrb[10].mxu1 %vm471_vm1, %v2371_v2  ;;  %v3004_v2 = vpop.f32.mrb[103].mxu0 }
 0x6bb   :  { %7792 = vmatpush3.bf16.msra.mxu1 %v7789_v39  ;;  %6895 = vmatprep.mubr.msk.f32.mxu1 %vm471_vm1, %v2568_v5  ;;  %v3007_v4 = vpop.f32.mrb[104].mxu0  ;;  %v6273_v2 = vld [vmem:[%s10615_s4 + $0x1d0] sm:$0xff] }
 0x6bc   :  { %7793 = vmatprep.subr.bf16.mxu1 %v8362_v0  ;;  %v3009_v5 = vpop.f32.mrb[105].mxu0 }
 0x6bd   :  { %v9750_v18 = vpop.f32.mrb[106].mxu0 }
 0x6be   :  { %6896 = vmatmul.mubr.msk.f32.vlgmr.msra.gmra.mrb[8].mxu1 %vm471_vm1, %v2573_v8  ;;  %v6261_v8 = vld [vmem:[%s10613_s3 + $0x390] sm:$0xff]  ;;  %v3418_v19 = vpop.f32.mrb[107].mxu0 }
 0x6bf   :  { %7795 = vmatpush1.bf16.msra.mxu1 %v8719_v48  ;;  %6898 = vmatprep.mubr.msk.f32.mxu1 %vm471_vm1, %v2578_v10  ;;  %v6263_v10 = vld [vmem:[%s10613_s3 + $0x3a0] sm:$0xff]  ;;  %v6293_v19 = vld [vmem:[%s10615_s4 + $0x1f0] sm:$0xff] }
 0x6c0   :  { %7796 = vmatprep.subr.bf16.mxu1 %v8362_v0  ;;  %3420 = vmatmul.mubr.f32.gmra.mrb[108].mxu0 %v6261_v8 }
 0x6c1   :  { %6269 = vmatprep.mubr.msk.f32.mxu0 %vm369_vm0, %v6264_v9  ;;  %v6291_v9 = vld [vmem:[%s10615_s4 + $0x1e0] sm:$0xff] }
 0x6c2   :  { %6899 = vmatmul.mubr.msk.f32.gmra.mrb[10].mxu1 %vm471_vm1, %v2583_v13  ;;  %v6265_v13 = vld [vmem:[%s10613_s3 + $0x3b0] sm:$0xff] }
 0x6c3   :  { %7798 = vmatpush1.bf16.msra.mxu1 %v8727_v57  ;;  %6207 = vmatprep.mubr.msk.f32.mxu1 %vm369_vm0, %v6200_v22 }
 0x6c4   :  { %7799 = vmatprep.subr.bf16.mxu1 %v8362_v0  ;;  %3425 = vmatmul.mubr.f32.gmra.mrb[110].mxu0 %v6263_v10  ;;  %v6292_v10 = vld [vmem:[%s10615_s4 + $0x1e8] sm:$0xff] }
 0x6c5   :  { %6270 = vmatprep.mubr.msk.f32.mxu0 %vm369_vm0, %v6266_v11 }
 0x6c7   :  { %7801 = vmatpush1.bf16.msra.mxu1 %v8735_v3 }
 0x6c8   :  { %7802 = vmatprep.subr.bf16.mxu1 %v8362_v0  ;;  %3430 = vmatmul.mubr.f32.gmra.mrb[112].mxu0 %v6265_v13  ;;  %v8005_v13 = vpack.c.bf16 %v6292_v10, %v6291_v9  ;;  %v6324_v10 = vld [vmem:[%s10618_s6 + $0x18] sm:$0xff] }
 0x6c9   :  { %6287 = vmatprep.mubr.msk.f32.mxu0 %vm369_vm0, %v6280_v14 }
 0x6cb   :  { %7804 = vmatpush1.bf16.msra.mxu1 %v8743_v12 }
 0x6cc   :  { %7805 = vmatprep.subr.bf16.mxu1 %v8362_v0  ;;  %3627 = vmatmul.mubr.f32.vlgmr.msra.gmra.mrb[114].mxu0 %v6279_v15 }
 0x6cd   :  { %6288 = vmatprep.mubr.msk.f32.mxu0 %vm369_vm0, %v6282_v16 }
 0x6cf   :  { %7807 = vmatpush1.bf16.msra.mxu1 %v8751_v21 }
 0x6d0   :  { %7808 = vmatprep.subr.bf16.mxu1 %v8362_v0  ;;  %3632 = vmatmul.mubr.f32.gmra.mrb[116].mxu0 %v6281_v20  ;;  %v6294_v20 = vld [vmem:[%s10615_s4 + $0x1f8] sm:$0xff] }
 0x6d1   :  { %6289 = vmatprep.mubr.msk.f32.mxu0 %vm369_vm0, %v6284_v23 }
 0x6d3   :  { %7810 = vmatpush1.bf16.msra.mxu1 %v8759_v30 }
 0x6d4   :  { %7811 = vmatprep.subr.bf16.mxu1 %v8362_v0  ;;  %3637 = vmatmul.mubr.f32.gmra.mrb[118].mxu0 %v6283_v24  ;;  %v8009_v24 = vpack.c.bf16 %v6294_v20, %v6293_v19  ;;  %v6319_v19 = vld [vmem:[%s10616_s7 + $0xa0] sm:$0xff]  ;;  %v6320_v20 = vld [vmem:[%s10616_s7 + $0xa8] sm:$0xff] }
 0x6d5   :  { %6290 = vmatprep.mubr.msk.f32.mxu0 %vm369_vm0, %v6286_v25  ;;  %v3840_v25 = vld [vmem:[%s10616_s7 + $0x8] sm:$0xff] }
 0x6d7   :  { %7813 = vmatpush1.bf16.msra.mxu1 %v8767_v40 }
 0x6d8   :  { %7814 = vmatprep.subr.bf16.mxu1 %v8362_v0  ;;  %3642 = vmatmul.mubr.f32.gmra.mrb[120].mxu0 %v6285_v26  ;;  %v3841_v26 = vld [vmem:[%s10616_s7 + $0x10] sm:$0xff] }
 0x6d9   :  { %6998 = vmatprep.mubr.msk.f32.mxu0 %vm8364_vm2, %v8363_v32  ;;  %v8023_v33 = vpack.c.bf16 %v3842_v29, %v3841_v26  ;;  %v6326_v29 = vld [vmem:[%s10616_s7 + $0xc0] sm:$0xff] }
 0x6db   :  { %7816 = vmatpush1.bf16.msra.mxu1 %v8775_v50 }
 0x6dc   :  { %7817 = vmatprep.subr.bf16.mxu1 %v8362_v0 }
 0x6df   :  { %7819 = vmatpush1.bf16.msra.mxu1 %v8783_v60 }
 0x6e0   :  { %7820 = vmatprep.subr.bf16.mxu1 %v8362_v0 }
 0x6e3   :  { %7822 = vmatpush1.bf16.msra.mxu1 %v8791_v7 }
 0x6e4   :  { %7823 = vmatprep.subr.bf16.mxu1 %v8362_v0 }
 0x6e7   :  { %7825 = vmatpush1.bf16.msra.mxu1 %v8799_v17 }
 0x6e8   :  { %7826 = vmatprep.subr.bf16.mxu1 %v8362_v0 }
 0x6eb   :  { %7828 = vmatpush1.bf16.msra.mxu1 %v8807_v27 }
 0x6ec   :  { %2762 = vmatprep.subr.mxu1 %v8363_v32 }
 0x6ef   :  { %2763 = vmatpush1.msra.mxu1 %v8810_v31 }
 0x6f0   :  { %2779 = vmatmul.mubr.f32.vlgmr.msra.gmra.mrb[44].mxu1 %v6199_v44  ;;  %7830 = vmatprep.subr.bf16.mxu1 %v7829_v43 }
 0x6f1   :  { %6208 = vmatprep.mubr.msk.f32.mxu1 %vm369_vm0, %v6202_v45  ;;  %7832 = vmatpush3.bf16.msra.mxu1 %v7829_v43  ;;  %v6240_v43 = vld [vmem:[%s10613_s3 + $0x348] sm:$0xff] }
 0x6f2   :  { %7834 = vmatprep.subr.bf16.mxu1 %v7833_v54 }
 0x6f4   :  { %2784 = vmatmul.mubr.f32.gmra.mrb[46].mxu1 %v6201_v46 }
 0x6f5   :  { %6209 = vmatprep.mubr.msk.f32.mxu1 %vm369_vm0, %v6204_v47  ;;  %7836 = vmatpush3.bf16.msra.mxu1 %v7833_v54  ;;  %v6271_v47 = vld [vmem:[%s10615_s4 + $0x1c0] sm:$0xff] }
 0x6f6   :  { %7874 = vmatprep.subr.bf16.mxu1 %v7873_v58 }
 0x6f8   :  { %2789 = vmatmul.mubr.f32.gmra.mrb[48].mxu1 %v6203_v49  ;;  %v6272_v49 = vld [vmem:[%s10615_s4 + $0x1c8] sm:$0xff] }
 0x6f9   :  { %6210 = vmatprep.mubr.msk.f32.mxu1 %vm369_vm0, %v6206_v51 }
 0x6fc   :  { %2794 = vmatmul.mubr.f32.gmra.mrb[50].mxu1 %v6205_v52  ;;  %v7961_v52 = vpack.c.bf16 %v6272_v49, %v6271_v47  ;;  %v6306_v47 = vld [vmem:[%s10616_s7 + $0x50] sm:$0xff] }
 0x793   :  { %v3421_v44 = vpop.f32.mrb[108].mxu0 }
 0x794   :  { %v3423_v45 = vpop.f32.mrb[109].mxu0 }
 0x795   :  { %v6304_v45 = vld [vmem:[%s10616_s7 + $0x40] sm:$0xff] }
 0x797   :  { %v3426_v46 = vpop.f32.mrb[110].mxu0 }
 0x798   :  { %v3428_v51 = vpop.f32.mrb[111].mxu0 }
 0x799   :  { %v6307_v51 = vld [vmem:[%s10616_s7 + $0x58] sm:$0xff] }
 0x79b   :  { %v3431_v53 = vpop.f32.mrb[112].mxu0 }
 0x79c   :  { %v3433_v37 = vpop.f32.mrb[113].mxu0 }
 0x79d   :  { %v6309_v37 = vld [vmem:[%s10616_s7 + $0x68] sm:$0xff] }
 0x79f   :  { %v3628_v54 = vpop.f32.mrb[114].mxu0 }
 0x7a0   :  { %v3630_v55 = vpop.f32.mrb[115].mxu0 }
 0x7a1   :  { %v6310_v55 = vld [vmem:[%s10616_s7 + $0x70] sm:$0xff] }
 0x7a3   :  { %v3633_v56 = vpop.f32.mrb[116].mxu0 }
 0x7c3   :  { %v2780_v28 = vpop.f32.mrb[44].mxu1 }
 0x7c4   :  { %v2782_v38 = vpop.f32.mrb[45].mxu1  ;;  %6909 = vmatprep.mubr.msk.f32.mxu1 %vm471_vm1, %v2780_v28 }
 0x7c5   :  { %v3843_v38 = vld [vmem:[%s10616_s7 + $0x20] sm:$0xff] }
 0x7c7   :  { %v2785_v35 = vpop.f32.mrb[46].mxu1 }
 0x7c8   :  { %v2787_v36 = vpop.f32.mrb[47].mxu1  ;;  %6910 = vmatmul.mubr.msk.f32.vlgmr.msra.gmra.mrb[8].mxu1 %vm471_vm1, %v2785_v35 }
 0x7c9   :  { %7876 = vmatpush3.bf16.msra.mxu1 %v7873_v58  ;;  %v3635_v58 = vpop.f32.mrb[117].mxu0  ;;  %v3845_v36 = vld [vmem:[%s10616_s7 + $0x30] sm:$0xff] }
 0x7ca   :  { %7878 = vmatprep.subr.bf16.mxu1 %v7877_v34 }
 0x7cb   :  { %v2790_v39 = vpop.f32.mrb[48].mxu1 }
 0x7cc   :  { %v2792_v22 = vpop.f32.mrb[49].mxu1  ;;  %6912 = vmatprep.mubr.msk.f32.mxu1 %vm471_vm1, %v2790_v39  ;;  %v3846_v39 = vld [vmem:[%s10616_s7 + $0x38] sm:$0xff] }
 0x7cd   :  { %7880 = vmatpush3.bf16.msra.mxu1 %v7877_v34  ;;  %v3844_v34 = vld [vmem:[%s10616_s7 + $0x28] sm:$0xff]  ;;  %v8029_v22 = vpack.c.bf16 %v3846_v39, %v3845_v36 }
 0x7ce   :  { %7881 = vmatprep.subr.bf16.mxu1 %v8362_v0  ;;  %v8026_v35 = vpack.c.bf16 %v3844_v34, %v3843_v38  ;;  %v6328_v34 = vld [vmem:[%s10616_s7 + $0xd0] sm:$0xff] }
 0x7cf   :  { %v2795_v41 = vpop.f32.mrb[50].mxu1 }
 0x7d0   :  { %v2797_v42 = vpop.f32.mrb[51].mxu1  ;;  %6913 = vmatmul.mubr.msk.f32.gmra.mrb[10].mxu1 %vm471_vm1, %v2795_v41  ;;  %v5990_v41 = vld [vmem:[%s10617_s5] ss:$0 sm:$0xff] }
 0x7d1   :  { %6923 = vmatprep.mubr.msk.f32.mxu1 %vm471_vm1, %v2992_v59  ;;  %v3638_v59 = vpop.f32.mrb[118].mxu0 }
 0x7d2   :  { %v3640_v61 = vpop.f32.mrb[119].mxu0 }
 0x7d4   :  { %6924 = vmatmul.mubr.msk.f32.vlgmr.msra.gmra.mrb[8].mxu1 %vm471_vm1, %v2997_v62  ;;  %v3643_v62 = vpop.f32.mrb[120].mxu0 }
 0x7d5   :  { %7883 = vmatpush1.bf16.msra.mxu1 %v8719_v48  ;;  %6926 = vmatprep.mubr.msk.f32.mxu1 %vm471_vm1, %v3002_v1  ;;  %v6251_v48 = vld [vmem:[%s10615_s4 + $0x1a0] sm:$0xff]  ;;  %v3645_v63 = vpop.f32.mrb[121].mxu0 }
 0x7d6   :  { %7884 = vmatprep.subr.bf16.mxu1 %v8362_v0  ;;  %v6316_v63 = vld [vmem:[%s10616_s7 + $0x88] sm:$0xff] }
 0x7d8   :  { %6927 = vmatmul.mubr.msk.f32.gmra.mrb[10].mxu1 %vm471_vm1, %v3007_v4  ;;  %v6274_v4 = vld [vmem:[%s10615_s4 + $0x1d8] sm:$0xff] }
 0x7d9   :  { %7886 = vmatpush1.bf16.msra.mxu1 %v8727_v57  ;;  %6247 = vmatprep.mubr.msk.f32.mxu1 %vm369_vm0, %v6240_v43  ;;  %v6252_v57 = vld [vmem:[%s10615_s4 + $0x1a8] sm:$0xff]  ;;  %v7965_v6 = vpack.c.bf16 %v6274_v4, %v6273_v2 }
 0x7da   :  { %7887 = vmatprep.subr.bf16.mxu1 %v8362_v0 }
 0x7dd   :  { %7889 = vmatpush1.bf16.msra.mxu1 %v8735_v3  ;;  %v7917_v3 = vpack.c.bf16 %v6252_v57, %v6251_v48 }
 0x7de   :  { %7890 = vmatprep.subr.bf16.mxu1 %v8362_v0 }
 0x7e1   :  { %7892 = vmatpush1.bf16.msra.mxu1 %v8743_v12  ;;  %v6239_v12 = vld [vmem:[%s10613_s3 + $0x340] sm:$0xff] }
 0x7e2   :  { %7893 = vmatprep.subr.bf16.mxu1 %v8362_v0 }
 0x7e5   :  { %7895 = vmatpush1.bf16.msra.mxu1 %v8751_v21  ;;  %v6242_v21 = vld [vmem:[%s10613_s3 + $0x358] sm:$0xff] }
 0x7e6   :  { %7896 = vmatprep.subr.bf16.mxu1 %v8362_v0 }
 0x7e9   :  { %7898 = vmatpush1.bf16.msra.mxu1 %v8759_v30  ;;  %v6241_v30 = vld [vmem:[%s10613_s3 + $0x350] sm:$0xff] }
 0x7ea   :  { %7899 = vmatprep.subr.bf16.mxu1 %v8362_v0 }
 0x7ed   :  { %7901 = vmatpush1.bf16.msra.mxu1 %v8767_v40  ;;  %v6244_v40 = vld [vmem:[%s10613_s3 + $0x368] sm:$0xff] }
 0x7ee   :  { %7902 = vmatprep.subr.bf16.mxu1 %v8362_v0 }
 0x7f1   :  { %7904 = vmatpush1.bf16.msra.mxu1 %v8775_v50  ;;  %v6243_v50 = vld [vmem:[%s10613_s3 + $0x360] sm:$0xff] }
 0x7f2   :  { %7905 = vmatprep.subr.bf16.mxu1 %v8362_v0 }
 0x7f5   :  { %7907 = vmatpush1.bf16.msra.mxu1 %v8783_v60  ;;  %v6246_v60 = vld [vmem:[%s10613_s3 + $0x378] sm:$0xff] }
 0x7f6   :  { %7908 = vmatprep.subr.bf16.mxu1 %v8362_v0 }
 0x7f9   :  { %7910 = vmatpush1.bf16.msra.mxu1 %v8791_v7  ;;  %v6245_v7 = vld [vmem:[%s10613_s3 + $0x370] sm:$0xff] }
 0x7fa   :  { %7911 = vmatprep.subr.bf16.mxu1 %v8362_v0 }
 0x7fd   :  { %7913 = vmatpush1.bf16.msra.mxu1 %v8799_v17  ;;  %v6253_v17 = vld [vmem:[%s10615_s4 + $0x1b0] sm:$0xff] }
 0x7fe   :  { %7914 = vmatprep.subr.bf16.mxu1 %v8362_v0 }
 0x801   :  { %7916 = vmatpush1.bf16.msra.mxu1 %v8807_v27  ;;  %v6254_v27 = vld [vmem:[%s10615_s4 + $0x1b8] sm:$0xff] }
 0x802   :  { %3186 = vmatprep.subr.mxu1 %v8363_v32 }
 0x805   :  { %3187 = vmatpush1.msra.mxu1 %v8810_v31  ;;  %v7921_v31 = vpack.c.bf16 %v6254_v27, %v6253_v17 }
 0x806   :  { %3203 = vmatmul.mubr.f32.vlgmr.msra.gmra.mrb[52].mxu1 %v6239_v12  ;;  %7918 = vmatprep.subr.bf16.mxu1 %v7917_v3 }
 0x807   :  { %6248 = vmatprep.mubr.msk.f32.mxu1 %vm369_vm0, %v6242_v21  ;;  %7920 = vmatpush3.bf16.msra.mxu1 %v7917_v3 }
 0x808   :  { %7922 = vmatprep.subr.bf16.mxu1 %v7921_v31 }
 0x80a   :  { %3208 = vmatmul.mubr.f32.gmra.mrb[54].mxu1 %v6241_v30 }
 0x80b   :  { %6249 = vmatprep.mubr.msk.f32.mxu1 %vm369_vm0, %v6244_v40  ;;  %7924 = vmatpush3.bf16.msra.mxu1 %v7921_v31  ;;  %v3765_v31 = vld [vmem:[%s10618_s6] sm:$0xff] }
 0x80c   :  { %7962 = vmatprep.subr.bf16.mxu1 %v7961_v52 }
 0x80e   :  { %3213 = vmatmul.mubr.f32.gmra.mrb[56].mxu1 %v6243_v50 }
 0x80f   :  { %6250 = vmatprep.mubr.msk.f32.mxu1 %vm369_vm0, %v6246_v60 }
 0x812   :  { %3218 = vmatmul.mubr.f32.gmra.mrb[58].mxu1 %v6245_v7 }
 0x8d9   :  { %v3204_v1 = vpop.f32.mrb[52].mxu1 }
 0x8da   :  { %v3206_v5 = vpop.f32.mrb[53].mxu1  ;;  %6937 = vmatprep.mubr.msk.f32.mxu1 %vm471_vm1, %v3204_v1  ;;  %v6313_v1 = vld [vmem:[%s10618_s6 + $0x10] sm:$0xff] }
 0x8db   :  { %v6317_v5 = vld [vmem:[%s10616_s7 + $0x90] sm:$0xff] }
 0x8dd   :  { %v3209_v8 = vpop.f32.mrb[54].mxu1 }
 0x8de   :  { %v3211_v11 = vpop.f32.mrb[55].mxu1  ;;  %6938 = vmatmul.mubr.msk.f32.vlgmr.msra.gmra.mrb[8].mxu1 %vm471_vm1, %v3209_v8 }
 0x8df   :  { %7964 = vmatpush3.bf16.msra.mxu1 %v7961_v52  ;;  %v8041_v52 = vpack.c.bf16 %v6307_v51, %v6306_v47  ;;  %v6335_v11 = vld [vmem:[%s10618_s6 + $0x20] sm:$0xff]  ;;  %v6343_v47 = vld [vmem:[%s10616_s7 + $0x130] sm:$0xff] }
 0x8e0   :  { %7966 = vmatprep.subr.bf16.mxu1 %v7965_v6 }
 0x8e1   :  { %v3214_v14 = vpop.f32.mrb[56].mxu1 }
 0x8e2   :  { %v3216_v15 = vpop.f32.mrb[57].mxu1  ;;  %6940 = vmatprep.mubr.msk.f32.mxu1 %vm471_vm1, %v3214_v14  ;;  %v6357_v14 = vld [vmem:[%s10618_s6 + $0x30] sm:$0xff] }
 0x8e3   :  { %7968 = vmatpush3.bf16.msra.mxu1 %v7965_v6  ;;  %v6318_v6 = vld [vmem:[%s10616_s7 + $0x98] sm:$0xff] }
 0x8e4   :  { %8006 = vmatprep.subr.bf16.mxu1 %v8005_v13  ;;  %v8059_v9 = vpack.c.bf16 %v6318_v6, %v6317_v5  ;;  %v6368_v15 = vld [vmem:[%s10618_s6 + $0x38] sm:$0xff] }
 0x8e5   :  { %v3219_v16 = vpop.f32.mrb[58].mxu1  ;;  %v6355_v5 = vld [vmem:[%s10616_s7 + $0x178] sm:$0xff] }
 0x8e6   :  { %v3221_v23 = vpop.f32.mrb[59].mxu1  ;;  %6941 = vmatmul.mubr.msk.f32.gmra.mrb[10].mxu1 %vm471_vm1, %v3219_v16  ;;  %v6379_v16 = vld [vmem:[%s10618_s6 + $0x40] sm:$0xff] }
 0x8e7   :  { %6951 = vmatprep.mubr.msk.f32.mxu1 %vm471_vm1, %v9750_v18  ;;  %v3839_v18 = vld [vmem:[%s10616_s7] sm:$0xff]  ;;  %v8062_v23 = vpack.c.bf16 %v6320_v20, %v6319_v19 }
 0x8e8   :  { %v8020_v28 = vpack.c.bf16 %v3840_v25, %v3839_v18  ;;  %v6322_v18 = vld [vmem:[%s10616_s7 + $0xb8] sm:$0xff] }
 0x8ea   :  { %6952 = vmatmul.mubr.msk.f32.vlgmr.msra.gmra.mrb[8].mxu1 %vm471_vm1, %v3421_v44  ;;  %8021 = vmatpush3.bf16.msra.mxu0 %v8020_v28  ;;  %v6302_v44 = vld [vmem:[%s10618_s6 + $0x8] sm:$0xff] }
 0x8eb   :  { %6954 = vmatprep.mubr.msk.f32.mxu1 %vm471_vm1, %v3426_v46  ;;  %8008 = vmatpush3.bf16.msra.mxu1 %v8005_v13  ;;  %v6305_v46 = vld [vmem:[%s10616_s7 + $0x48] sm:$0xff] }
 0x8ec   :  { %8010 = vmatprep.subr.bf16.mxu1 %v8009_v24  ;;  %8022 = vmatprep.subr.bf16.mxu0 %v8362_v0  ;;  %v8038_v49 = vpack.c.bf16 %v6305_v46, %v6304_v45  ;;  %v6346_v13 = vld [vmem:[%s10618_s6 + $0x28] sm:$0xff] }
 0x8ed   :  { %v6342_v45 = vld [vmem:[%s10616_s7 + $0x128] sm:$0xff] }
 0x8ee   :  { %6955 = vmatmul.mubr.msk.f32.gmra.mrb[10].mxu1 %vm471_vm1, %v3431_v53  ;;  %8024 = vmatpush3.bf16.msra.mxu0 %v8023_v33  ;;  %v6308_v53 = vld [vmem:[%s10616_s7 + $0x60] sm:$0xff]  ;;  %v6327_v33 = vld [vmem:[%s10616_s7 + $0xc8] sm:$0xff] }
 0x8ef   :  { %8012 = vmatpush3.bf16.msra.mxu1 %v8009_v24  ;;  %6965 = vmatprep.mubr.msk.f32.mxu1 %vm471_vm1, %v3628_v54  ;;  %v8044_v54 = vpack.c.bf16 %v6309_v37, %v6308_v53  ;;  %v6321_v24 = vld [vmem:[%s10616_s7 + $0xb0] sm:$0xff]  ;;  %v8074_v38 = vpack.c.bf16 %v6327_v33, %v6326_v29  ;;  %v6348_v37 = vld [vmem:[%s10616_s7 + $0x140] sm:$0xff] }
 0x8f0   :  { %8013 = vmatprep.subr.bf16.mxu1 %v8362_v0  ;;  %8025 = vmatprep.subr.bf16.mxu0 %v8362_v0  ;;  %v8065_v25 = vpack.c.bf16 %v6322_v18, %v6321_v24  ;;  %v6364_v24 = vld [vmem:[%s10616_s7 + $0x1a8] sm:$0xff]  ;;  %v6370_v33 = vld [vmem:[%s10616_s7 + $0x1c0] sm:$0xff] }
 0x8f2   :  { %6966 = vmatmul.mubr.msk.f32.vlgmr.msra.gmra.mrb[8].mxu1 %vm471_vm1, %v3633_v56  ;;  %8027 = vmatpush3.bf16.msra.mxu0 %v8026_v35  ;;  %v6311_v56 = vld [vmem:[%s10616_s7 + $0x78] sm:$0xff] }
 0x8f3   :  { %6968 = vmatprep.mubr.msk.f32.mxu1 %vm471_vm1, %v3638_v59  ;;  %8028 = vmatprep.subr.bf16.mxu0 %v8362_v0  ;;  %v8047_v58 = vpack.c.bf16 %v6311_v56, %v6310_v55  ;;  %v6329_v35 = vld [vmem:[%s10616_s7 + $0xd8] sm:$0xff]  ;;  %v6350_v56 = vld [vmem:[%s10616_s7 + $0x150] sm:$0xff] }
 0x8f6   :  { %6969 = vmatmul.mubr.msk.f32.gmra.mrb[10].mxu1 %vm471_vm1, %v3643_v62  ;;  %8030 = vmatpush3.bf16.msra.mxu0 %v8029_v22  ;;  %v6315_v62 = vld [vmem:[%s10616_s7 + $0x80] sm:$0xff]  ;;  %v8077_v22 = vpack.c.bf16 %v6329_v35, %v6328_v34  ;;  %v6372_v35 = vld [vmem:[%s10616_s7 + $0x1d0] sm:$0xff] }
 0x8f7   :  { %6979 = vmatprep.mubr.msk.f32.mxu1 %vm8364_vm2, %v8363_v32  ;;  %8049 = vmatprep.subr.bf16.mxu0 %v8362_v0  ;;  %v8056_v2 = vpack.c.bf16 %v6316_v63, %v6315_v62  ;;  %v6352_v63 = vld [vmem:[%s10616_s7 + $0x160] sm:$0xff] }
 0x9c5   :  { %v6967_v42 = vpop.f32.mrb[8].mxu1 }
 0x9c6   :  { %v8271_v43 = vadd.f32 %v6967_v42, %v5990_v41  ;;  %v3730_v48 = vpop.f32.mrb[9].mxu1  ;;  %v6331_v42 = vld [vmem:[%s10616_s7 + $0xe8] sm:$0xff] }
 0x9c7   :  { %v8272_v57 = vadd.f32 %v5990_v41, %v3730_v48  ;;  %v6332_v48 = vld [vmem:[%s10616_s7 + $0xf0] sm:$0xff] }
 0x9c8   :  { %v3754_v3 = vmax.f32 %v8271_v43, 0.0 }
 0x9c9   :  { %v3753_v12 = vmax.f32 %v8272_v57, 0.0  ;;  %v6970_v21 = vpop.f32.mrb[10].mxu1  ;;  %v6333_v57 = vld [vmem:[%s10616_s7 + $0xf8] sm:$0xff] }
 0x9ca   :  { %v8273_v30 = vadd.f32 %v6970_v21, %v5990_v41  ;;  %v3740_v40 = vpop.f32.mrb[11].mxu1  ;;  %v8083_v21 = vpack.c.bf16 %v6333_v57, %v6332_v48  ;;  %v6377_v48 = vld [vmem:[%s10616_s7 + $0x1f8] sm:$0xff] }
 0x9cb   :  { %v9924_v50 = vpack.c.bf16 %v3754_v3, %v3753_v12  ;;  %v8274_v60 = vadd.f32 %v5990_v41, %v3740_v40  ;;  %v6330_v41 = vld [vmem:[%s10616_s7 + $0xe0] sm:$0xff]  ;;  %v6338_v40 = vld [vmem:[%s10616_s7 + $0x108] sm:$0xff] }
 0x9cc   :  { %v3756_v7 = vmax.f32 %v8273_v30, 0.0  ;;  %v8080_v43 = vpack.c.bf16 %v6331_v42, %v6330_v41  ;;  %v6337_v30 = vld [vmem:[%s10616_s7 + $0x100] sm:$0xff]  ;;  %v6375_v41 = vld [vmem:[%s10616_s7 + $0x1e8] sm:$0xff] }
 0x9cd   :  { %v3755_v17 = vmax.f32 %v8274_v60, 0.0  ;;  %8015 = vmatpush3.bf16.msra.mxu1 %v9924_v50  ;;  %v6339_v60 = vld [vmem:[%s10616_s7 + $0x110] sm:$0xff] }
 0x9ce   :  { %8016 = vmatprep.subr.bf16.mxu1 %v8362_v0 }
 0x9cf   :  { %v9928_v27 = vpack.c.bf16 %v3756_v7, %v3755_v17  ;;  %v6340_v7 = vld [vmem:[%s10616_s7 + $0x118] sm:$0xff] }
 0x9d1   :  { %8018 = vmatpush3.bf16.msra.mxu1 %v9928_v27 }
 0x9d2   :  { %8031 = vmatprep.subr.bf16.mxu1 %v8362_v0 }
 0x9d4   :  { %6980 = vmatmul.mubr.msk.f32.vlgmr.msra.gmra.mrb[60].mxu1 %vm471_vm1, %v3765_v31  ;;  %v8095_v31 = vpack.c.bf16 %v6340_v7, %v6339_v60  ;;  %v6385_v60 = vld [vmem:[%s10616_s7 + $0x220] sm:$0xff]  ;;  %v6386_v7 = vld [vmem:[%s10616_s7 + $0x228] sm:$0xff] }
 0x9d5   :  { %8033 = vmatpush3.bf16.msra.mxu1 %v9924_v50  ;;  %7009 = vmatprep.mubr.msk.f32.mxu1 %vm8364_vm2, %v8363_v32 }
 0x9d6   :  { %8034 = vmatprep.subr.bf16.mxu1 %v8362_v0 }
 0x9d9   :  { %8036 = vmatpush3.bf16.msra.mxu1 %v9928_v27 }
 0x9da   :  { %8037 = vmatprep.subr.bf16.mxu1 %v8362_v0 }
 0x9dc   :  { %7010 = vmatmul.mubr.msk.f32.vlgmr.msra.gmra.mrb[62].mxu1 %vm471_vm1, %v6302_v44  ;;  %v6341_v44 = vld [vmem:[%s10616_s7 + $0x120] sm:$0xff] }
 0x9dd   :  { %7028 = vmatprep.mubr.msk.f32.mxu1 %vm8364_vm2, %v8363_v32  ;;  %8039 = vmatpush3.bf16.msra.mxu1 %v8038_v49  ;;  %v8098_v46 = vpack.c.bf16 %v6342_v45, %v6341_v44  ;;  %v6344_v49 = vld [vmem:[%s10616_s7 + $0x138] sm:$0xff]  ;;  %v5277_v45 = vld [vmem:[%s10619_s10 + $0x8] sm:$0xff] }
 0x9de   :  { %8040 = vmatprep.subr.bf16.mxu1 %v8362_v0  ;;  %v8101_v53 = vpack.c.bf16 %v6344_v49, %v6343_v47  ;;  %v5278_v49 = vld [vmem:[%s10619_s10 + $0x10] sm:$0xff] }
 0x9e1   :  { %8042 = vmatpush3.bf16.msra.mxu1 %v8041_v52 }
 0x9e2   :  { %8043 = vmatprep.subr.bf16.mxu1 %v8362_v0 }
 0x9e5   :  { %8045 = vmatpush3.bf16.msra.mxu1 %v8044_v54  ;;  %v6349_v54 = vld [vmem:[%s10616_s7 + $0x148] sm:$0xff] }
 0x9e6   :  { %8046 = vmatprep.subr.bf16.mxu1 %v8362_v0  ;;  %v8110_v55 = vpack.c.bf16 %v6349_v54, %v6348_v37  ;;  %v5280_v54 = vld [vmem:[%s10619_s10 + $0x20] sm:$0xff] }
 0x9e9   :  { %8048 = vmatpush3.bf16.msra.mxu1 %v8047_v58  ;;  %v6351_v58 = vld [vmem:[%s10616_s7 + $0x158] sm:$0xff] }
 0x9ea   :  { %8055 = vmatprep.subr.bf16.mxu1 %v8362_v0  ;;  %v8113_v62 = vpack.c.bf16 %v6351_v58, %v6350_v56  ;;  %v5285_v56 = vld [vmem:[%s10619_s10 + $0x48] sm:$0xff]  ;;  %v5287_v58 = vld [vmem:[%s10619_s10 + $0x58] sm:$0xff] }
 0xaa7   :  { %v3835_v59 = vpop.f32.mrb[60].mxu1 }
 0xaa8   :  { %v6981_v61 = vpop.f32.mrb[61].mxu1  ;;  %6999 = vmatmul.mubr.msk.f32.vlgmr.msra.gmra.mrb[122].mxu0 %vm3847_vm3, %v3835_v59 }
 0xaa9   :  { %8051 = vmatpush3.bf16.msra.mxu0 %v9924_v50  ;;  %7039 = vmatprep.mubr.msk.f32.mxu0 %vm8364_vm2, %v8363_v32 }
 0xaaa   :  { %8052 = vmatprep.subr.bf16.mxu0 %v8362_v0 }
 0xaad   :  { %8054 = vmatpush3.bf16.msra.mxu0 %v9928_v27 }
 0xaae   :  { %8067 = vmatprep.subr.bf16.mxu0 %v8362_v0 }
 0xaaf   :  { %v3993_v4 = vpop.f32.mrb[62].mxu1 }
 0xab0   :  { %7040 = vmatmul.mubr.msk.f32.vlgmr.msra.gmra.mrb[124].mxu0 %vm471_vm1, %v6313_v1  ;;  %v7011_v8 = vpop.f32.mrb[63].mxu1  ;;  %7029 = vmatmul.mubr.msk.f32.vlgmr.msra.gmra.mrb[64].mxu1 %vm3847_vm3, %v3993_v4  ;;  %v6353_v1 = vld [vmem:[%s10616_s7 + $0x168] sm:$0xff]  ;;  %v6354_v4 = vld [vmem:[%s10616_s7 + $0x170] sm:$0xff] }
 0xab1   :  { %8069 = vmatpush3.bf16.msra.mxu0 %v9924_v50  ;;  %7069 = vmatprep.mubr.msk.f32.mxu0 %vm8364_vm2, %v8363_v32 }
 0xab2   :  { %8070 = vmatprep.subr.bf16.mxu0 %v8362_v0  ;;  %8057 = vmatpush3.bf16.msra.mxu1 %v8056_v2  ;;  %v8116_v2 = vpack.c.bf16 %v6353_v1, %v6352_v63  ;;  %v5286_v63 = vld [vmem:[%s10619_s10 + $0x50] sm:$0xff]  ;;  %v5289_v1 = vld [vmem:[%s10619_s10 + $0x68] sm:$0xff] }
 0xab3   :  { %8058 = vmatprep.subr.bf16.mxu1 %v8362_v0  ;;  %7058 = vmatprep.mubr.msk.f32.mxu1 %vm8364_vm2, %v8363_v32 }
 0xab5   :  { %8072 = vmatpush3.bf16.msra.mxu0 %v9928_v27 }
 0xab6   :  { %8085 = vmatprep.subr.bf16.mxu0 %v8362_v0  ;;  %8060 = vmatpush3.bf16.msra.mxu1 %v8059_v9  ;;  %v8119_v9 = vpack.c.bf16 %v6355_v5, %v6354_v4 }
 0xab7   :  { %8061 = vmatprep.subr.bf16.mxu1 %v8362_v0 }
 0xab8   :  { %7070 = vmatmul.mubr.msk.f32.vlgmr.msra.gmra.mrb[126].mxu0 %vm471_vm1, %v6324_v10  ;;  %v6359_v10 = vld [vmem:[%s10616_s7 + $0x180] sm:$0xff] }
 0xab9   :  { %8087 = vmatpush3.bf16.msra.mxu0 %v9924_v50  ;;  %7099 = vmatprep.mubr.msk.f32.mxu0 %vm8364_vm2, %v8363_v32 }
 0xaba   :  { %8088 = vmatprep.subr.bf16.mxu0 %v8362_v0  ;;  %8063 = vmatpush3.bf16.msra.mxu1 %v8062_v23  ;;  %v6363_v23 = vld [vmem:[%s10616_s7 + $0x1a0] sm:$0xff] }
 0xabb   :  { %8064 = vmatprep.subr.bf16.mxu1 %v8362_v0  ;;  %v8134_v18 = vpack.c.bf16 %v6364_v24, %v6363_v23  ;;  %v6394_v24 = vld [vmem:[%s10619_s10 + $0x80] sm:$0xff] }
 0xabd   :  { %8090 = vmatpush3.bf16.msra.mxu0 %v9928_v27 }
 0xabe   :  { %8103 = vmatprep.subr.bf16.mxu0 %v8362_v0  ;;  %8066 = vmatpush3.bf16.msra.mxu1 %v8065_v25  ;;  %v6365_v25 = vld [vmem:[%s10616_s7 + $0x1b0] sm:$0xff] }
 0xabf   :  { %8073 = vmatprep.subr.bf16.mxu1 %v8362_v0 }
 0xac0   :  { %7100 = vmatmul.mubr.msk.f32.vlgmr.msra.gmra.mrb[128].mxu0 %vm471_vm1, %v6335_v11  ;;  %v6360_v11 = vld [vmem:[%s10616_s7 + $0x188] sm:$0xff] }
 0xac1   :  { %8105 = vmatpush3.bf16.msra.mxu0 %v9924_v50  ;;  %7129 = vmatprep.mubr.msk.f32.mxu0 %vm8364_vm2, %v8363_v32 }
 0xac2   :  { %8106 = vmatprep.subr.bf16.mxu0 %v8362_v0 }
 0xac5   :  { %8108 = vmatpush3.bf16.msra.mxu0 %v9928_v27 }
 0xac6   :  { %8121 = vmatprep.subr.bf16.mxu0 %v8362_v0 }
 0xac8   :  { %7130 = vmatmul.mubr.msk.f32.vlgmr.msra.gmra.mrb[130].mxu0 %vm471_vm1, %v6346_v13  ;;  %v8128_v13 = vpack.c.bf16 %v6360_v11, %v6359_v10  ;;  %v6299_v10 = vld [vmem:[%s10620_s8] ss:$0 sm:$0xff] }
 0xac9   :  { %8123 = vmatpush3.bf16.msra.mxu0 %v9924_v50  ;;  %7159 = vmatprep.mubr.msk.f32.mxu0 %vm8364_vm2, %v8363_v32 }
 0xaca   :  { %8124 = vmatprep.subr.bf16.mxu0 %v8362_v0 }
 0xacd   :  { %8126 = vmatpush3.bf16.msra.mxu0 %v9928_v27 }
 0xace   :  { %8139 = vmatprep.subr.bf16.mxu0 %v8362_v0 }
 0xad0   :  { %7160 = vmatmul.mubr.msk.f32.vlgmr.msra.gmra.mrb[132].mxu0 %vm471_vm1, %v6357_v14  ;;  %v6361_v14 = vld [vmem:[%s10616_s7 + $0x190] sm:$0xff] }
 0xad1   :  { %8141 = vmatpush3.bf16.msra.mxu0 %v9924_v50  ;;  %7189 = vmatprep.mubr.msk.f32.mxu0 %vm8364_vm2, %v8363_v32 }
 0xad2   :  { %8142 = vmatprep.subr.bf16.mxu0 %v8362_v0 }
 0xad5   :  { %8144 = vmatpush3.bf16.msra.mxu0 %v9928_v27 }
 0xad6   :  { %8157 = vmatprep.subr.bf16.mxu0 %v8362_v0 }
 0xad8   :  { %7190 = vmatmul.mubr.msk.f32.vlgmr.msra.gmra.mrb[134].mxu0 %vm471_vm1, %v6368_v15  ;;  %v6362_v15 = vld [vmem:[%s10616_s7 + $0x198] sm:$0xff] }
 0xad9   :  { %8159 = vmatpush3.bf16.msra.mxu0 %v9924_v50  ;;  %7219 = vmatprep.mubr.msk.f32.mxu0 %vm8364_vm2, %v8363_v32  ;;  %v8092_v50 = vpack.c.bf16 %v6338_v40, %v6337_v30  ;;  %v8131_v20 = vpack.c.bf16 %v6362_v15, %v6361_v14  ;;  %v6383_v30 = vld [vmem:[%s10616_s7 + $0x210] sm:$0xff]  ;;  %v6384_v40 = vld [vmem:[%s10616_s7 + $0x218] sm:$0xff] }
 0xada   :  { %8160 = vmatprep.subr.bf16.mxu0 %v8362_v0 }
 0xadd   :  { %8162 = vmatpush3.bf16.msra.mxu0 %v9928_v27 }
 0xae0   :  { %7220 = vmatmul.mubr.msk.f32.vlgmr.msra.gmra.mrb[136].mxu0 %vm471_vm1, %v6379_v16 }
 0xae1   :  { %5359 = vmatprep.mubr.f32.mxu0 %v8363_v32 }
 0xb7b   :  { %v10078_v26 = vpop.f32.mrb[122].mxu0 }
 0xb7c   :  { %v7000_v28 = vpop.f32.mrb[123].mxu0  ;;  %v3921_v11 = vadd.f32 %v6299_v10, %v10078_v26  ;;  %v6397_v26 = vld [vmem:[%s10619_s10 + $0x98] sm:$0xff] }
 0xb7d   :  { %v6366_v28 = vld [vmem:[%s10616_s7 + $0x1b8] sm:$0xff] }
 0xb7e   :  { %v8137_v29 = vpack.c.bf16 %v6366_v28, %v6365_v25  ;;  %v6399_v28 = vld [vmem:[%s10619_s10 + $0xa8] sm:$0xff] }
 0xb83   :  { %v4151_v36 = vpop.f32.mrb[124].mxu0 }
 0xb84   :  { %v7041_v39 = vpop.f32.mrb[125].mxu0  ;;  %7059 = vmatmul.mubr.msk.f32.vlgmr.msra.gmra.mrb[64].mxu1 %vm3847_vm3, %v4151_v36  ;;  %v6373_v36 = vld [vmem:[%s10616_s7 + $0x1d8] sm:$0xff] }
 0xb85   :  { %8075 = vmatpush3.bf16.msra.mxu1 %v8074_v38  ;;  %7088 = vmatprep.mubr.msk.f32.mxu1 %vm8364_vm2, %v8363_v32  ;;  %v6371_v38 = vld [vmem:[%s10616_s7 + $0x1c8] sm:$0xff]  ;;  %v8149_v39 = vpack.c.bf16 %v6373_v36, %v6372_v35  ;;  %v6398_v36 = vld [vmem:[%s10619_s10 + $0xa0] sm:$0xff] }
 0xb86   :  { %8076 = vmatprep.subr.bf16.mxu1 %v8362_v0  ;;  %v8146_v34 = vpack.c.bf16 %v6371_v38, %v6370_v33  ;;  %v6392_v38 = vld [vmem:[%s10621_s9 + $0x2] sm:$0x3] }
 0xb89   :  { %8078 = vmatpush3.bf16.msra.mxu1 %v8077_v22  ;;  %v6374_v22 = vld [vmem:[%s10616_s7 + $0x1e0] sm:$0xff] }
 0xb8a   :  { %8079 = vmatprep.subr.bf16.mxu1 %v8362_v0  ;;  %v8152_v42 = vpack.c.bf16 %v6375_v41, %v6374_v22  ;;  %v6403_v22 = vld [vmem:[%s10619_s10 + $0xc8] sm:$0xff]  ;;  %v6405_v41 = vld [vmem:[%s10619_s10 + $0xd8] sm:$0xff] }
 0xb8b   :  { %v4309_v3 = vpop.f32.mrb[126].mxu0 }
 0xb8c   :  { %v7071_v12 = vpop.f32.mrb[127].mxu0 }
 0xb8d   :  { %8081 = vmatpush3.bf16.msra.mxu1 %v8080_v43  ;;  %v6376_v43 = vld [vmem:[%s10616_s7 + $0x1f0] sm:$0xff]  ;;  %v6382_v12 = vld [vmem:[%s10616_s7 + $0x208] sm:$0xff] }
 0xb8e   :  { %8082 = vmatprep.subr.bf16.mxu1 %v8362_v0  ;;  %v8155_v57 = vpack.c.bf16 %v6377_v48, %v6376_v43  ;;  %v8199_v43 = vpack.c.bf16 %v6405_v41, %v6403_v22  ;;  %v6402_v48 = vld [vmem:[%s10619_s10 + $0xc0] sm:$0xff]  ;;  %v6446_v41 = vld [vmem:[%s10619_s10 + $0x1f0] sm:$0xff] }
 0xb8f   :  { %v6444_v22 = vld [vmem:[%s10619_s10 + $0x1e0] sm:$0xff] }
 0xb91   :  { %8084 = vmatpush3.bf16.msra.mxu1 %v8083_v21 }
 0xb92   :  { %8091 = vmatprep.subr.bf16.mxu1 %v8362_v0 }
 0xb93   :  { %v4467_v17 = vpop.f32.mrb[128].mxu0 }
 0xb94   :  { %7089 = vmatmul.mubr.msk.f32.vlgmr.msra.gmra.mrb[64].mxu1 %vm3847_vm3, %v4309_v3  ;;  %v7101_v27 = vpop.f32.mrb[129].mxu0  ;;  %v6381_v3 = vld [vmem:[%s10616_s7 + $0x200] sm:$0xff] }
 0xb95   :  { %8093 = vmatpush3.bf16.msra.mxu1 %v8092_v50  ;;  %7118 = vmatprep.mubr.msk.f32.mxu1 %vm8364_vm2, %v8363_v32  ;;  %v8164_v21 = vpack.c.bf16 %v6382_v12, %v6381_v3  ;;  %v8167_v50 = vpack.c.bf16 %v6384_v40, %v6383_v30  ;;  %v6387_v27 = vld [vmem:[%s10616_s7 + $0x230] sm:$0xff]  ;;  %v6407_v3 = vld [vmem:[%s10619_s10 + $0xe8] sm:$0xff]  ;;  %v6409_v12 = vld [vmem:[%s10619_s10 + $0xf8] sm:$0xff] }
 0xb96   :  { %8094 = vmatprep.subr.bf16.mxu1 %v8362_v0  ;;  %v8203_v30 = vpack.c.bf16 %v6409_v12, %v6407_v3  ;;  %v6406_v40 = vld [vmem:[%s10619_s10 + $0xe0] sm:$0xff]  ;;  %v5875_v12 = vld [vmem:[%s10622_s12 + $0x8] sm:$0xff] }
 0xb99   :  { %8096 = vmatpush3.bf16.msra.mxu1 %v8095_v31  ;;  %v6388_v31 = vld [vmem:[%s10616_s7 + $0x238] sm:$0xff] }
 0xb9a   :  { %8097 = vmatprep.subr.bf16.mxu1 %v8362_v0  ;;  %v8173_v44 = vpack.c.bf16 %v6388_v31, %v6387_v27  ;;  %v6413_v31 = vld [vmem:[%s10619_s10 + $0x100] sm:$0xff] }
 0xb9b   :  { %v4625_v51 = vpop.f32.mrb[130].mxu0 }
 0xb9c   :  { %v7131_v52 = vpop.f32.mrb[131].mxu0 }
 0xb9d   :  { %8099 = vmatpush3.bf16.msra.mxu1 %v8098_v46  ;;  %v5279_v46 = vld [vmem:[%s10619_s10 + $0x18] sm:$0xff] }
 0xb9e   :  { %8100 = vmatprep.subr.bf16.mxu1 %v8362_v0  ;;  %v8175_v47 = vpack.c.bf16 %v5279_v46, %v5277_v45  ;;  %v5283_v52 = vld [vmem:[%s10619_s10 + $0x38] sm:$0xff]  ;;  %v6418_v46 = vld [vmem:[%s10619_s10 + $0x128] sm:$0xff] }
 0xba0   :  { %8176 = vmatprep.subr.bf16.mxu0 %v8175_v47 }
 0xba1   :  { %8102 = vmatpush3.bf16.msra.mxu1 %v8101_v53 }
 0xba2   :  { %8109 = vmatprep.subr.bf16.mxu1 %v8362_v0 }
 0xba3   :  { %v4783_v59 = vpop.f32.mrb[132].mxu0 }
 0xba4   :  { %7119 = vmatmul.mubr.msk.f32.vlgmr.msra.gmra.mrb[64].mxu1 %vm3847_vm3, %v4467_v17  ;;  %v7161_v61 = vpop.f32.mrb[133].mxu0  ;;  %v8170_v17 = vpack.c.bf16 %v6386_v7, %v6385_v60  ;;  %v6414_v7 = vld [vmem:[%s10619_s10 + $0x108] sm:$0xff] }
 0xba5   :  { %8111 = vmatpush3.bf16.msra.mxu1 %v8110_v55  ;;  %7148 = vmatprep.mubr.msk.f32.mxu1 %vm8364_vm2, %v8363_v32  ;;  %v5282_v55 = vld [vmem:[%s10619_s10 + $0x30] sm:$0xff]  ;;  %v8183_v61 = vpack.c.bf16 %v5287_v58, %v5285_v56 }
 0xba6   :  { %8112 = vmatprep.subr.bf16.mxu1 %v8362_v0 }
 0xba9   :  { %8114 = vmatpush3.bf16.msra.mxu1 %v8113_v62  ;;  %v5284_v62 = vld [vmem:[%s10619_s10 + $0x40] sm:$0xff] }
 0xbaa   :  { %8115 = vmatprep.subr.bf16.mxu1 %v8362_v0  ;;  %v8185_v4 = vpack.c.bf16 %v5286_v63, %v5284_v62  ;;  %v6426_v62 = vld [vmem:[%s10619_s10 + $0x168] sm:$0xff]  ;;  %v6428_v63 = vld [vmem:[%s10619_s10 + $0x178] sm:$0xff] }
 0xbab   :  { %v4941_v6 = vpop.f32.mrb[134].mxu0 }
 0xbac   :  { %v7191_v8 = vpop.f32.mrb[135].mxu0 }
 0xbad   :  { %8117 = vmatpush3.bf16.msra.mxu1 %v8116_v2  ;;  %v5291_v2 = vld [vmem:[%s10619_s10 + $0x78] sm:$0xff]  ;;  %v5290_v8 = vld [vmem:[%s10619_s10 + $0x70] sm:$0xff] }
 0xbae   :  { %8118 = vmatprep.subr.bf16.mxu1 %v8362_v0  ;;  %v8187_v5 = vpack.c.bf16 %v5291_v2, %v5289_v1  ;;  %v8219_v2 = vpack.c.bf16 %v6428_v63, %v6426_v62  ;;  %v5901_v62 = vld [vmem:[%s10622_s12 + $0xd8] sm:$0xff] }
 0xbb1   :  { %8120 = vmatpush3.bf16.msra.mxu1 %v8119_v9 }
 0xbb2   :  { %8127 = vmatprep.subr.bf16.mxu1 %v8362_v0 }
 0xbb3   :  { %v10185_v16 = vpop.f32.mrb[136].mxu0 }
 0xbb4   :  { %7149 = vmatmul.mubr.msk.f32.vlgmr.msra.gmra.mrb[64].mxu1 %vm3847_vm3, %v4625_v51  ;;  %v7221_v19 = vpop.f32.mrb[137].mxu0  ;;  %v5281_v51 = vld [vmem:[%s10619_s10 + $0x28] sm:$0xff] }
 0xbb5   :  { %8129 = vmatpush3.bf16.msra.mxu1 %v8128_v13  ;;  %7178 = vmatprep.mubr.msk.f32.mxu1 %vm8364_vm2, %v8363_v32  ;;  %v8179_v37 = vpack.c.bf16 %v5283_v52, %v5281_v51  ;;  %v5201_v19 = vld [vmem:[%s10621_s9] sm:$0x3] }
 0xbb6   :  { %8130 = vmatprep.subr.bf16.mxu1 %v8362_v0 }
 0xbb9   :  { %8132 = vmatpush3.bf16.msra.mxu1 %v8131_v20  ;;  %v6395_v20 = vld [vmem:[%s10619_s10 + $0x88] sm:$0xff] }
 0xbba   :  { %8133 = vmatprep.subr.bf16.mxu1 %v8362_v0  ;;  %v8191_v23 = vpack.c.bf16 %v6397_v26, %v6395_v20  ;;  %v6430_v26 = vld [vmem:[%s10621_s9 + $0x6] sm:$0x3] }
 0xbbd   :  { %8135 = vmatpush3.bf16.msra.mxu1 %v8134_v18  ;;  %v6396_v18 = vld [vmem:[%s10619_s10 + $0x90] sm:$0xff] }
 0xbbe   :  { %8136 = vmatprep.subr.bf16.mxu1 %v8362_v0 }
 0xbc1   :  { %8138 = vmatpush3.bf16.msra.mxu1 %v8137_v29  ;;  %v6401_v29 = vld [vmem:[%s10619_s10 + $0xb8] sm:$0xff] }
 0xbc2   :  { %8145 = vmatprep.subr.bf16.mxu1 %v8362_v0  ;;  %v8195_v35 = vpack.c.bf16 %v6401_v29, %v6399_v28  ;;  %v6443_v28 = vld [vmem:[%s10619_s10 + $0x1d8] sm:$0xff] }
 0xbc4   :  { %7179 = vmatmul.mubr.msk.f32.vlgmr.msra.gmra.mrb[64].mxu1 %vm3847_vm3, %v4783_v59  ;;  %v8181_v59 = vpack.c.bf16 %v5282_v55, %v5280_v54  ;;  %v6422_v54 = vld [vmem:[%s10619_s10 + $0x148] sm:$0xff]  ;;  %v6424_v55 = vld [vmem:[%s10619_s10 + $0x158] sm:$0xff] }
 0xbc5   :  { %8147 = vmatpush3.bf16.msra.mxu1 %v8146_v34  ;;  %7208 = vmatprep.mubr.msk.f32.mxu1 %vm8364_vm2, %v8363_v32  ;;  %v8193_v34 = vpack.c.bf16 %v6396_v18, %v6394_v24  ;;  %v8215_v58 = vpack.c.bf16 %v6424_v55, %v6422_v54  ;;  %v6436_v18 = vld [vmem:[%s10619_s10 + $0x1a0] sm:$0xff]  ;;  %v5899_v54 = vld [vmem:[%s10622_s12 + $0xc8] sm:$0xff] }
 0xbc6   :  { %8148 = vmatprep.subr.bf16.mxu1 %v8362_v0 }
 0xbc9   :  { %8150 = vmatpush3.bf16.msra.mxu1 %v8149_v39  ;;  %v6400_v39 = vld [vmem:[%s10619_s10 + $0xb0] sm:$0xff] }
 0xbca   :  { %8151 = vmatprep.subr.bf16.mxu1 %v8362_v0 }
 0xbcd   :  { %8153 = vmatpush3.bf16.msra.mxu1 %v8152_v42  ;;  %v8197_v42 = vpack.c.bf16 %v6400_v39, %v6398_v36  ;;  %v6447_v36 = vld [vmem:[%s10619_s10 + $0x1f8] sm:$0xff] }
 0xbce   :  { %8154 = vmatprep.subr.bf16.mxu1 %v8362_v0 }
 0xbd1   :  { %8156 = vmatpush3.bf16.msra.mxu1 %v8155_v57  ;;  %v6404_v57 = vld [vmem:[%s10619_s10 + $0xd0] sm:$0xff] }
 0xbd2   :  { %8163 = vmatprep.subr.bf16.mxu1 %v8362_v0 }
 0xbd4   :  { %7209 = vmatmul.mubr.msk.f32.vlgmr.msra.gmra.mrb[64].mxu1 %vm3847_vm3, %v4941_v6  ;;  %v5288_v6 = vld [vmem:[%s10619_s10 + $0x60] sm:$0xff] }
 0xbd5   :  { %8165 = vmatpush3.bf16.msra.mxu1 %v8164_v21  ;;  %7238 = vmatprep.mubr.msk.f32.mxu1 %vm8364_vm2, %v8363_v32  ;;  %v8189_v9 = vpack.c.bf16 %v5290_v8, %v5288_v6  ;;  %v8201_v21 = vpack.c.bf16 %v6404_v57, %v6402_v48  ;;  %v6433_v8 = vld [vmem:[%s10619_s10 + $0x188] sm:$0xff]  ;;  %v5874_v57 = vld [vmem:[%s10622_s12] sm:$0xff] }
 0xbd6   :  { %8166 = vmatprep.subr.bf16.mxu1 %v8362_v0  ;;  %v5891_v48 = vld [vmem:[%s10622_s12 + $0x88] sm:$0xff] }
 0xbd9   :  { %8168 = vmatpush3.bf16.msra.mxu1 %v8167_v50  ;;  %v6408_v50 = vld [vmem:[%s10619_s10 + $0xf0] sm:$0xff] }
 0xbda   :  { %8169 = vmatprep.subr.bf16.mxu1 %v8362_v0  ;;  %v8205_v60 = vpack.c.bf16 %v6408_v50, %v6406_v40  ;;  %v8241_v40 = vpack.c.bf16 %v5875_v12, %v5874_v57 }
 0xbdd   :  { %8171 = vmatpush3.bf16.msra.mxu1 %v8170_v17  ;;  %v6416_v17 = vld [vmem:[%s10619_s10 + $0x118] sm:$0xff] }
 0xbde   :  { %8172 = vmatprep.subr.bf16.mxu1 %v8362_v0  ;;  %v5276_v0 = vld [vmem:[%s10619_s10] sm:$0xff]  ;;  %v8207_v27 = vpack.c.bf16 %v6416_v17, %v6414_v7  ;;  %v5877_v7 = vld [vmem:[%s10622_s12 + $0x18] sm:$0xff] }
 0xbdf   :  { %v8177_v53 = vpack.c.bf16 %v5278_v49, %v5276_v0  ;;  %v6420_v0 = vld [vmem:[%s10619_s10 + $0x138] sm:$0xff]  ;;  %v6411_v49 = vld [vmem:[%s10621_s9 + $0x4] sm:$0x3] }
 0xbe0   :  { %v8211_v52 = vpack.c.bf16 %v6420_v0, %v6418_v46  ;;  %v5894_v17 = vld [vmem:[%s10622_s12 + $0xa0] sm:$0xff]  ;;  %v5879_v46 = vld [vmem:[%s10622_s12 + $0x28] sm:$0xff]  ;;  %v5896_v0 = vld [vmem:[%s10622_s12 + $0xb0] sm:$0xff] }
 0xbe1   :  { %8174 = vmatpush3.bf16.msra.mxu1 %v8173_v44  ;;  %8178 = vmatpush1.bf16.msra.mxu0 %v8177_v53  ;;  %v6415_v44 = vld [vmem:[%s10619_s10 + $0x110] sm:$0xff]  ;;  %v6417_v53 = vld [vmem:[%s10619_s10 + $0x120] sm:$0xff] }
 0xbe2   :  { %7241 = vmatprep.subr.mxu1 %v8363_v32  ;;  %8180 = vmatprep.subr.bf16.mxu0 %v8179_v37  ;;  %v8209_v51 = vpack.c.bf16 %v6415_v44, %v6413_v31  ;;  %v6419_v37 = vld [vmem:[%s10619_s10 + $0x130] sm:$0xff] }
 0xbe3   :  { %v8213_v56 = vpack.c.bf16 %v6419_v37, %v6417_v53  ;;  %v5881_v53 = vld [vmem:[%s10622_s12 + $0x38] sm:$0xff]  ;;  %v5898_v37 = vld [vmem:[%s10622_s12 + $0xc0] sm:$0xff] }
 0xbe4   :  { %7239 = vmatmul.mubr.msk.f32.vlgmr.msra.gmra.mrb[64].mxu1 %vm3847_vm3, %v10185_v16 }
 0xbe5   :  { %7243 = vmatprep.mubr.msk.f32.mxu1 %vm8364_vm2, %v8363_v32  ;;  %8182 = vmatpush1.bf16.msra.mxu0 %v8181_v59  ;;  %v6421_v59 = vld [vmem:[%s10619_s10 + $0x140] sm:$0xff] }
 0xbe6   :  { %8184 = vmatprep.subr.bf16.mxu0 %v8183_v61  ;;  %v6423_v61 = vld [vmem:[%s10619_s10 + $0x150] sm:$0xff] }
 0xbe7   :  { %v8217_v1 = vpack.c.bf16 %v6423_v61, %v6421_v59  ;;  %v5883_v59 = vld [vmem:[%s10622_s12 + $0x48] sm:$0xff]  ;;  %v5900_v61 = vld [vmem:[%s10622_s12 + $0xd0] sm:$0xff] }
 0xbe9   :  { %8186 = vmatpush1.bf16.msra.mxu0 %v8185_v4  ;;  %v6425_v4 = vld [vmem:[%s10619_s10 + $0x160] sm:$0xff] }
 0xbea   :  { %8188 = vmatprep.subr.bf16.mxu0 %v8187_v5  ;;  %v6427_v5 = vld [vmem:[%s10619_s10 + $0x170] sm:$0xff] }
 0xbeb   :  { %v8221_v6 = vpack.c.bf16 %v6427_v5, %v6425_v4  ;;  %v5885_v4 = vld [vmem:[%s10622_s12 + $0x58] sm:$0xff]  ;;  %v5902_v5 = vld [vmem:[%s10622_s12 + $0xe0] sm:$0xff] }
 0xbed   :  { %8190 = vmatpush1.bf16.msra.mxu0 %v8189_v9  ;;  %v6435_v9 = vld [vmem:[%s10619_s10 + $0x198] sm:$0xff] }
 0xbee   :  { %7246 = vmatprep.subr.mxu0 %v8363_v32  ;;  %v8223_v10 = vpack.c.bf16 %v6435_v9, %v6433_v8 }
 0xcb7   :  { %v5181_v13 = vpop.f32.mrb[64].mxu1 }
 0xcb8   :  { %v8276_v14 = vadd.f32 %v5181_v13, %v3921_v11  ;;  %v7240_v15 = vpop.f32.mrb[65].mxu1  ;;  %v6432_v11 = vld [vmem:[%s10619_s10 + $0x180] sm:$0xff]  ;;  %v6434_v13 = vld [vmem:[%s10619_s10 + $0x190] sm:$0xff] }
 0xcb9   :  { %v6437_v15 = vld [vmem:[%s10619_s10 + $0x1a8] sm:$0xff] }
 0xcba   :  { %v10325_v16 = vmax.f32 %v8276_v14, 0.0 }
 0xcbc   :  { %7242 = vmatpush3.msra.mxu1 %v10325_v16 }
 0xcbd   :  { %7244 = vmatmul.mubr.msk.f32.vlgmr.msra.gmra.mrb[66].mxu1 %vm5202_vm4, %v5201_v19  ;;  %v6439_v19 = vld [vmem:[%s10619_s10 + $0x1b8] sm:$0xff] }
 0xcbe   :  { %v8227_v24 = vpack.c.bf16 %v6439_v19, %v6437_v15  ;;  %v5904_v19 = vld [vmem:[%s10622_s12 + $0xf0] sm:$0xff] }
 0xd90   :  { %v5272_v25 = vpop.f32.mrb[66].mxu1 }
 0xd91   :  { %6391 = vmatmul.mubr.msk.f32.vlgmr.msra.gmra.mrb[138].mxu0 %vm3847_vm3, %v5272_v25  ;;  %v7245_v33 = vpop.f32.mrb[67].mxu1  ;;  %v6438_v25 = vld [vmem:[%s10619_s10 + $0x1b0] sm:$0xff] }
 0xd92   :  { %7247 = vmatpush3.msra.mxu0 %v10325_v16  ;;  %7248 = vmatprep.mubr.msk.f32.mxu0 %vm8364_vm2, %v8363_v32  ;;  %v8229_v29 = vpack.c.bf16 %v6438_v25, %v6436_v18  ;;  %v5189_v25 = vlaneseq }
 0xd93   :  { %8192 = vmatprep.subr.bf16.mxu0 %v8191_v23  ;;  %v8225_v23 = vpack.c.bf16 %v6434_v13, %v6432_v11  ;;  %v5886_v13 = vld [vmem:[%s10622_s12 + $0x60] sm:$0xff] }
 0xd95   :  { %7249 = vmatmul.mubr.msk.f32.vlgmr.msra.gmra.mrb[140].mxu0 %vm5202_vm4, %v6392_v38  ;;  %v6440_v38 = vld [vmem:[%s10619_s10 + $0x1c0] sm:$0xff] }
 0xd96   :  { %8194 = vmatpush1.bf16.msra.mxu0 %v8193_v34  ;;  %5527 = vmatprep.mubr.f32.mxu0 %v8363_v32  ;;  %v6442_v34 = vld [vmem:[%s10619_s10 + $0x1d0] sm:$0xff] }
 0xd97   :  { %8196 = vmatprep.subr.bf16.mxu0 %v8195_v35  ;;  %v6445_v35 = vld [vmem:[%s10619_s10 + $0x1e8] sm:$0xff] }
 0xd98   :  { %v8235_v39 = vpack.c.bf16 %v6447_v36, %v6445_v35 }
 0xd9a   :  { %8198 = vmatpush1.bf16.msra.mxu0 %v8197_v42  ;;  %v8237_v42 = vpack.c.bf16 %v6446_v41, %v6444_v22 }
 0xd9b   :  { %8200 = vmatprep.subr.bf16.mxu0 %v8199_v43  ;;  %v5890_v43 = vld [vmem:[%s10622_s12 + $0x80] sm:$0xff] }
 0xd9c   :  { %v8239_v3 = vpack.c.bf16 %v5891_v48, %v5890_v43 }
 0xd9e   :  { %8202 = vmatpush1.bf16.msra.mxu0 %v8201_v21  ;;  %v5892_v21 = vld [vmem:[%s10622_s12 + $0x90] sm:$0xff]  ;;  %8240 = vmatprep.subr.bf16.mxu1 %v8239_v3 }
 0xd9f   :  { %8204 = vmatprep.subr.bf16.mxu0 %v8203_v30  ;;  %v5893_v30 = vld [vmem:[%s10622_s12 + $0x98] sm:$0xff]  ;;  %8242 = vmatpush3.bf16.msra.mxu1 %v8241_v40 }
 0xda0   :  { %v8243_v50 = vpack.c.bf16 %v5893_v30, %v5892_v21 }
 0xda2   :  { %8206 = vmatpush1.bf16.msra.mxu0 %v8205_v60  ;;  %v5876_v60 = vld [vmem:[%s10622_s12 + $0x10] sm:$0xff]  ;;  %8244 = vmatprep.subr.bf16.mxu1 %v8243_v50 }
 0xda3   :  { %7251 = vmatprep.subr.mxu0 %v8363_v32  ;;  %v8245_v31 = vpack.c.bf16 %v5877_v7, %v5876_v60 }
 0xda5   :  { %8246 = vmatpush3.bf16.msra.mxu1 %v8245_v31 }
 0xe68   :  { %v5439_v45 = vpop.f32.mrb[140].mxu0 }
 0xe69   :  { %6410 = vmatmul.mubr.msk.f32.vlgmr.msra.gmra.mrb[138].mxu0 %vm3847_vm3, %v5439_v45  ;;  %v7250_v47 = vpop.f32.mrb[141].mxu0  ;;  %v5878_v45 = vld [vmem:[%s10622_s12 + $0x20] sm:$0xff] }
 0xe6a   :  { %7252 = vmatpush3.msra.mxu0 %v10325_v16  ;;  %7253 = vmatprep.mubr.msk.f32.mxu0 %vm8364_vm2, %v8363_v32  ;;  %v5897_v47 = vld [vmem:[%s10622_s12 + $0xb8] sm:$0xff] }
 0xe6b   :  { %8208 = vmatprep.subr.bf16.mxu0 %v8207_v27  ;;  %v5895_v27 = vld [vmem:[%s10622_s12 + $0xa8] sm:$0xff] }
 0xe6c   :  { %v8247_v44 = vpack.c.bf16 %v5895_v27, %v5894_v17 }
 0xe6d   :  { %7254 = vmatmul.mubr.msk.f32.vlgmr.msra.gmra.mrb[142].mxu0 %vm5202_vm4, %v6411_v49  ;;  %v8249_v49 = vpack.c.bf16 %v5879_v46, %v5878_v45 }
 0xe6e   :  { %8210 = vmatpush1.bf16.msra.mxu0 %v8209_v51  ;;  %5695 = vmatprep.mubr.f32.mxu0 %v8363_v32  ;;  %v8251_v51 = vpack.c.bf16 %v5897_v47, %v5896_v0 }
 0xe6f   :  { %8212 = vmatprep.subr.bf16.mxu0 %v8211_v52  ;;  %8248 = vmatprep.subr.bf16.mxu1 %v8247_v44  ;;  %v5880_v52 = vld [vmem:[%s10622_s12 + $0x30] sm:$0xff] }
 0xe70   :  { %8250 = vmatpush3.bf16.msra.mxu1 %v8249_v49  ;;  %v8253_v55 = vpack.c.bf16 %v5881_v53, %v5880_v52 }
 0xe71   :  { %8252 = vmatprep.subr.bf16.mxu1 %v8251_v51 }
 0xe72   :  { %8214 = vmatpush1.bf16.msra.mxu0 %v8213_v56  ;;  %v8255_v56 = vpack.c.bf16 %v5899_v54, %v5898_v37 }
 0xe73   :  { %8216 = vmatprep.subr.bf16.mxu0 %v8215_v58  ;;  %v5882_v58 = vld [vmem:[%s10622_s12 + $0x40] sm:$0xff] }
 0xe74   :  { %8254 = vmatpush3.bf16.msra.mxu1 %v8253_v55  ;;  %v8257_v63 = vpack.c.bf16 %v5883_v59, %v5882_v58 }
 0xe75   :  { %8256 = vmatprep.subr.bf16.mxu1 %v8255_v56 }
 0xe76   :  { %8218 = vmatpush1.bf16.msra.mxu0 %v8217_v1  ;;  %v8259_v1 = vpack.c.bf16 %v5901_v62, %v5900_v61 }
 0xe77   :  { %8220 = vmatprep.subr.bf16.mxu0 %v8219_v2  ;;  %v5884_v2 = vld [vmem:[%s10622_s12 + $0x50] sm:$0xff] }
 0xe78   :  { %8258 = vmatpush3.bf16.msra.mxu1 %v8257_v63  ;;  %v8261_v8 = vpack.c.bf16 %v5885_v4, %v5884_v2 }
 0xe79   :  { %8260 = vmatprep.subr.bf16.mxu1 %v8259_v1 }
 0xe7a   :  { %8222 = vmatpush1.bf16.msra.mxu0 %v8221_v6  ;;  %v5903_v6 = vld [vmem:[%s10622_s12 + $0xe8] sm:$0xff] }
 0xe7b   :  { %7256 = vmatprep.subr.mxu0 %v8363_v32  ;;  %v8263_v9 = vpack.c.bf16 %v5903_v6, %v5902_v5 }
 0xe7c   :  { %8262 = vmatpush3.bf16.msra.mxu1 %v8261_v8 }
 0xe7d   :  { %8264 = vmatprep.subr.bf16.mxu1 %v8263_v9 }
 0xf40   :  { %v5607_v14 = vpop.f32.mrb[142].mxu0 }
 0xf41   :  { %6429 = vmatmul.mubr.msk.f32.vlgmr.msra.gmra.mrb[138].mxu0 %vm3847_vm3, %v5607_v14  ;;  %v7255_v20 = vpop.f32.mrb[143].mxu0  ;;  %v5887_v14 = vld [vmem:[%s10622_s12 + $0x68] sm:$0xff] }
 0xf42   :  { %7257 = vmatpush3.msra.mxu0 %v10325_v16  ;;  %7258 = vmatprep.mubr.msk.f32.mxu0 %vm8364_vm2, %v8363_v32  ;;  %v6441_v16 = vld [vmem:[%s10619_s10 + $0x1c8] sm:$0xff]  ;;  %v8265_v15 = vpack.c.bf16 %v5887_v14, %v5886_v13  ;;  %v5905_v20 = vld [vmem:[%s10622_s12 + $0xf8] sm:$0xff] }
 0xf43   :  { %8224 = vmatprep.subr.bf16.mxu0 %v8223_v10  ;;  %v8231_v33 = vpack.c.bf16 %v6443_v28, %v6441_v16  ;;  %v5190_v16 = vshrl.u32 %v5189_v25, 7 }
 0xf44   :  { %8266 = vmatpush3.bf16.msra.mxu1 %v8265_v15 }
 0xf45   :  { %7259 = vmatmul.mubr.msk.f32.vlgmr.msra.gmra.mrb[144].mxu0 %vm5202_vm4, %v6430_v26  ;;  %v8267_v26 = vpack.c.bf16 %v5905_v20, %v5904_v19  ;;  %v5191_v28 = vsub.s32 0, %v5190_v16 }
 0xf46   :  { %8226 = vmatpush1.bf16.msra.mxu0 %v8225_v23  ;;  %5863 = vmatprep.mubr.f32.mxu0 %v8363_v32  ;;  %v8233_v32 = vpack.c.bf16 %v6442_v34, %v6440_v38  ;;  %v5888_v23 = vld [vmem:[%s10622_s12 + $0x70] sm:$0xff] }
 0xf47   :  { %8228 = vmatprep.subr.bf16.mxu0 %v8227_v24  ;;  %v5889_v24 = vld [vmem:[%s10622_s12 + $0x78] sm:$0xff]  ;;  %8268 = vmatprep.subr.bf16.mxu1 %v8267_v26 }
 0xf48   :  { %v8269_v18 = vpack.c.bf16 %v5889_v24, %v5888_v23 }
 0xf4a   :  { %8230 = vmatpush1.bf16.msra.mxu0 %v8229_v29  ;;  %8270 = vmatpush3.bf16.msra.mxu1 %v8269_v18  ;;  %v5187_v29 = vld [vmem:[%s10623_s11] sm:$0x3] }
 0xf4b   :  { %8232 = vmatprep.subr.bf16.mxu0 %v8231_v33  ;;  %v5195_v33 = vsub.s32 1, %v5190_v16  ;;  %v5192_v38 = vrot.slane %v5187_v29, %v5191_v28 }
 0xf4d   :  { %v5196_v34 = vrot.slane %v5187_v29, %v5195_v33 }
 0xf4e   :  { %8234 = vmatpush1.bf16.msra.mxu0 %v8233_v32 }
 0xf4f   :  { %8236 = vmatprep.subr.bf16.mxu0 %v8235_v39 }
 0xf52   :  { %8238 = vmatpush1.bf16.msra.mxu0 %v8237_v42  ;;  %v19_v42 = vstv %s10624_s13 }
 0xf53   :  { %20 = vst [vmem:[#allocation2] sm:$0x1] %v19_v42 }
 0xf5a   :  { %v6449_v48 = vld [vmem:[#allocation2] ss:$0 sm:$0xff] }
0x1018   :  { %v5775_v10 = vpop.f32.mrb[144].mxu0 }
0x1019   :  { %6448 = vmatmul.mubr.msk.f32.vlgmr.msra.gmra.mrb[138].mxu0 %vm3847_vm3, %v5775_v10  ;;  %v7260_v11 = vpop.f32.mrb[145].mxu0 }
0x10ec   :  { %v5865_v35 = vpop.f32.mrb[138].mxu0 }
0x10ed   :  { %v8277_v36 = vadd.f32 %v5865_v35, %v5192_v38  ;;  %v5867_v32 = vpop.f32.mrb[139].mxu0 }
0x10ee   :  { %v8278_v39 = vadd.f32 %v5867_v32, %v5196_v34 }
0x10ef   :  { %v5872_v41 = vmax.f32 %v8277_v36, 0.0 }
0x10f0   :  { %v5873_v22 = vmax.f32 %v8278_v39, 0.0 }
0x10f2   :  { %5977 = vmatprep.mubr.f32.mxu1 %v5873_v22 }
0x10f3   :  { %5978 = vmatmul.mubr.f32.vlgmr.msra.gmra.mrb[68].mxu1 %v5872_v41 }
0x11c6   :  { %v6744_v43 = vpop.f32.mrb[68].mxu1 }
0x11c7   :  { %v6745_v57 = vpop.f32.mrb[69].mxu1 }
0x11c8   :  { %v6746_v3 = vadd.f32 %v6745_v57, %v6744_v43 }
0x11ca   :  { %v5980_v12 = vadd.f32 %v6746_v3, %v6449_v48 }
0x11cc   :  { %5984 = vst.msk [vmem:[%s10625_s14] sm:$0x3] %vm5983_vm5, %v5980_v12 }

</bundles_post_ra>
